<compile_context>
chip_gen: v7x
topology: tpu7x:2x2x1
jax: 0.10.0
libtpu: 0.0.40
codegen_flags: <defaults>
</compile_context>

<pallas_src>
import numpy as np

import jax
import jax.numpy as jnp
from jax.experimental import pallas as pl
from jax.experimental.pallas import tpu as pltpu

K = 3      # conv kernel size (kernel_size=3 in the module)
CP = 128   # lane-padded channel width (all real channel counts are <= 128)


# ----------------------------- kernel ---------------------------------------

def _cnn_kernel(x_ref, cw_ref, dw_ref, sp_ref, mask_ref, pool_ref, out_ref):
    # x_ref:    (N=B*L, CP)      lane-padded, flattened activations
    # cw_ref:   (8, 3*CP, CP)    im2col-packed conv weights (8 conv layers)
    # dw_ref:   (3, CP, CP)      padded dense weights
    # sp_ref:   (16, CP)         packed small params (biases, gamma/beta, eps row)
    # mask_ref: (N, 2)           col0: row is not first of its sample, col1: not last
    # pool_ref: (B, N)           per-sample mean-pooling matrix (1/L entries)
    # out_ref:  (B, CP)          sigmoid outputs (real output in lane 0)
    N = x_ref.shape[0]

    not_first = mask_ref[:, 0:1] > 0.0   # (N, 1)
    not_last = mask_ref[:, 1:2] > 0.0    # (N, 1)

    def conv_relu(h, idx):
        # shifted taps via XLU roll, zeroed at sample boundaries ('same' padding)
        hp = jnp.where(not_first, pltpu.roll(h, shift=1, axis=0), 0.0)       # h[l-1]
        hn = jnp.where(not_last, pltpu.roll(h, shift=N - 1, axis=0), 0.0)    # h[l+1]
        a = jnp.concatenate([hp, h, hn], axis=1)                             # (N, 3*CP)
        y = jnp.dot(a, cw_ref[idx], preferred_element_type=jnp.float32)
        y = y + sp_ref[idx:idx + 1, :]                                       # bias once
        return jnp.maximum(y, 0.0)                                           # ReLU

    h = x_ref[...]

    # ConvBlock 1: conv -> ReLU -> conv -> ReLU
    h = conv_relu(h, 0)
    h = conv_relu(h, 1)

    # BatchNorm1d(n_filters[0], eps=0) -- training-mode batch stats, one pass.
    gamma = sp_ref[8:9, :]
    beta = sp_ref[9:10, :]
    eps_pad = sp_ref[10:11, :]     # 0 on real channels (eps=0), 1 on padded channels
    inv_n = 1.0 / float(N)
    s = jnp.sum(h, axis=0, keepdims=True)
    ss = jnp.sum(h * h, axis=0, keepdims=True)
    m = s * inv_n
    var = jnp.maximum(ss * inv_n - m * m, 0.0)
    h = (h - m) * jax.lax.rsqrt(var + eps_pad) * gamma + beta

    # ConvBlocks 2-4
    for idx in range(2, 8):
        h = conv_relu(h, idx)

    # torch.mean(x, dim=-1): per-sample mean over the length axis, as a matmul
    pooled = jnp.dot(pool_ref[...], h, preferred_element_type=jnp.float32)   # (B, CP)

    # MLP head: Linear -> ReLU -> Linear -> ReLU -> Linear -> Sigmoid
    z = jnp.maximum(jnp.dot(pooled, dw_ref[0], preferred_element_type=jnp.float32)
                    + sp_ref[11:12, :], 0.0)
    z = jnp.maximum(jnp.dot(z, dw_ref[1], preferred_element_type=jnp.float32)
                    + sp_ref[12:13, :], 0.0)
    logits = jnp.dot(z, dw_ref[2], preferred_element_type=jnp.float32) + sp_ref[13:14, :]
    out_ref[...] = jax.nn.sigmoid(logits)


# ----------------------------- wrapper ---------------------------------------

def _full_spec(shape):
    nd = len(shape)
    return pl.BlockSpec(shape, lambda i, _nd=nd: (0,) * _nd)


def cnn_forward(x, conv_w, dense_w, small):
    """x: (B, L, C) float32 (PyTorch NCL input transposed to NLC)."""
    B, L, C = x.shape
    N = B * L

    # lane-pad channels to CP and flatten rows (done by XLA outside the kernel)
    xp = jnp.zeros((N, CP), jnp.float32).at[:, :C].set(x.reshape(N, C))

    # batch-boundary tap masks (trace-time constants)
    m = np.ones((N, 2), np.float32)
    m[0::L, 0] = 0.0        # first row of each sample has no left neighbor
    m[L - 1::L, 1] = 0.0    # last row of each sample has no right neighbor
    mask = jnp.asarray(m)

    # per-sample mean-pooling matrix
    p = np.zeros((B, N), np.float32)
    for b in range(B):
        p[b, b * L:(b + 1) * L] = 1.0 / L
    pool = jnp.asarray(p)

    args = [xp, conv_w, dense_w, small, mask, pool]
    out = pl.pallas_call(
        _cnn_kernel,
        out_shape=jax.ShapeDtypeStruct((B, CP), jnp.float32),
        grid=(1,),
        in_specs=[_full_spec(a.shape) for a in args],
        out_specs=pl.BlockSpec((B, CP), lambda i: (0, 0)),
        compiler_params=pltpu.CompilerParams(
            dimension_semantics=("arbitrary",),
            vmem_limit_bytes=32 * 1024 * 1024),
    )(*args)
    # single_output=True head: only lane 0 is a real output
    return out[:, :1]


# ----------------- deterministic parameter construction + packing ------------

def _init_conv(key, cin, cout):
    kw, kb = jax.random.split(key)
    fan_in, fan_out = cin * K, cout * K
    bw = float(np.sqrt(6.0 / (fan_in + fan_out)))   # xavier_uniform_
    w = jax.random.uniform(kw, (K, cin, cout), jnp.float32, -bw, bw)
    bb = float(1.0 / np.sqrt(fan_in))               # PyTorch default conv bias init
    b = jax.random.uniform(kb, (cout,), jnp.float32, -bb, bb)
    return w, b


def _init_linear(key, fin, fout):
    kw, kb = jax.random.split(key)
    bw = float(np.sqrt(6.0 / (fin + fout)))         # xavier_uniform_
    w = jax.random.uniform(kw, (fin, fout), jnp.float32, -bw, bw)
    bb = float(1.0 / np.sqrt(fin))                  # PyTorch default linear bias init
    b = jax.random.uniform(kb, (fout,), jnp.float32, -bb, bb)
    return w, b


def _pack_conv_w(w):
    # (K, cin, cout) -> im2col-packed, lane-padded (K*CP, CP)
    k, cin, cout = w.shape
    wp = jnp.zeros((K * CP, CP), jnp.float32)
    for i in range(k):
        wp = wp.at[i * CP:i * CP + cin, :cout].set(w[i])
    return wp


def _pack_dense_w(w):
    fin, fout = w.shape
    return jnp.zeros((CP, CP), jnp.float32).at[:fin, :fout].set(w)


def build_params(key, channels, n_filters, n_fc, sample_size=60, single_output=True):
    keys = jax.random.split(key, 11)
    f0, f1, f2, f3 = n_filters
    out_dim = 1 if single_output else sample_size

    conv_raw = []
    dims = [(channels, f0), (f0, f0), (f0, f1), (f1, f1),
            (f2 := f2, f2) if False else None]  # placeholder removed below
    conv_raw = [
        _init_conv(keys[0], channels, f0),
        _init_conv(keys[1], f0, f0),
        _init_conv(keys[2], f0, f1),
        _init_conv(keys[3], f1, f1),
        _init_conv(keys[4], f1, f2),
        _init_conv(keys[5], f2, f2),
        _init_conv(keys[6], f2, f3),
        _init_conv(keys[7], f3, f3),
    ]
    d1w, d1b = _init_linear(keys[8], f3, n_fc)
    d2w, d2b = _init_linear(keys[9], n_fc, n_fc)
    dow, dob = _init_linear(keys[10], n_fc, out_dim)

    conv_w = jnp.stack([_pack_conv_w(w) for w, _ in conv_raw])            # (8, 3*CP, CP)
    dense_w = jnp.stack([_pack_dense_w(w) for w in (d1w, d2w, dow)])      # (3, CP, CP)

    small = jnp.zeros((16, CP), jnp.float32)
    for i, (_, b) in enumerate(conv_raw):                                 # rows 0-7: conv biases
        small = small.at[i, :b.shape[0]].set(b)
    small = small.at[8, :].set(1.0)                                       # gamma (init_bn weight=1)
    # row 9: beta = 0 (init_bn bias=0) -- already zero
    small = small.at[10, f0:].set(1.0)                                    # variance guard, padded BN channels
    small = small.at[11, :d1b.shape[0]].set(d1b)
    small = small.at[12, :d2b.shape[0]].set(d2b)
    small = small.at[13, :dob.shape[0]].set(dob)
    return conv_w, dense_w, small


if __name__ == "__main__":
    key = jax.random.PRNGKey(0)
    pkey, xkey = jax.random.split(key)

    # small shapes consistent with cnn_class(channels=2, sample_size=L, ...)
    B, C, L = 4, 2, 24
    n_filters = [8, 16, 32, 64]
    n_fc = 32

    conv_w, dense_w, small = build_params(pkey, C, n_filters, n_fc,
                                          sample_size=L, single_output=True)

    x_ncl = jax.random.normal(xkey, (B, C, L), jnp.float32)   # PyTorch NCL input
    x_nlc = jnp.transpose(x_ncl, (0, 2, 1))                   # kernel layout (B, L, C)

    y = jax.jit(cnn_forward)(x_nlc, conv_w, dense_w, small)
    y = jax.block_until_ready(y)
    assert y.shape == (B, 1) and bool(jnp.all(jnp.isfinite(y)))
    print("KERNEL_OK")
</pallas_src>

<mosaic_0001>
module attributes {stable_mosaic.version = 11 : i64} {
  func.func @_cnn_kernel(%arg0: i32, %arg1: memref<96x128xf32, #tpu.memory_space<vmem>>, %arg2: memref<8x384x128xf32, #tpu.memory_space<vmem>>, %arg3: memref<3x128x128xf32, #tpu.memory_space<vmem>>, %arg4: memref<16x128xf32, #tpu.memory_space<vmem>>, %arg5: memref<96x2xf32, #tpu.memory_space<vmem>>, %arg6: memref<4x96xf32, #tpu.memory_space<vmem>>, %arg7: memref<4x128xf32, #tpu.memory_space<vmem>>) attributes {dimension_semantics = [#tpu.dimension_semantics<arbitrary>], iteration_bounds = array<i64: 1>, scalar_prefetch = 0 : i64, scratch_operands = 0 : i64, tpu.core_type = #tpu.core_type<tc>, window_params = [{pipeline_mode = #tpu.pipeline_mode<synchronous>, transform_indices = @transform_0, window_bounds = array<i64: 96, 128>}, {pipeline_mode = #tpu.pipeline_mode<synchronous>, transform_indices = @transform_1, window_bounds = array<i64: 8, 384, 128>}, {pipeline_mode = #tpu.pipeline_mode<synchronous>, transform_indices = @transform_2, window_bounds = array<i64: 3, 128, 128>}, {pipeline_mode = #tpu.pipeline_mode<synchronous>, transform_indices = @transform_3, window_bounds = array<i64: 16, 128>}, {pipeline_mode = #tpu.pipeline_mode<synchronous>, transform_indices = @transform_4, window_bounds = array<i64: 96, 2>}, {pipeline_mode = #tpu.pipeline_mode<synchronous>, transform_indices = @transform_5, window_bounds = array<i64: 4, 96>}, {pipeline_mode = #tpu.pipeline_mode<synchronous>, transform_indices = @transform_6, window_bounds = array<i64: 4, 128>}]} {
    %c0 = arith.constant 0 : index
    %c0_0 = arith.constant 0 : index
    %0 = vector.load %arg5[%c0, %c0_0] : memref<96x2xf32, #tpu.memory_space<vmem>>, vector<96x1xf32>
    %cst = arith.constant 0.000000e+00 : f32
    %1 = vector.broadcast %cst : f32 to vector<96x1xf32>
    %2 = arith.cmpf ogt, %0, %1 : vector<96x1xf32>
    %c0_1 = arith.constant 0 : index
    %c1 = arith.constant 1 : index
    %3 = vector.load %arg5[%c0_1, %c1] : memref<96x2xf32, #tpu.memory_space<vmem>>, vector<96x1xf32>
    %cst_2 = arith.constant 0.000000e+00 : f32
    %4 = vector.broadcast %cst_2 : f32 to vector<96x1xf32>
    %5 = arith.cmpf ogt, %3, %4 : vector<96x1xf32>
    %c0_3 = arith.constant 0 : index
    %c0_4 = arith.constant 0 : index
    %6 = vector.load %arg1[%c0_3, %c0_4] : memref<96x128xf32, #tpu.memory_space<vmem>>, vector<96x128xf32>
    %c1_i32 = arith.constant 1 : i32
    %7 = tpu.dynamic_rotate %6 by %c1_i32 dim 0 : vector<96x128xf32>, i32 -> vector<96x128xf32>
    %cst_5 = arith.constant 0.000000e+00 : f32
    %8 = vector.shape_cast %2 : vector<96x1xi1> to vector<96x1xi1>
    %9 = vector.broadcast %8 : vector<96x1xi1> to vector<96x128xi1>
    %10 = vector.broadcast %cst_5 : f32 to vector<96x128xf32>
    %11 = arith.select %9, %7, %10 : vector<96x128xi1>, vector<96x128xf32>
    %c95_i32 = arith.constant 95 : i32
    %12 = tpu.dynamic_rotate %6 by %c95_i32 dim 0 : vector<96x128xf32>, i32 -> vector<96x128xf32>
    %cst_6 = arith.constant 0.000000e+00 : f32
    %13 = vector.shape_cast %5 : vector<96x1xi1> to vector<96x1xi1>
    %14 = vector.broadcast %13 : vector<96x1xi1> to vector<96x128xi1>
    %15 = vector.broadcast %cst_6 : f32 to vector<96x128xf32>
    %16 = arith.select %14, %12, %15 : vector<96x128xi1>, vector<96x128xf32>
    %17 = tpu.concatenate %11, %6, %16 in 1 : vector<96x128xf32>, vector<96x128xf32>, vector<96x128xf32> -> vector<96x384xf32>
    %c0_7 = arith.constant 0 : index
    %c0_8 = arith.constant 0 : index
    %c0_9 = arith.constant 0 : index
    %18 = vector.load %arg2[%c0_7, %c0_8, %c0_9] : memref<8x384x128xf32, #tpu.memory_space<vmem>>, vector<1x384x128xf32>
    %19 = vector.shape_cast %18 : vector<1x384x128xf32> to vector<384x128xf32>
    %cst_10 = arith.constant dense<0.000000e+00> : vector<96x128xf32>
    %20 = tpu.matmul %17, %19, %cst_10 {dimension_numbers = #tpu.dot_dimension_numbers<[1], [0], [0], [1], [0, 0, 1, 1], [], []>} : vector<96x384xf32>, vector<384x128xf32>, vector<96x128xf32> -> vector<96x128xf32>
    %c0_11 = arith.constant 0 : index
    %c0_12 = arith.constant 0 : index
    %21 = vector.load %arg4[%c0_11, %c0_12] : memref<16x128xf32, #tpu.memory_space<vmem>>, vector<1x128xf32>
    %22 = vector.broadcast %21 : vector<1x128xf32> to vector<96x128xf32>
    %23 = arith.addf %20, %22 : vector<96x128xf32>
    %cst_13 = arith.constant 0.000000e+00 : f32
    %24 = vector.broadcast %cst_13 : f32 to vector<96x128xf32>
    %25 = arith.maximumf %23, %24 : vector<96x128xf32>
    %c1_i32_14 = arith.constant 1 : i32
    %26 = tpu.dynamic_rotate %25 by %c1_i32_14 dim 0 : vector<96x128xf32>, i32 -> vector<96x128xf32>
    %cst_15 = arith.constant 0.000000e+00 : f32
    %27 = vector.shape_cast %2 : vector<96x1xi1> to vector<96x1xi1>
    %28 = vector.broadcast %27 : vector<96x1xi1> to vector<96x128xi1>
    %29 = vector.broadcast %cst_15 : f32 to vector<96x128xf32>
    %30 = arith.select %28, %26, %29 : vector<96x128xi1>, vector<96x128xf32>
    %c95_i32_16 = arith.constant 95 : i32
    %31 = tpu.dynamic_rotate %25 by %c95_i32_16 dim 0 : vector<96x128xf32>, i32 -> vector<96x128xf32>
    %cst_17 = arith.constant 0.000000e+00 : f32
    %32 = vector.shape_cast %5 : vector<96x1xi1> to vector<96x1xi1>
    %33 = vector.broadcast %32 : vector<96x1xi1> to vector<96x128xi1>
    %34 = vector.broadcast %cst_17 : f32 to vector<96x128xf32>
    %35 = arith.select %33, %31, %34 : vector<96x128xi1>, vector<96x128xf32>
    %36 = tpu.concatenate %30, %25, %35 in 1 : vector<96x128xf32>, vector<96x128xf32>, vector<96x128xf32> -> vector<96x384xf32>
    %c1_18 = arith.constant 1 : index
    %c0_19 = arith.constant 0 : index
    %c0_20 = arith.constant 0 : index
    %37 = vector.load %arg2[%c1_18, %c0_19, %c0_20] : memref<8x384x128xf32, #tpu.memory_space<vmem>>, vector<1x384x128xf32>
    %38 = vector.shape_cast %37 : vector<1x384x128xf32> to vector<384x128xf32>
    %cst_21 = arith.constant dense<0.000000e+00> : vector<96x128xf32>
    %39 = tpu.matmul %36, %38, %cst_21 {dimension_numbers = #tpu.dot_dimension_numbers<[1], [0], [0], [1], [0, 0, 1, 1], [], []>} : vector<96x384xf32>, vector<384x128xf32>, vector<96x128xf32> -> vector<96x128xf32>
    %c1_22 = arith.constant 1 : index
    %c0_23 = arith.constant 0 : index
    %40 = vector.load %arg4[%c1_22, %c0_23] : memref<16x128xf32, #tpu.memory_space<vmem>>, vector<1x128xf32>
    %41 = vector.broadcast %40 : vector<1x128xf32> to vector<96x128xf32>
    %42 = arith.addf %39, %41 : vector<96x128xf32>
    %cst_24 = arith.constant 0.000000e+00 : f32
    %43 = vector.broadcast %cst_24 : f32 to vector<96x128xf32>
    %44 = arith.maximumf %42, %43 : vector<96x128xf32>
    %c8 = arith.constant 8 : index
    %c0_25 = arith.constant 0 : index
    %45 = vector.load %arg4[%c8, %c0_25] : memref<16x128xf32, #tpu.memory_space<vmem>>, vector<1x128xf32>
    %c9 = arith.constant 9 : index
    %c0_26 = arith.constant 0 : index
    %46 = vector.load %arg4[%c9, %c0_26] : memref<16x128xf32, #tpu.memory_space<vmem>>, vector<1x128xf32>
    %c10 = arith.constant 10 : index
    %c0_27 = arith.constant 0 : index
    %47 = vector.load %arg4[%c10, %c0_27] : memref<16x128xf32, #tpu.memory_space<vmem>>, vector<1x128xf32>
    %cst_28 = arith.constant dense<0.000000e+00> : vector<128xf32>
    %48 = vector.multi_reduction <add>, %44, %cst_28 [0] : vector<96x128xf32> to vector<128xf32>
    %49 = vector.shape_cast %48 : vector<128xf32> to vector<1x128xf32>
    %50 = arith.mulf %44, %44 : vector<96x128xf32>
    %cst_29 = arith.constant dense<0.000000e+00> : vector<128xf32>
    %51 = vector.multi_reduction <add>, %50, %cst_29 [0] : vector<96x128xf32> to vector<128xf32>
    %52 = vector.shape_cast %51 : vector<128xf32> to vector<1x128xf32>
    %cst_30 = arith.constant 0.010416667 : f32
    %53 = vector.broadcast %cst_30 : f32 to vector<1x128xf32>
    %54 = arith.mulf %49, %53 : vector<1x128xf32>
    %cst_31 = arith.constant 0.010416667 : f32
    %55 = vector.broadcast %cst_31 : f32 to vector<1x128xf32>
    %56 = arith.mulf %52, %55 : vector<1x128xf32>
    %57 = arith.mulf %54, %54 : vector<1x128xf32>
    %58 = arith.subf %56, %57 : vector<1x128xf32>
    %cst_32 = arith.constant 0.000000e+00 : f32
    %59 = vector.broadcast %cst_32 : f32 to vector<1x128xf32>
    %60 = arith.maximumf %58, %59 : vector<1x128xf32>
    %61 = vector.broadcast %54 : vector<1x128xf32> to vector<96x128xf32>
    %62 = arith.subf %44, %61 : vector<96x128xf32>
    %63 = arith.addf %60, %47 : vector<1x128xf32>
    %64 = math.rsqrt %63 : vector<1x128xf32>
    %65 = vector.broadcast %64 : vector<1x128xf32> to vector<96x128xf32>
    %66 = arith.mulf %62, %65 : vector<96x128xf32>
    %67 = vector.broadcast %45 : vector<1x128xf32> to vector<96x128xf32>
    %68 = arith.mulf %66, %67 : vector<96x128xf32>
    %69 = vector.broadcast %46 : vector<1x128xf32> to vector<96x128xf32>
    %70 = arith.addf %68, %69 : vector<96x128xf32>
    %c1_i32_33 = arith.constant 1 : i32
    %71 = tpu.dynamic_rotate %70 by %c1_i32_33 dim 0 : vector<96x128xf32>, i32 -> vector<96x128xf32>
    %cst_34 = arith.constant 0.000000e+00 : f32
    %72 = vector.shape_cast %2 : vector<96x1xi1> to vector<96x1xi1>
    %73 = vector.broadcast %72 : vector<96x1xi1> to vector<96x128xi1>
    %74 = vector.broadcast %cst_34 : f32 to vector<96x128xf32>
    %75 = arith.select %73, %71, %74 : vector<96x128xi1>, vector<96x128xf32>
    %c95_i32_35 = arith.constant 95 : i32
    %76 = tpu.dynamic_rotate %70 by %c95_i32_35 dim 0 : vector<96x128xf32>, i32 -> vector<96x128xf32>
    %cst_36 = arith.constant 0.000000e+00 : f32
    %77 = vector.shape_cast %5 : vector<96x1xi1> to vector<96x1xi1>
    %78 = vector.broadcast %77 : vector<96x1xi1> to vector<96x128xi1>
    %79 = vector.broadcast %cst_36 : f32 to vector<96x128xf32>
    %80 = arith.select %78, %76, %79 : vector<96x128xi1>, vector<96x128xf32>
    %81 = tpu.concatenate %75, %70, %80 in 1 : vector<96x128xf32>, vector<96x128xf32>, vector<96x128xf32> -> vector<96x384xf32>
    %c2 = arith.constant 2 : index
    %c0_37 = arith.constant 0 : index
    %c0_38 = arith.constant 0 : index
    %82 = vector.load %arg2[%c2, %c0_37, %c0_38] : memref<8x384x128xf32, #tpu.memory_space<vmem>>, vector<1x384x128xf32>
    %83 = vector.shape_cast %82 : vector<1x384x128xf32> to vector<384x128xf32>
    %cst_39 = arith.constant dense<0.000000e+00> : vector<96x128xf32>
    %84 = tpu.matmul %81, %83, %cst_39 {dimension_numbers = #tpu.dot_dimension_numbers<[1], [0], [0], [1], [0, 0, 1, 1], [], []>} : vector<96x384xf32>, vector<384x128xf32>, vector<96x128xf32> -> vector<96x128xf32>
    %c2_40 = arith.constant 2 : index
    %c0_41 = arith.constant 0 : index
    %85 = vector.load %arg4[%c2_40, %c0_41] : memref<16x128xf32, #tpu.memory_space<vmem>>, vector<1x128xf32>
    %86 = vector.broadcast %85 : vector<1x128xf32> to vector<96x128xf32>
    %87 = arith.addf %84, %86 : vector<96x128xf32>
    %cst_42 = arith.constant 0.000000e+00 : f32
    %88 = vector.broadcast %cst_42 : f32 to vector<96x128xf32>
    %89 = arith.maximumf %87, %88 : vector<96x128xf32>
    %c1_i32_43 = arith.constant 1 : i32
    %90 = tpu.dynamic_rotate %89 by %c1_i32_43 dim 0 : vector<96x128xf32>, i32 -> vector<96x128xf32>
    %cst_44 = arith.constant 0.000000e+00 : f32
    %91 = vector.shape_cast %2 : vector<96x1xi1> to vector<96x1xi1>
    %92 = vector.broadcast %91 : vector<96x1xi1> to vector<96x128xi1>
    %93 = vector.broadcast %cst_44 : f32 to vector<96x128xf32>
    %94 = arith.select %92, %90, %93 : vector<96x128xi1>, vector<96x128xf32>
    %c95_i32_45 = arith.constant 95 : i32
    %95 = tpu.dynamic_rotate %89 by %c95_i32_45 dim 0 : vector<96x128xf32>, i32 -> vector<96x128xf32>
    %cst_46 = arith.constant 0.000000e+00 : f32
    %96 = vector.shape_cast %5 : vector<96x1xi1> to vector<96x1xi1>
    %97 = vector.broadcast %96 : vector<96x1xi1> to vector<96x128xi1>
    %98 = vector.broadcast %cst_46 : f32 to vector<96x128xf32>
    %99 = arith.select %97, %95, %98 : vector<96x128xi1>, vector<96x128xf32>
    %100 = tpu.concatenate %94, %89, %99 in 1 : vector<96x128xf32>, vector<96x128xf32>, vector<96x128xf32> -> vector<96x384xf32>
    %c3 = arith.constant 3 : index
    %c0_47 = arith.constant 0 : index
    %c0_48 = arith.constant 0 : index
    %101 = vector.load %arg2[%c3, %c0_47, %c0_48] : memref<8x384x128xf32, #tpu.memory_space<vmem>>, vector<1x384x128xf32>
    %102 = vector.shape_cast %101 : vector<1x384x128xf32> to vector<384x128xf32>
    %cst_49 = arith.constant dense<0.000000e+00> : vector<96x128xf32>
    %103 = tpu.matmul %100, %102, %cst_49 {dimension_numbers = #tpu.dot_dimension_numbers<[1], [0], [0], [1], [0, 0, 1, 1], [], []>} : vector<96x384xf32>, vector<384x128xf32>, vector<96x128xf32> -> vector<96x128xf32>
    %c3_50 = arith.constant 3 : index
    %c0_51 = arith.constant 0 : index
    %104 = vector.load %arg4[%c3_50, %c0_51] : memref<16x128xf32, #tpu.memory_space<vmem>>, vector<1x128xf32>
    %105 = vector.broadcast %104 : vector<1x128xf32> to vector<96x128xf32>
    %106 = arith.addf %103, %105 : vector<96x128xf32>
    %cst_52 = arith.constant 0.000000e+00 : f32
    %107 = vector.broadcast %cst_52 : f32 to vector<96x128xf32>
    %108 = arith.maximumf %106, %107 : vector<96x128xf32>
    %c1_i32_53 = arith.constant 1 : i32
    %109 = tpu.dynamic_rotate %108 by %c1_i32_53 dim 0 : vector<96x128xf32>, i32 -> vector<96x128xf32>
    %cst_54 = arith.constant 0.000000e+00 : f32
    %110 = vector.shape_cast %2 : vector<96x1xi1> to vector<96x1xi1>
    %111 = vector.broadcast %110 : vector<96x1xi1> to vector<96x128xi1>
    %112 = vector.broadcast %cst_54 : f32 to vector<96x128xf32>
    %113 = arith.select %111, %109, %112 : vector<96x128xi1>, vector<96x128xf32>
    %c95_i32_55 = arith.constant 95 : i32
    %114 = tpu.dynamic_rotate %108 by %c95_i32_55 dim 0 : vector<96x128xf32>, i32 -> vector<96x128xf32>
    %cst_56 = arith.constant 0.000000e+00 : f32
    %115 = vector.shape_cast %5 : vector<96x1xi1> to vector<96x1xi1>
    %116 = vector.broadcast %115 : vector<96x1xi1> to vector<96x128xi1>
    %117 = vector.broadcast %cst_56 : f32 to vector<96x128xf32>
    %118 = arith.select %116, %114, %117 : vector<96x128xi1>, vector<96x128xf32>
    %119 = tpu.concatenate %113, %108, %118 in 1 : vector<96x128xf32>, vector<96x128xf32>, vector<96x128xf32> -> vector<96x384xf32>
    %c4 = arith.constant 4 : index
    %c0_57 = arith.constant 0 : index
    %c0_58 = arith.constant 0 : index
    %120 = vector.load %arg2[%c4, %c0_57, %c0_58] : memref<8x384x128xf32, #tpu.memory_space<vmem>>, vector<1x384x128xf32>
    %121 = vector.shape_cast %120 : vector<1x384x128xf32> to vector<384x128xf32>
    %cst_59 = arith.constant dense<0.000000e+00> : vector<96x128xf32>
    %122 = tpu.matmul %119, %121, %cst_59 {dimension_numbers = #tpu.dot_dimension_numbers<[1], [0], [0], [1], [0, 0, 1, 1], [], []>} : vector<96x384xf32>, vector<384x128xf32>, vector<96x128xf32> -> vector<96x128xf32>
    %c4_60 = arith.constant 4 : index
    %c0_61 = arith.constant 0 : index
    %123 = vector.load %arg4[%c4_60, %c0_61] : memref<16x128xf32, #tpu.memory_space<vmem>>, vector<1x128xf32>
    %124 = vector.broadcast %123 : vector<1x128xf32> to vector<96x128xf32>
    %125 = arith.addf %122, %124 : vector<96x128xf32>
    %cst_62 = arith.constant 0.000000e+00 : f32
    %126 = vector.broadcast %cst_62 : f32 to vector<96x128xf32>
    %127 = arith.maximumf %125, %126 : vector<96x128xf32>
    %c1_i32_63 = arith.constant 1 : i32
    %128 = tpu.dynamic_rotate %127 by %c1_i32_63 dim 0 : vector<96x128xf32>, i32 -> vector<96x128xf32>
    %cst_64 = arith.constant 0.000000e+00 : f32
    %129 = vector.shape_cast %2 : vector<96x1xi1> to vector<96x1xi1>
    %130 = vector.broadcast %129 : vector<96x1xi1> to vector<96x128xi1>
    %131 = vector.broadcast %cst_64 : f32 to vector<96x128xf32>
    %132 = arith.select %130, %128, %131 : vector<96x128xi1>, vector<96x128xf32>
    %c95_i32_65 = arith.constant 95 : i32
    %133 = tpu.dynamic_rotate %127 by %c95_i32_65 dim 0 : vector<96x128xf32>, i32 -> vector<96x128xf32>
    %cst_66 = arith.constant 0.000000e+00 : f32
    %134 = vector.shape_cast %5 : vector<96x1xi1> to vector<96x1xi1>
    %135 = vector.broadcast %134 : vector<96x1xi1> to vector<96x128xi1>
    %136 = vector.broadcast %cst_66 : f32 to vector<96x128xf32>
    %137 = arith.select %135, %133, %136 : vector<96x128xi1>, vector<96x128xf32>
    %138 = tpu.concatenate %132, %127, %137 in 1 : vector<96x128xf32>, vector<96x128xf32>, vector<96x128xf32> -> vector<96x384xf32>
    %c5 = arith.constant 5 : index
    %c0_67 = arith.constant 0 : index
    %c0_68 = arith.constant 0 : index
    %139 = vector.load %arg2[%c5, %c0_67, %c0_68] : memref<8x384x128xf32, #tpu.memory_space<vmem>>, vector<1x384x128xf32>
    %140 = vector.shape_cast %139 : vector<1x384x128xf32> to vector<384x128xf32>
    %cst_69 = arith.constant dense<0.000000e+00> : vector<96x128xf32>
    %141 = tpu.matmul %138, %140, %cst_69 {dimension_numbers = #tpu.dot_dimension_numbers<[1], [0], [0], [1], [0, 0, 1, 1], [], []>} : vector<96x384xf32>, vector<384x128xf32>, vector<96x128xf32> -> vector<96x128xf32>
    %c5_70 = arith.constant 5 : index
    %c0_71 = arith.constant 0 : index
    %142 = vector.load %arg4[%c5_70, %c0_71] : memref<16x128xf32, #tpu.memory_space<vmem>>, vector<1x128xf32>
    %143 = vector.broadcast %142 : vector<1x128xf32> to vector<96x128xf32>
    %144 = arith.addf %141, %143 : vector<96x128xf32>
    %cst_72 = arith.constant 0.000000e+00 : f32
    %145 = vector.broadcast %cst_72 : f32 to vector<96x128xf32>
    %146 = arith.maximumf %144, %145 : vector<96x128xf32>
    %c1_i32_73 = arith.constant 1 : i32
    %147 = tpu.dynamic_rotate %146 by %c1_i32_73 dim 0 : vector<96x128xf32>, i32 -> vector<96x128xf32>
    %cst_74 = arith.constant 0.000000e+00 : f32
    %148 = vector.shape_cast %2 : vector<96x1xi1> to vector<96x1xi1>
    %149 = vector.broadcast %148 : vector<96x1xi1> to vector<96x128xi1>
    %150 = vector.broadcast %cst_74 : f32 to vector<96x128xf32>
    %151 = arith.select %149, %147, %150 : vector<96x128xi1>, vector<96x128xf32>
    %c95_i32_75 = arith.constant 95 : i32
    %152 = tpu.dynamic_rotate %146 by %c95_i32_75 dim 0 : vector<96x128xf32>, i32 -> vector<96x128xf32>
    %cst_76 = arith.constant 0.000000e+00 : f32
    %153 = vector.shape_cast %5 : vector<96x1xi1> to vector<96x1xi1>
    %154 = vector.broadcast %153 : vector<96x1xi1> to vector<96x128xi1>
    %155 = vector.broadcast %cst_76 : f32 to vector<96x128xf32>
    %156 = arith.select %154, %152, %155 : vector<96x128xi1>, vector<96x128xf32>
    %157 = tpu.concatenate %151, %146, %156 in 1 : vector<96x128xf32>, vector<96x128xf32>, vector<96x128xf32> -> vector<96x384xf32>
    %c6 = arith.constant 6 : index
    %c0_77 = arith.constant 0 : index
    %c0_78 = arith.constant 0 : index
    %158 = vector.load %arg2[%c6, %c0_77, %c0_78] : memref<8x384x128xf32, #tpu.memory_space<vmem>>, vector<1x384x128xf32>
    %159 = vector.shape_cast %158 : vector<1x384x128xf32> to vector<384x128xf32>
    %cst_79 = arith.constant dense<0.000000e+00> : vector<96x128xf32>
    %160 = tpu.matmul %157, %159, %cst_79 {dimension_numbers = #tpu.dot_dimension_numbers<[1], [0], [0], [1], [0, 0, 1, 1], [], []>} : vector<96x384xf32>, vector<384x128xf32>, vector<96x128xf32> -> vector<96x128xf32>
    %c6_80 = arith.constant 6 : index
    %c0_81 = arith.constant 0 : index
    %161 = vector.load %arg4[%c6_80, %c0_81] : memref<16x128xf32, #tpu.memory_space<vmem>>, vector<1x128xf32>
    %162 = vector.broadcast %161 : vector<1x128xf32> to vector<96x128xf32>
    %163 = arith.addf %160, %162 : vector<96x128xf32>
    %cst_82 = arith.constant 0.000000e+00 : f32
    %164 = vector.broadcast %cst_82 : f32 to vector<96x128xf32>
    %165 = arith.maximumf %163, %164 : vector<96x128xf32>
    %c1_i32_83 = arith.constant 1 : i32
    %166 = tpu.dynamic_rotate %165 by %c1_i32_83 dim 0 : vector<96x128xf32>, i32 -> vector<96x128xf32>
    %cst_84 = arith.constant 0.000000e+00 : f32
    %167 = vector.shape_cast %2 : vector<96x1xi1> to vector<96x1xi1>
    %168 = vector.broadcast %167 : vector<96x1xi1> to vector<96x128xi1>
    %169 = vector.broadcast %cst_84 : f32 to vector<96x128xf32>
    %170 = arith.select %168, %166, %169 : vector<96x128xi1>, vector<96x128xf32>
    %c95_i32_85 = arith.constant 95 : i32
    %171 = tpu.dynamic_rotate %165 by %c95_i32_85 dim 0 : vector<96x128xf32>, i32 -> vector<96x128xf32>
    %cst_86 = arith.constant 0.000000e+00 : f32
    %172 = vector.shape_cast %5 : vector<96x1xi1> to vector<96x1xi1>
    %173 = vector.broadcast %172 : vector<96x1xi1> to vector<96x128xi1>
    %174 = vector.broadcast %cst_86 : f32 to vector<96x128xf32>
    %175 = arith.select %173, %171, %174 : vector<96x128xi1>, vector<96x128xf32>
    %176 = tpu.concatenate %170, %165, %175 in 1 : vector<96x128xf32>, vector<96x128xf32>, vector<96x128xf32> -> vector<96x384xf32>
    %c7 = arith.constant 7 : index
    %c0_87 = arith.constant 0 : index
    %c0_88 = arith.constant 0 : index
    %177 = vector.load %arg2[%c7, %c0_87, %c0_88] : memref<8x384x128xf32, #tpu.memory_space<vmem>>, vector<1x384x128xf32>
    %178 = vector.shape_cast %177 : vector<1x384x128xf32> to vector<384x128xf32>
    %cst_89 = arith.constant dense<0.000000e+00> : vector<96x128xf32>
    %179 = tpu.matmul %176, %178, %cst_89 {dimension_numbers = #tpu.dot_dimension_numbers<[1], [0], [0], [1], [0, 0, 1, 1], [], []>} : vector<96x384xf32>, vector<384x128xf32>, vector<96x128xf32> -> vector<96x128xf32>
    %c7_90 = arith.constant 7 : index
    %c0_91 = arith.constant 0 : index
    %180 = vector.load %arg4[%c7_90, %c0_91] : memref<16x128xf32, #tpu.memory_space<vmem>>, vector<1x128xf32>
    %181 = vector.broadcast %180 : vector<1x128xf32> to vector<96x128xf32>
    %182 = arith.addf %179, %181 : vector<96x128xf32>
    %cst_92 = arith.constant 0.000000e+00 : f32
    %183 = vector.broadcast %cst_92 : f32 to vector<96x128xf32>
    %184 = arith.maximumf %182, %183 : vector<96x128xf32>
    %c0_93 = arith.constant 0 : index
    %c0_94 = arith.constant 0 : index
    %185 = vector.load %arg6[%c0_93, %c0_94] : memref<4x96xf32, #tpu.memory_space<vmem>>, vector<4x96xf32>
    %cst_95 = arith.constant dense<0.000000e+00> : vector<4x128xf32>
    %186 = tpu.matmul %185, %184, %cst_95 {dimension_numbers = #tpu.dot_dimension_numbers<[1], [0], [0], [1], [0, 0, 1, 1], [], []>} : vector<4x96xf32>, vector<96x128xf32>, vector<4x128xf32> -> vector<4x128xf32>
    %c0_96 = arith.constant 0 : index
    %c0_97 = arith.constant 0 : index
    %c0_98 = arith.constant 0 : index
    %187 = vector.load %arg3[%c0_96, %c0_97, %c0_98] : memref<3x128x128xf32, #tpu.memory_space<vmem>>, vector<1x128x128xf32>
    %188 = vector.shape_cast %187 : vector<1x128x128xf32> to vector<128x128xf32>
    %cst_99 = arith.constant dense<0.000000e+00> : vector<4x128xf32>
    %189 = tpu.matmul %186, %188, %cst_99 {dimension_numbers = #tpu.dot_dimension_numbers<[1], [0], [0], [1], [0, 0, 1, 1], [], []>} : vector<4x128xf32>, vector<128x128xf32>, vector<4x128xf32> -> vector<4x128xf32>
    %c11 = arith.constant 11 : index
    %c0_100 = arith.constant 0 : index
    %190 = vector.load %arg4[%c11, %c0_100] : memref<16x128xf32, #tpu.memory_space<vmem>>, vector<1x128xf32>
    %191 = vector.broadcast %190 : vector<1x128xf32> to vector<4x128xf32>
    %192 = arith.addf %189, %191 : vector<4x128xf32>
    %cst_101 = arith.constant 0.000000e+00 : f32
    %193 = vector.broadcast %cst_101 : f32 to vector<4x128xf32>
    %194 = arith.maximumf %192, %193 : vector<4x128xf32>
    %c1_102 = arith.constant 1 : index
    %c0_103 = arith.constant 0 : index
    %c0_104 = arith.constant 0 : index
    %195 = vector.load %arg3[%c1_102, %c0_103, %c0_104] : memref<3x128x128xf32, #tpu.memory_space<vmem>>, vector<1x128x128xf32>
    %196 = vector.shape_cast %195 : vector<1x128x128xf32> to vector<128x128xf32>
    %cst_105 = arith.constant dense<0.000000e+00> : vector<4x128xf32>
    %197 = tpu.matmul %194, %196, %cst_105 {dimension_numbers = #tpu.dot_dimension_numbers<[1], [0], [0], [1], [0, 0, 1, 1], [], []>} : vector<4x128xf32>, vector<128x128xf32>, vector<4x128xf32> -> vector<4x128xf32>
    %c12 = arith.constant 12 : index
    %c0_106 = arith.constant 0 : index
    %198 = vector.load %arg4[%c12, %c0_106] : memref<16x128xf32, #tpu.memory_space<vmem>>, vector<1x128xf32>
    %199 = vector.broadcast %198 : vector<1x128xf32> to vector<4x128xf32>
    %200 = arith.addf %197, %199 : vector<4x128xf32>
    %cst_107 = arith.constant 0.000000e+00 : f32
    %201 = vector.broadcast %cst_107 : f32 to vector<4x128xf32>
    %202 = arith.maximumf %200, %201 : vector<4x128xf32>
    %c2_108 = arith.constant 2 : index
    %c0_109 = arith.constant 0 : index
    %c0_110 = arith.constant 0 : index
    %203 = vector.load %arg3[%c2_108, %c0_109, %c0_110] : memref<3x128x128xf32, #tpu.memory_space<vmem>>, vector<1x128x128xf32>
    %204 = vector.shape_cast %203 : vector<1x128x128xf32> to vector<128x128xf32>
    %cst_111 = arith.constant dense<0.000000e+00> : vector<4x128xf32>
    %205 = tpu.matmul %202, %204, %cst_111 {dimension_numbers = #tpu.dot_dimension_numbers<[1], [0], [0], [1], [0, 0, 1, 1], [], []>} : vector<4x128xf32>, vector<128x128xf32>, vector<4x128xf32> -> vector<4x128xf32>
    %c13 = arith.constant 13 : index
    %c0_112 = arith.constant 0 : index
    %206 = vector.load %arg4[%c13, %c0_112] : memref<16x128xf32, #tpu.memory_space<vmem>>, vector<1x128xf32>
    %207 = vector.broadcast %206 : vector<1x128xf32> to vector<4x128xf32>
    %208 = arith.addf %205, %207 : vector<4x128xf32>
    %209 = arith.negf %208 : vector<4x128xf32>
    %210 = math.exp %209 : vector<4x128xf32>
    %cst_113 = arith.constant 1.000000e+00 : f32
    %211 = vector.broadcast %cst_113 : f32 to vector<4x128xf32>
    %212 = arith.addf %211, %210 : vector<4x128xf32>
    %213 = arith.divf %211, %212 : vector<4x128xf32>
    %c0_114 = arith.constant 0 : index
    %c0_115 = arith.constant 0 : index
    %214 = vector.load %arg7[%c0_114, %c0_115] : memref<4x128xf32, #tpu.memory_space<vmem>>, vector<4x128xf32>
    tpu.vector_store %arg7[%c0_114, %c0_115], %213 {strides = array<i32>} : memref<4x128xf32, #tpu.memory_space<vmem>>, vector<4x128xf32>,
    return
  }
  func.func @transform_0(%arg0: i32) -> (i32, i32) {
    %c0_i32 = arith.constant 0 : i32
    %c0_i32_0 = arith.constant 0 : i32
    %c0_i32_1 = arith.constant 0 : i32
    return %c0_i32, %c0_i32_0 : i32, i32
  }
  func.func @transform_1(%arg0: i32) -> (i32, i32, i32) {
    %c0_i32 = arith.constant 0 : i32
    %c0_i32_0 = arith.constant 0 : i32
    %c0_i32_1 = arith.constant 0 : i32
    %c0_i32_2 = arith.constant 0 : i32
    return %c0_i32, %c0_i32_0, %c0_i32_1 : i32, i32, i32
  }
  func.func @transform_2(%arg0: i32) -> (i32, i32, i32) {
    %c0_i32 = arith.constant 0 : i32
    %c0_i32_0 = arith.constant 0 : i32
    %c0_i32_1 = arith.constant 0 : i32
    %c0_i32_2 = arith.constant 0 : i32
    return %c0_i32, %c0_i32_0, %c0_i32_1 : i32, i32, i32
  }
  func.func @transform_3(%arg0: i32) -> (i32, i32) {
    %c0_i32 = arith.constant 0 : i32
    %c0_i32_0 = arith.constant 0 : i32
    %c0_i32_1 = arith.constant 0 : i32
    return %c0_i32, %c0_i32_0 : i32, i32
  }
  func.func @transform_4(%arg0: i32) -> (i32, i32) {
    %c0_i32 = arith.constant 0 : i32
    %c0_i32_0 = arith.constant 0 : i32
    %c0_i32_1 = arith.constant 0 : i32
    return %c0_i32, %c0_i32_0 : i32, i32
  }
  func.func @transform_5(%arg0: i32) -> (i32, i32) {
    %c0_i32 = arith.constant 0 : i32
    %c0_i32_0 = arith.constant 0 : i32
    %c0_i32_1 = arith.constant 0 : i32
    return %c0_i32, %c0_i32_0 : i32, i32
  }
  func.func @transform_6(%arg0: i32) -> (i32, i32) {
    %c0_i32 = arith.constant 0 : i32
    %c0_i32_0 = arith.constant 0 : i32
    %c0_i32_1 = arith.constant 0 : i32
    return %c0_i32, %c0_i32_0 : i32, i32
  }
}

</mosaic_0001>

<bundles_post_ra>
// kernel: cnn_forward.1
= control target key start
LH: loop header
LB: loop body
LE: loop exit
PB: predicated region body
PF: predicated region fallthrough
CT: control target
= control target key end

     0   :  { %11 = vsyncpa [#allocation3], 0  ;;  %s8064_s0 = inlined_call_operand.vmem [shape: f32[96,128], index: 0, kind: input, shape index: {}]   ;;  %s8065_s1 = inlined_call_operand.hbm [shape: f32[8,384,128], index: 1, kind: input, shape index: {}]   ;;  %s8066_s2 = inlined_call_operand.hbm [shape: f32[3,128,128], index: 2, kind: input, shape index: {}]   ;;  %s8067_s3 = inlined_call_operand.hbm [shape: f32[16,128], index: 3, kind: input, shape index: {}]   ;;  %s8068_s4 = inlined_call_operand.hbm [shape: f32[96,2], index: 4, kind: input, shape index: {}]   ;;  %s8069_s5 = inlined_call_operand.hbm [shape: f32[4,96], index: 5, kind: input, shape index: {}]   ;;  %s8070_s6 = inlined_call_operand.vmem [shape: f32[4,128], index: 6, kind: output, shape index: {}]  }
   0x1   :  { %12 = vsyncpa [#allocation5], 0 }
   0x2   :  { %13 = vsyncpa [#allocation8], 0  ;;  %s6139_s21 = smov [#allocation4]   ;;  %s6140_s23 = smov [#allocation7]  }
   0x3   :  { %s33_s22 = sshll.u32 %s6139_s21, 4  ;;  %s57_s24 = sshll.u32 %s6140_s23, 4  ;;  %s34_s22 = int_to_ptr.vmem [resolvable:$true] %s33_s22  ;;  %s6186_s24 = int_to_ptr.vmem [resolvable:$true] %s57_s24 }
   0x4   :  { %s6023_s27 = scalar_lea.hbm %s8066_s2, 6144 }
   0x5   :  { %p6024_p0 = scmp.ne.s32.totalorder %s8066_s2, %s6023_s27  ;;  %p6027_p1 = scmp.lt.u32.totalorder %s6023_s27, %s8066_s2 }
   0x7   :  { %p6029_p2 = pnand %p6027_p1, %p6024_p0 }
   0x9   :  { %6032 = shalt.err (!%p6029_p2)
}
   0xa   :  { %s6033_s8 = scalar_lea.vmem %s34_s22, 6144  ;;  %p6038_p4 = scmp.lt.s32.totalorder %s34_s22, %s34_s22 }
   0xb   :  { %p6034_p3 = scmp.ne.s32.totalorder %s34_s22, %s6033_s8  ;;  %p6039_p5 = scmp.lt.s32.totalorder %s6033_s8, %s6033_s8 }
   0xd   :  { %p6040_p6 = por %p6039_p5, %p6038_p4 }
   0xf   :  { %p6041_p7 = pnand %p6040_p6, %p6034_p3 }
  0x11   :  { %6044 = shalt.err (!%p6041_p7)
}
  0x12   :  { %s6141_s9 = smov 128   ;;  %s6142_s10 = smov 8  }
  0x13   :  { %39 = dma.hbm_to_vmem [thread:$0]  %s8066_s2, 6144, %s34_s22, [#allocation5], %s6141_s9, %s6141_s9, %s6142_s10  }
  0x14   :  { %s6045_s15 = scalar_lea.hbm %s8068_s4, 1536 }
  0x15   :  { %p6046_p8 = scmp.ne.s32.totalorder %s8068_s4, %s6045_s15  ;;  %p6049_p9 = scmp.lt.u32.totalorder %s6045_s15, %s8068_s4 }
  0x17   :  { %p6051_p10 = pnand %p6049_p9, %p6046_p8 }
  0x19   :  { %6054 = shalt.err (!%p6051_p10)
}
  0x1a   :  { %s6055_s20 = scalar_lea.vmem %s6186_s24, 1536  ;;  %p6060_p12 = scmp.lt.s32.totalorder %s6186_s24, %s6186_s24 }
  0x1b   :  { %p6056_p11 = scmp.ne.s32.totalorder %s6186_s24, %s6055_s20  ;;  %p6061_p13 = scmp.lt.s32.totalorder %s6055_s20, %s6055_s20 }
  0x1d   :  { %p6062_p0 = por %p6061_p13, %p6060_p12 }
  0x1f   :  { %p6063_p1 = pnand %p6062_p0, %p6056_p11 }
  0x21   :  { %6066 = shalt.err (!%p6063_p1)
}
  0x22   :  { %63 = dma.hbm_to_vmem [thread:$0]  %s8068_s4, 1536, %s6186_s24, [#allocation8], %s6141_s9, %s6141_s9, %s6142_s10  }
  0x23   :  { %s6143_s22 = smov [#allocation2]   ;;  %s6144_s25 = smov [#allocation6]  }
  0x24   :  { %s21_s23 = sshll.u32 %s6143_s22, 4  ;;  %s45_s26 = sshll.u32 %s6144_s25, 4  ;;  %s22_s23 = int_to_ptr.vmem [resolvable:$true] %s21_s23  ;;  %s6223_s26 = int_to_ptr.vmem [resolvable:$true] %s45_s26 }
  0x25   :  { %s6067_s29 = scalar_lea.hbm %s8065_s1, 49152 }
  0x26   :  { %p6068_p2 = scmp.ne.s32.totalorder %s8065_s1, %s6067_s29  ;;  %p6071_p3 = scmp.lt.u32.totalorder %s6067_s29, %s8065_s1 }
  0x28   :  { %p6073_p4 = pnand %p6071_p3, %p6068_p2 }
  0x2a   :  { %6076 = shalt.err (!%p6073_p4)
}
  0x2b   :  { %s6077_s4 = scalar_lea.vmem %s22_s23, 49152  ;;  %p6082_p6 = scmp.lt.s32.totalorder %s22_s23, %s22_s23 }
  0x2c   :  { %p6078_p5 = scmp.ne.s32.totalorder %s22_s23, %s6077_s4  ;;  %p6083_p7 = scmp.lt.s32.totalorder %s6077_s4, %s6077_s4 }
  0x2e   :  { %p6084_p8 = por %p6083_p7, %p6082_p6 }
  0x30   :  { %p6085_p9 = pnand %p6084_p8, %p6078_p5 }
  0x32   :  { %6088 = shalt.err (!%p6085_p9)
}
  0x33   :  { %27 = dma.hbm_to_vmem [thread:$0]  %s8065_s1, 49152, %s22_s23, [#allocation3], %s6141_s9, %s6141_s9, %s6142_s10  }
  0x34   :  { %s6089_s15 = scalar_lea.hbm %s8067_s3, 256 }
  0x35   :  { %p6090_p10 = scmp.ne.s32.totalorder %s8067_s3, %s6089_s15  ;;  %p6093_p11 = scmp.lt.u32.totalorder %s6089_s15, %s8067_s3 }
  0x37   :  { %p6095_p12 = pnand %p6093_p11, %p6090_p10 }
  0x39   :  { %6098 = shalt.err (!%p6095_p12)
}
  0x3a   :  { %s6099_s20 = scalar_lea.vmem %s6223_s26, 256  ;;  %p6104_p0 = scmp.lt.s32.totalorder %s6223_s26, %s6223_s26 }
  0x3b   :  { %p6100_p13 = scmp.ne.s32.totalorder %s6223_s26, %s6099_s20  ;;  %p6105_p1 = scmp.lt.s32.totalorder %s6099_s20, %s6099_s20 }
  0x3d   :  { %p6106_p2 = por %p6105_p1, %p6104_p0 }
  0x3f   :  { %p6107_p3 = pnand %p6106_p2, %p6100_p13 }
  0x41   :  { %6110 = shalt.err (!%p6107_p3)
}
  0x42   :  { %51 = dma.hbm_to_vmem [thread:$0]  %s8067_s3, 256, %s6223_s26, [#allocation5], %s6141_s9, %s6141_s9, %s6142_s10  }
  0x43   :  { %s6145_s21 = smov [#allocation9]   ;;  %s6111_s27 = scalar_lea.hbm %s8069_s5, 64 }
  0x44   :  { %s70_s22 = sshll.u32 %s6145_s21, 4  ;;  %p6112_p4 = scmp.ne.s32.totalorder %s8069_s5, %s6111_s27  ;;  %s71_s22 = int_to_ptr.vmem [resolvable:$true] %s70_s22 }
  0x45   :  { %p6115_p5 = scmp.lt.u32.totalorder %s6111_s27, %s8069_s5 }
  0x47   :  { %p6117_p6 = pnand %p6115_p5, %p6112_p4 }
  0x49   :  { %6120 = shalt.err (!%p6117_p6)
}
  0x4a   :  { %s6121_s8 = scalar_lea.vmem %s71_s22, 64  ;;  %p6126_p8 = scmp.lt.s32.totalorder %s71_s22, %s71_s22 }
  0x4b   :  { %p6122_p7 = scmp.ne.s32.totalorder %s71_s22, %s6121_s8  ;;  %p6127_p9 = scmp.lt.s32.totalorder %s6121_s8, %s6121_s8 }
  0x4d   :  { %p6128_p10 = por %p6127_p9, %p6126_p8 }
  0x4f   :  { %p6129_p11 = pnand %p6128_p10, %p6122_p7 }
  0x51   :  { %6132 = shalt.err (!%p6129_p11)
}
  0x52   :  { %73 = dma.hbm_to_vmem [thread:$0]  %s8069_s5, 64, %s71_s22, [#allocation8]  }
  0x53   :  { %6133 = dma.done.wait [#allocation3], 49152  }
  0x54   :  { %6134 = vsyncadd [#allocation3], 4294918144 }
  0x55   :  { %6135 = dma.done.wait [#allocation5], 6400  }
  0x56   :  { %6136 = vsyncadd [#allocation5], 4294960896 }
  0x57   :  { %6137 = dma.done.wait [#allocation8], 1600  }
  0x58   :  { %6138 = vsyncadd [#allocation8], 4294965696  ;;  %v6146_v0 = vmov 0   ;;  %v91_v1 = vld [vmem:[#allocation7 + $0x10] sm:$0xff]  ;;  %v89_v2 = vld [vmem:[#allocation7] sm:$0xff]  ;;  %v6147_v54 = vmov 1  }
  0x59   :  { %6008 = vset.pattern.permute.xlu1 %v6146_v0  ;;  %6007 = vset.pattern.permute.xlu0 %v6146_v0  ;;  %v92_v3 = vld [vmem:[#allocation7 + $0x18] sm:$0xff]  ;;  %vm103_vm0 = vcmp.gt.f32.partialorder %v91_v1, 0.0  ;;  %vm101_vm1 = vcmp.gt.f32.partialorder %v89_v2, 0.0  ;;  %v90_v4 = vld [vmem:[#allocation7 + $0x8] sm:$0xff]  ;;  %v93_v8 = vld [vmem:[#allocation7 + $0x20] sm:$0xff] }
  0x5a   :  { %vm104_vm2 = vcmp.gt.f32.partialorder %v92_v3, 0.0  ;;  %v6275_v5 = vsel %vm103_vm0, 1, %v6146_v0  ;;  %v6278_v6 = vsel %vm101_vm1, 1, %v6146_v0  ;;  %vm102_vm3 = vcmp.gt.f32.partialorder %v90_v4, 0.0  ;;  %v94_v7 = vld [vmem:[#allocation7 + $0x28] sm:$0xff]  ;;  %v96_v11 = vld [vmem:[#allocation7 + $0x38] sm:$0xff] }
  0x5b   :  { %171 = vperm.xlu1 %6008, %v6275_v5   ;;  %165 = vperm.xlu0 %6007, %v6278_v6   ;;  %v6283_v9 = vsel %vm104_vm2, 1, %v6146_v0  ;;  %v6286_v10 = vsel %vm102_vm3, 1, %v6146_v0  ;;  %vm106_vm4 = vcmp.gt.f32.partialorder %v94_v7, 0.0  ;;  %vm105_vm5 = vcmp.gt.f32.partialorder %v93_v8, 0.0  ;;  %v325_v12 = vld [vmem:[#allocation2 + $0x80] sm:$0xff]  ;;  %v326_v13 = vld [vmem:[#allocation2 + $0x88] sm:$0xff] }
  0x5c   :  { %v95_v14 = vld [vmem:[#allocation7 + $0x30] sm:$0xff]  ;;  %v310_v16 = vld [vmem:[#allocation2 + $0x8] sm:$0xff]  ;;  %v5393_v17 = vpack.c.bf16 %v326_v13, %v325_v12  ;;  %v327_v19 = vld [vmem:[#allocation2 + $0x90] sm:$0xff]  ;;  %v6291_v22 = vsel %vm106_vm4, 1, %v6146_v0  ;;  %v6294_v23 = vsel %vm105_vm5, 1, %v6146_v0  ;;  %vm108_vm6 = vcmp.gt.f32.partialorder %v96_v11, 0.0 }
  0x5d   :  { %v309_v15 = vld [vmem:[#allocation2] sm:$0xff]  ;;  %v328_v20 = vld [vmem:[#allocation2 + $0x98] sm:$0xff]  ;;  %v311_v21 = vld [vmem:[#allocation2 + $0x10] sm:$0xff]  ;;  %vm107_vm7 = vcmp.gt.f32.partialorder %v95_v14, 0.0  ;;  %v6299_v31 = vsel %vm108_vm6, 1, %v6146_v0 }
  0x5e   :  { %v5395_v18 = vpack.c.bf16 %v310_v16, %v309_v15  ;;  %v5397_v24 = vpack.c.bf16 %v328_v20, %v327_v19  ;;  %v312_v25 = vld [vmem:[#allocation2 + $0x18] sm:$0xff]  ;;  %5394 = vmatprep.subr.bf16.mxu0 %v5393_v17  ;;  %v329_v26 = vld [vmem:[#allocation2 + $0xa0] sm:$0xff]  ;;  %v330_v27 = vld [vmem:[#allocation2 + $0xa8] sm:$0xff]  ;;  %v6302_v32 = vsel %vm107_vm7, 1, %v6146_v0 }
  0x5f   :  { %174 = vperm.xlu1 %6008, %v6283_v9   ;;  %168 = vperm.xlu0 %6007, %v6286_v10   ;;  %v5399_v28 = vpack.c.bf16 %v312_v25, %v311_v21  ;;  %v313_v29 = vld [vmem:[#allocation2 + $0x20] sm:$0xff]  ;;  %v314_v30 = vld [vmem:[#allocation2 + $0x28] sm:$0xff]  ;;  %v5401_v33 = vpack.c.bf16 %v330_v27, %v329_v26  ;;  %v331_v36 = vld [vmem:[#allocation2 + $0xb0] sm:$0xff] }
  0x60   :  { %5396 = vmatpush3.bf16.msra.mxu0 %v5395_v18  ;;  %v341_v34 = vld [vmem:[#allocation2 + $0x100] sm:$0xff]  ;;  %v342_v35 = vld [vmem:[#allocation2 + $0x108] sm:$0xff]  ;;  %v97_v38 = vld [vmem:[#allocation7 + $0x40] sm:$0xff]  ;;  %v5403_v39 = vpack.c.bf16 %v314_v30, %v313_v29 }
  0x61   :  { %5398 = vmatprep.subr.bf16.mxu0 %v5397_v24  ;;  %v5425_v37 = vpack.c.bf16 %v342_v35, %v341_v34  ;;  %v332_v40 = vld [vmem:[#allocation2 + $0xb8] sm:$0xff]  ;;  %v343_v41 = vld [vmem:[#allocation2 + $0x110] sm:$0xff]  ;;  %v333_v45 = vld [vmem:[#allocation2 + $0xc0] sm:$0xff]  ;;  %vm109_vm8 = vcmp.gt.f32.partialorder %v97_v38, 0.0 }
  0x62   :  { %v344_v42 = vld [vmem:[#allocation2 + $0x118] sm:$0xff]  ;;  %v315_v43 = vld [vmem:[#allocation2 + $0x30] sm:$0xff]  ;;  %v334_v47 = vld [vmem:[#allocation2 + $0xc8] sm:$0xff]  ;;  %v5405_v50 = vpack.c.bf16 %v332_v40, %v331_v36  ;;  %v6311_v62 = vsel %vm109_vm8, 1, %v6146_v0 }
  0x63   :  { %180 = vperm.xlu1 %6008, %v6291_v22   ;;  %177 = vperm.xlu0 %6007, %v6294_v23   ;;  %v316_v44 = vld [vmem:[#allocation2 + $0x38] sm:$0xff]  ;;  %v5429_v46 = vpack.c.bf16 %v344_v42, %v343_v41  ;;  %v345_v48 = vld [vmem:[#allocation2 + $0x120] sm:$0xff]  ;;  %v346_v49 = vld [vmem:[#allocation2 + $0x128] sm:$0xff]  ;;  %v5409_v55 = vpack.c.bf16 %v334_v47, %v333_v45 }
  0x64   :  { %5400 = vmatpush3.bf16.msra.mxu0 %v5399_v28  ;;  %5426 = vmatprep.subr.bf16.mxu1 %v5425_v37  ;;  %v5407_v51 = vpack.c.bf16 %v316_v44, %v315_v43  ;;  %v317_v52 = vld [vmem:[#allocation2 + $0x40] sm:$0xff]  ;;  %v5433_v53 = vpack.c.bf16 %v346_v49, %v345_v48  ;;  %v318_v56 = vld [vmem:[#allocation2 + $0x48] sm:$0xff]  ;;  %v347_v57 = vld [vmem:[#allocation2 + $0x130] sm:$0xff] }
  0x65   :  { %5402 = vmatprep.subr.bf16.mxu0 %v5401_v33  ;;  %5428 = vmatpush3.bf16.msra.mxu1 %v5425_v37  ;;  %v348_v58 = vld [vmem:[#allocation2 + $0x138] sm:$0xff]  ;;  %v335_v60 = vld [vmem:[#allocation2 + $0xd0] sm:$0xff]  ;;  %v5411_v63 = vpack.c.bf16 %v318_v56, %v317_v52  ;;  %v6316_v2 = vld [vmem:[%s8064_s0] sm:$0xff] }
  0x66   :  { %5430 = vmatprep.subr.bf16.mxu1 %v5429_v46  ;;  %v98_v59 = vld [vmem:[#allocation7 + $0x48] sm:$0xff]  ;;  %v5437_v1 = vpack.c.bf16 %v348_v58, %v347_v57  ;;  %v319_v4 = vld [vmem:[#allocation2 + $0x50] sm:$0xff]  ;;  %426 = vmatprep.mubr.f32.mxu0 %v6316_v2  ;;  %v99_v7 = vld [vmem:[#allocation7 + $0x50] sm:$0xff]  ;;  %v224_v58 = vrot.slane %v6316_v2, 1 }
  0x67   :  { %186 = vperm.xlu1 %6008, %v6299_v31   ;;  %183 = vperm.xlu0 %6007, %v6302_v32   ;;  %v336_v61 = vld [vmem:[#allocation2 + $0xd8] sm:$0xff]  ;;  %vm110_vm9 = vcmp.gt.f32.partialorder %v98_v59, 0.0  ;;  %v337_v8 = vld [vmem:[#allocation2 + $0xe0] sm:$0xff]  ;;  %v350_v12 = vld [vmem:[#allocation2 + $0x148] sm:$0xff]  ;;  %vm111_vm10 = vcmp.gt.f32.partialorder %v99_v7, 0.0 }
  0x68   :  { %5404 = vmatpush3.bf16.msra.mxu0 %v5403_v39  ;;  %v5413_v3 = vpack.c.bf16 %v336_v61, %v335_v60  ;;  %v349_v11 = vld [vmem:[#allocation2 + $0x140] sm:$0xff]  ;;  %v161_v13 = vsel %vm110_vm9, 1, %v6146_v0  ;;  %v322_v17 = vld [vmem:[#allocation2 + $0x68] sm:$0xff]  ;;  %v340_v18 = vld [vmem:[#allocation2 + $0xf8] sm:$0xff]  ;;  %v162_v24 = vsel %vm111_vm10, 1, %v6146_v0  ;;  %v125_v39 = vrot.slane %v6316_v2, 7 }
  0x69   :  { %5406 = vmatprep.subr.bf16.mxu0 %v5405_v50  ;;  %5432 = vmatpush3.bf16.msra.mxu1 %v5429_v46  ;;  %v321_v16 = vld [vmem:[#allocation2 + $0x60] sm:$0xff]  ;;  %v5441_v19 = vpack.c.bf16 %v350_v12, %v349_v11  ;;  %v351_v20 = vld [vmem:[#allocation2 + $0x150] sm:$0xff]  ;;  %v352_v21 = vld [vmem:[#allocation2 + $0x158] sm:$0xff] }
  0x6a   :  { %5434 = vmatprep.subr.bf16.mxu1 %v5433_v53  ;;  %v5419_v25 = vpack.c.bf16 %v322_v17, %v321_v16  ;;  %v323_v27 = vld [vmem:[#allocation2 + $0x70] sm:$0xff]  ;;  %v324_v28 = vld [vmem:[#allocation2 + $0x78] sm:$0xff]  ;;  %v5445_v29 = vpack.c.bf16 %v352_v21, %v351_v20  ;;  %v353_v30 = vld [vmem:[#allocation2 + $0x160] sm:$0xff] }
  0x6b   :  { %6010 = vset.pattern.permute.xlu1 %v6147_v54  ;;  %6009 = vset.pattern.permute.xlu0 %v6147_v54  ;;  %v354_v33 = vld [vmem:[#allocation2 + $0x168] sm:$0xff]  ;;  %v5423_v34 = vpack.c.bf16 %v324_v28, %v323_v27  ;;  %v355_v35 = vld [vmem:[#allocation2 + $0x170] sm:$0xff]  ;;  %v356_v36 = vld [vmem:[#allocation2 + $0x178] sm:$0xff] }
  0x6c   :  { %253 = vperm.xlu1 %6010, %v6286_v10   ;;  %250 = vperm.xlu0 %6009, %v6278_v6   ;;  %v320_v6 = vld [vmem:[#allocation2 + $0x58] sm:$0xff]  ;;  %v338_v10 = vld [vmem:[#allocation2 + $0xe8] sm:$0xff]  ;;  %v5453_v38 = vpack.c.bf16 %v356_v36, %v355_v35  ;;  %v115_v45 = vld [vmem:[%s8064_s0 + $0x10] sm:$0xff] }
  0x6d   :  { %5408 = vmatpush3.bf16.msra.mxu0 %v5407_v51  ;;  %5436 = vmatpush3.bf16.msra.mxu1 %v5433_v53  ;;  %v5415_v14 = vpack.c.bf16 %v320_v6, %v319_v4  ;;  %v5417_v15 = vpack.c.bf16 %v338_v10, %v337_v8  ;;  %v100_v37 = vld [vmem:[#allocation7 + $0x58] sm:$0xff]  ;;  %v127_v47 = vrot.slane %v115_v45, 7  ;;  %v116_v50 = vld [vmem:[%s8064_s0 + $0x18] sm:$0xff]  ;;  %v6417_v7 = vld [vmem:[%s8064_s0 + $0x30] sm:$0xff] }
  0x6e   :  { %5410 = vmatprep.subr.bf16.mxu0 %v5409_v55  ;;  %5438 = vmatprep.subr.bf16.mxu1 %v5437_v1  ;;  %vm112_vm11 = vcmp.gt.f32.partialorder %v100_v37, 0.0  ;;  %v114_v40 = vld [vmem:[%s8064_s0 + $0x8] sm:$0xff]  ;;  %v128_v52 = vrot.slane %v116_v50, 7  ;;  %v6384_v55 = vld [vmem:[%s8064_s0 + $0x20] sm:$0xff]  ;;  %v227_v4 = vrot.slane %v116_v50, 1  ;;  %v123_v37 = vld [vmem:[%s8064_s0 + $0x50] sm:$0xff] }
  0x6f   :  { %v126_v42 = vrot.slane %v114_v40, 7  ;;  %v129_v57 = vrot.slane %v6384_v55, 7  ;;  %v225_v59 = vrot.slane %v114_v40, 1  ;;  %v228_v17 = vrot.slane %v6384_v55, 1  ;;  %v121_v20 = vld [vmem:[%s8064_s0 + $0x40] sm:$0xff]  ;;  %v732_v2 = vld [vmem:[#allocation2 + $0x298] sm:$0xff] }
  0x70   :  { %6011 = vset.pattern.permute.xlu1 %v6146_v0  ;;  %256 = vperm.xlu0 %6009, %v6275_v5   ;;  %v339_v5 = vld [vmem:[#allocation2 + $0xf0] sm:$0xff]  ;;  %v133_v28 = vrot.slane %v121_v20, 7 }
  0x71   :  { %189 = vperm.xlu1 %6011, %v6311_v62   ;;  %5412 = vmatpush3.bf16.msra.mxu0 %v5411_v63  ;;  %v5421_v26 = vpack.c.bf16 %v340_v18, %v339_v5  ;;  %v226_v63 = vrot.slane %v115_v45, 1 }
  0x72   :  { %5414 = vmatprep.subr.bf16.mxu0 %v5413_v3  ;;  %5440 = vmatpush3.bf16.msra.mxu1 %v5437_v1 }
  0x73   :  { %5442 = vmatprep.subr.bf16.mxu1 %v5441_v19 }
  0x74   :  { %6013 = vset.pattern.permute.xlu0 %v6146_v0 }
  0x75   :  { %6012 = vset.pattern.permute.xlu1 %v6147_v54  ;;  %192 = vperm.xlu0 %6013, %v161_v13  }
  0x76   :  { %259 = vperm.xlu1 %6012, %v6283_v9   ;;  %5416 = vmatpush3.bf16.msra.mxu0 %v5415_v14  ;;  %v5449_v9 = vpack.c.bf16 %v354_v33, %v353_v30  ;;  %v230_v30 = vrot.slane %v6417_v7, 1 }
  0x77   :  { %5418 = vmatprep.subr.bf16.mxu0 %v5417_v15  ;;  %5444 = vmatpush3.bf16.msra.mxu1 %v5441_v19  ;;  %v120_v15 = vld [vmem:[%s8064_s0 + $0x38] sm:$0xff] }
  0x78   :  { %5446 = vmatprep.subr.bf16.mxu1 %v5445_v29  ;;  %v132_v19 = vrot.slane %v120_v15, 7 }
  0x79   :  { %195 = vperm.xlu0 %6013, %v162_v24  }
  0x7a   :  { %262 = vperm.xlu1 %6012, %v6294_v23   ;;  %5420 = vmatpush3.bf16.msra.mxu0 %v5419_v25  ;;  %v163_v23 = vsel %vm112_vm11, 1, %v6146_v0 }
  0x7b   :  { %5422 = vmatprep.subr.bf16.mxu0 %v5421_v26  ;;  %5448 = vmatpush3.bf16.msra.mxu1 %v5445_v29  ;;  %v122_v29 = vld [vmem:[%s8064_s0 + $0x48] sm:$0xff] }
  0x7c   :  { %5450 = vmatprep.subr.bf16.mxu1 %v5449_v9  ;;  %v134_v35 = vrot.slane %v122_v29, 7 }
  0x7d   :  { %6014 = vset.pattern.permute.xlu0 %v6147_v54 }
  0x7e   :  { %265 = vperm.xlu1 %6012, %v6291_v22   ;;  %271 = vperm.xlu0 %6014, %v6299_v31   ;;  %v137_v22 = vlaneseq  ;;  %v6339_v31 = vld [vmem:[%s8064_s0 + $0x58] sm:$0xff] }
  0x7f   :  { %5424 = vmatpush3.bf16.msra.mxu0 %v5423_v34  ;;  %5452 = vmatpush3.bf16.msra.mxu1 %v5449_v9 }
  0x80   :  { %5454 = vmatprep.subr.bf16.mxu1 %v5453_v38 }
  0x82   :  { %268 = vperm.xlu1 %6012, %v6302_v32   ;;  %277 = vperm.xlu0 %6014, %v161_v13   ;;  %v6341_v32 = vshrl.u32 %v137_v22, 7  ;;  %v131_v13 = vrot.slane %v6417_v7, 7  ;;  %v232_v22 = vrot.slane %v121_v20, 1 }
  0x83   :  { %5456 = vmatpush3.bf16.msra.mxu1 %v5453_v38  ;;  %v231_v38 = vrot.slane %v120_v15, 1 }
  0x84   :  { %vm139_vm12 = vcmp.lt.s32.totalorder %v6341_v32, 1  ;;  %vm236_vm1 = vcmp.lt.s32.totalorder %v6341_v32, 7 }
  0x85   :  { %v150_v46 = vsel %vm139_vm12, %v125_v39, %v126_v42  ;;  %v149_v51 = vsel %vm139_vm12, %v126_v42, %v127_v47  ;;  %v148_v56 = vsel %vm139_vm12, %v127_v47, %v128_v52  ;;  %v147_v1 = vsel %vm139_vm12, %v128_v52, %v129_v57 }
  0x86   :  { %6015 = vset.pattern.permute.xlu1 %v6146_v0  ;;  %283 = vperm.xlu0 %6014, %v163_v23   ;;  %v136_v0 = vrot.slane %v6339_v31, 7  ;;  %v247_v6 = vsel %vm236_vm1, %v224_v58, %v225_v59  ;;  %v246_v11 = vsel %vm236_vm1, %v225_v59, %v226_v63  ;;  %v245_v14 = vsel %vm236_vm1, %v226_v63, %v227_v4 }
  0x87   :  { %198 = vperm.xlu1 %6015, %v163_v23   ;;  %v144_v27 = vsel %vm139_vm12, %v131_v13, %v132_v19  ;;  %v143_v9 = vsel %vm139_vm12, %v132_v19, %v133_v28  ;;  %v233_v52 = vrot.slane %v122_v29, 1 }
  0x88   :  { %v151_v41 = vsel %vm139_vm12, %v136_v0, %v125_v39 }
  0x89   :  { %v239_v59 = vsel %vm236_vm1, %v232_v22, %v233_v52 }
  0x8b   :  { %6016 = vset.pattern.permute.xlu1 %v6147_v54 }
  0x8c   :  { %274 = vperm.xlu1 %6016, %v6311_v62   ;;  %v6400_v62 = vld [vmem:[%s8064_s0 + $0x28] sm:$0xff] }
  0x8d   :  { %v130_v3 = vrot.slane %v6400_v62, 7  ;;  %v229_v21 = vrot.slane %v6400_v62, 1 }
  0x8f   :  { %v146_v12 = vsel %vm139_vm12, %v129_v57, %v130_v3  ;;  %v145_v18 = vsel %vm139_vm12, %v130_v3, %v131_v13  ;;  %v243_v33 = vsel %vm236_vm1, %v228_v17, %v229_v21  ;;  %v242_v23 = vsel %vm236_vm1, %v229_v21, %v230_v30  ;;  %v738_v21 = vld [vmem:[#allocation2 + $0x2c8] sm:$0xff] }
  0x90   :  { %280 = vperm.xlu1 %6016, %v162_v24   ;;  %v244_v24 = vsel %vm236_vm1, %v227_v4, %v228_v17  ;;  %v735_v17 = vld [vmem:[#allocation2 + $0x2b0] sm:$0xff] }
  0xda   :  { %v6353_v43 = vpop.permute.xlu1 %171  ;;  %v6355_v44 = vpop.permute.xlu0 %165 }
  0xdb   :  { %vm200_vm13 = vcmp.eq.s32.totalorder %v6355_v44, 1  ;;  %vm8080_vm15 = vcmp.eq.s32.totalorder %v6353_v43, 1  ;;  %v3531_v44 = vld [vmem:[#allocation4] sm:$0xff] }
  0xdc   :  { %3823 = vmatmul.mubr.msk.f32.vlgmr.msra.gmra.mrb[0].mxu0 %vm200_vm13, %v151_v41  ;;  %v135_v41 = vrot.slane %v123_v37, 7 }
  0xdd   :  { %431 = vmatprep.mubr.f32.mxu0 %v114_v40  ;;  %v142_v40 = vsel %vm139_vm12, %v133_v28, %v134_v35  ;;  %v740_v28 = vld [vmem:[#allocation2 + $0x2d8] sm:$0xff] }
  0xde   :  { %v6365_v48 = vpop.permute.xlu1 %174  ;;  %v6367_v49 = vpop.permute.xlu0 %168  ;;  %v141_v47 = vsel %vm139_vm12, %v134_v35, %v135_v41  ;;  %v713_v35 = vld [vmem:[#allocation2 + $0x200] sm:$0xff] }
  0xdf   :  { %vm8092_vm14 = vcmp.eq.s32.totalorder %v6367_v49, 1  ;;  %vm8078_vm0 = vcmp.eq.s32.totalorder %v6365_v48, 1 }
  0xe0   :  { %3824 = vmatmul.mubr.msk.f32.gmra.mrb[2].mxu0 %vm8092_vm14, %v150_v46 }
  0xe1   :  { %436 = vmatprep.mubr.f32.mxu0 %v115_v45  ;;  %v241_v45 = vsel %vm236_vm1, %v230_v30, %v231_v38  ;;  %v741_v30 = vld [vmem:[#allocation2 + $0x2e0] sm:$0xff] }
  0xe2   :  { %v6377_v53 = vpop.permute.xlu1 %180  ;;  %v6379_v54 = vpop.permute.xlu0 %177 }
  0xe3   :  { %vm8076_vm2 = vcmp.eq.s32.totalorder %v6379_v54, 1  ;;  %vm8074_vm5 = vcmp.eq.s32.totalorder %v6377_v53, 1 }
  0xe4   :  { %3825 = vmatmul.mubr.msk.f32.gmra.mrb[4].mxu0 %vm8080_vm15, %v149_v51  ;;  %v140_v51 = vsel %vm139_vm12, %v135_v41, %v136_v0  ;;  %v743_v41 = vld [vmem:[#allocation2 + $0x2f0] sm:$0xff] }
  0xe5   :  { %441 = vmatprep.mubr.f32.mxu0 %v116_v50  ;;  %v240_v50 = vsel %vm236_vm1, %v231_v38, %v232_v22  ;;  %v698_v22 = vld [vmem:[#allocation2 + $0x188] sm:$0xff] }
  0xe6   :  { %v6393_v60 = vpop.permute.xlu1 %186  ;;  %v6395_v61 = vpop.permute.xlu0 %183 }
  0xe7   :  { %vm8072_vm7 = vcmp.eq.s32.totalorder %v6395_v61, 1  ;;  %vm8071_vm9 = vcmp.eq.s32.totalorder %v6393_v60, 1 }
  0xe8   :  { %3826 = vmatmul.mubr.msk.f32.gmra.mrb[6].mxu0 %vm8078_vm0, %v148_v56  ;;  %v234_v56 = vrot.slane %v123_v37, 1 }
  0xe9   :  { %446 = vmatprep.mubr.f32.mxu0 %v6384_v55 }
  0xea   :  { %v238_v0 = vsel %vm236_vm1, %v233_v52, %v234_v56 }
  0xeb   :  { %v6420_v8 = vpop.permute.xlu1 %253  ;;  %v6422_v10 = vpop.permute.xlu0 %250 }
  0xec   :  { %vm286_vm3 = vcmp.eq.s32.totalorder %v6420_v8, 1  ;;  %vm285_vm4 = vcmp.eq.s32.totalorder %v6422_v10, 1  ;;  %3827 = vmatmul.mubr.msk.f32.gmra.mrb[8].mxu0 %vm8076_vm2, %v147_v1 }
  0xed   :  { %4893 = vmatprep.mubr.msk.f32.mxu1 %vm285_vm4, %v247_v6  ;;  %451 = vmatprep.mubr.f32.mxu0 %v6400_v62  ;;  %v235_v62 = vrot.slane %v6339_v31, 1  ;;  %v729_v6 = vld [vmem:[#allocation2 + $0x280] sm:$0xff] }
  0xee   :  { %4894 = vmatmul.mubr.msk.f32.vlgmr.msra.gmra.mrb[0].mxu1 %vm286_vm3, %v246_v11 }
  0xef   :  { %v6444_v16 = vpop.permute.xlu0 %256  ;;  %v248_v4 = vsel %vm236_vm1, %v235_v62, %v224_v58  ;;  %v733_v58 = vld [vmem:[#allocation2 + $0x2a0] sm:$0xff] }
  0xf0   :  { %v6447_v5 = vpop.permute.xlu1 %189  ;;  %3828 = vmatmul.mubr.msk.f32.gmra.mrb[10].mxu0 %vm8074_vm5, %v146_v12  ;;  %vm287_vm6 = vcmp.eq.s32.totalorder %v6444_v16, 1  ;;  %v731_v12 = vld [vmem:[#allocation2 + $0x290] sm:$0xff] }
  0xf1   :  { %456 = vmatprep.mubr.f32.mxu0 %v6417_v7  ;;  %4896 = vmatprep.mubr.msk.f32.mxu1 %vm287_vm6, %v245_v14  ;;  %vm8073_vm11 = vcmp.eq.s32.totalorder %v6447_v5, 1  ;;  %v730_v7 = vld [vmem:[#allocation2 + $0x288] sm:$0xff]  ;;  %v5493_v13 = vpack.c.bf16 %v732_v2, %v731_v12  ;;  %v719_v12 = vld [vmem:[#allocation2 + $0x230] sm:$0xff]  ;;  %v720_v2 = vld [vmem:[#allocation2 + $0x238] sm:$0xff] }
  0xf2   :  { %v5489_v11 = vpack.c.bf16 %v730_v7, %v729_v6  ;;  %v734_v14 = vld [vmem:[#allocation2 + $0x2a8] sm:$0xff]  ;;  %v701_v6 = vld [vmem:[#allocation2 + $0x1a0] sm:$0xff] }
  0xf3   :  { %v702_v7 = vld [vmem:[#allocation2 + $0x1a8] sm:$0xff] }
  0xf4   :  { %3829 = vmatmul.mubr.msk.f32.gmra.mrb[12].mxu0 %vm8072_vm7, %v145_v18  ;;  %v6466_v25 = vpop.permute.xlu0 %192  ;;  %5490 = vmatprep.subr.bf16.mxu0 %v5489_v11  ;;  %v736_v18 = vld [vmem:[#allocation2 + $0x2b8] sm:$0xff] }
  0xf5   :  { %v6468_v26 = vpop.permute.xlu1 %259  ;;  %461 = vmatprep.mubr.f32.mxu0 %v120_v15  ;;  %5492 = vmatpush3.bf16.msra.mxu0 %v5489_v11  ;;  %v5497_v15 = vpack.c.bf16 %v734_v14, %v733_v58  ;;  %v5501_v19 = vpack.c.bf16 %v736_v18, %v735_v17  ;;  %v5467_v11 = vpack.c.bf16 %v702_v7, %v701_v6  ;;  %v703_v58 = vld [vmem:[#allocation2 + $0x1b0] sm:$0xff]  ;;  %v704_v14 = vld [vmem:[#allocation2 + $0x1b8] sm:$0xff]  ;;  %v721_v17 = vld [vmem:[#allocation2 + $0x240] sm:$0xff] }
  0xf6   :  { %vm288_vm8 = vcmp.eq.s32.totalorder %v6468_v26, 1  ;;  %5494 = vmatprep.subr.bf16.mxu0 %v5493_v13  ;;  %v722_v18 = vld [vmem:[#allocation2 + $0x248] sm:$0xff] }
  0xf7   :  { %4897 = vmatmul.mubr.msk.f32.gmra.mrb[2].mxu1 %vm288_vm8, %v244_v24 }
  0xf8   :  { %3830 = vmatmul.mubr.msk.f32.gmra.mrb[14].mxu0 %vm8071_vm9, %v144_v27  ;;  %v6489_v36 = vpop.permute.xlu0 %195  ;;  %vm8075_vm9 = vcmp.eq.s32.totalorder %v6466_v25, 1  ;;  %v739_v27 = vld [vmem:[#allocation2 + $0x2d0] sm:$0xff] }
  0xf9   :  { %v6484_v34 = vpop.permute.xlu1 %262  ;;  %466 = vmatprep.mubr.f32.mxu0 %v121_v20  ;;  %5496 = vmatpush3.bf16.msra.mxu0 %v5493_v13  ;;  %v737_v20 = vld [vmem:[#allocation2 + $0x2c0] sm:$0xff]  ;;  %v5469_v13 = vpack.c.bf16 %v720_v2, %v719_v12 }
  0xfa   :  { %vm289_vm10 = vcmp.eq.s32.totalorder %v6484_v34, 1  ;;  %5498 = vmatprep.subr.bf16.mxu0 %v5497_v15  ;;  %v5505_v24 = vpack.c.bf16 %v738_v21, %v737_v20  ;;  %v705_v20 = vld [vmem:[#allocation2 + $0x1c0] sm:$0xff]  ;;  %v706_v21 = vld [vmem:[#allocation2 + $0x1c8] sm:$0xff] }
  0xfb   :  { %4899 = vmatprep.mubr.msk.f32.mxu1 %vm289_vm10, %v243_v33  ;;  %v742_v33 = vld [vmem:[#allocation2 + $0x2e8] sm:$0xff] }
  0xfc   :  { %3831 = vmatmul.mubr.msk.f32.gmra.mrb[16].mxu0 %vm8073_vm11, %v143_v9  ;;  %v5513_v9 = vpack.c.bf16 %v742_v33, %v741_v30  ;;  %v707_v30 = vld [vmem:[#allocation2 + $0x1d0] sm:$0xff]  ;;  %v708_v33 = vld [vmem:[#allocation2 + $0x1d8] sm:$0xff] }
  0xfd   :  { %v6502_v39 = vpop.permute.xlu1 %265  ;;  %471 = vmatprep.mubr.f32.mxu0 %v122_v29  ;;  %v6511_v42 = vpop.permute.xlu0 %271  ;;  %5500 = vmatpush3.bf16.msra.mxu0 %v5497_v15  ;;  %v5509_v29 = vpack.c.bf16 %v740_v28, %v739_v27  ;;  %v5471_v15 = vpack.c.bf16 %v704_v14, %v703_v58  ;;  %v723_v27 = vld [vmem:[#allocation2 + $0x250] sm:$0xff]  ;;  %v724_v28 = vld [vmem:[#allocation2 + $0x258] sm:$0xff]  ;;  %v6571_v58 = vld [vmem:[#allocation6] ss:$0 sm:$0xff] }
  0xfe   :  { %8093 = vst [vmem:[#allocation13_spill] sm:$0xff] %v6502_v39  ;;  %vm290_vm7 = vcmp.eq.s32.totalorder %v6502_v39, 1  ;;  %vm8091_vm11 = vcmp.eq.s32.totalorder %v6511_v42, 1  ;;  %5502 = vmatprep.subr.bf16.mxu0 %v5501_v19 }
  0xff   :  { %4900 = vmatmul.mubr.msk.f32.gmra.mrb[4].mxu1 %vm290_vm7, %v242_v23  ;;  %v697_v23 = vld [vmem:[#allocation2 + $0x180] sm:$0xff] }
 0x100   :  { %3832 = vmatmul.mubr.msk.f32.gmra.mrb[18].mxu0 %vm8075_vm9, %v142_v40  ;;  %vm8077_vm9 = vcmp.eq.s32.totalorder %v6489_v36, 1  ;;  %v5459_v40 = vpack.c.bf16 %v698_v22, %v697_v23  ;;  %v709_v23 = vld [vmem:[#allocation2 + $0x1e0] sm:$0xff]  ;;  %v710_v22 = vld [vmem:[#allocation2 + $0x1e8] sm:$0xff] }
 0x101   :  { %v6516_v46 = vpop.permute.xlu1 %268  ;;  %476 = vmatprep.mubr.f32.mxu0 %v123_v37  ;;  %v6538_v57 = vpop.permute.xlu0 %277  ;;  %5504 = vmatpush3.bf16.msra.mxu0 %v5501_v19  ;;  %v714_v37 = vld [vmem:[#allocation2 + $0x208] sm:$0xff]  ;;  %v5473_v19 = vpack.c.bf16 %v722_v18, %v721_v17 }
 0x102   :  { %8094 = vst [vmem:[#allocation14_spill] sm:$0xff] %v6516_v46  ;;  %vm291_vm5 = vcmp.eq.s32.totalorder %v6516_v46, 1  ;;  %vm8088_vm0 = vcmp.eq.s32.totalorder %v6538_v57, 1  ;;  %5506 = vmatprep.subr.bf16.mxu0 %v5505_v24  ;;  %v5457_v38 = vpack.c.bf16 %v714_v37, %v713_v35  ;;  %v725_v35 = vld [vmem:[#allocation2 + $0x260] sm:$0xff]  ;;  %v726_v37 = vld [vmem:[#allocation2 + $0x268] sm:$0xff] }
 0x103   :  { %4902 = vmatprep.mubr.msk.f32.mxu1 %vm291_vm5, %v241_v45  ;;  %v744_v45 = vld [vmem:[#allocation2 + $0x2f8] sm:$0xff] }
 0x104   :  { %3833 = vmatmul.mubr.msk.f32.gmra.mrb[20].mxu0 %vm8077_vm9, %v141_v47  ;;  %4903 = vmatmul.mubr.msk.f32.gmra.mrb[6].mxu1 %vm8091_vm11, %v240_v50  ;;  %v5517_v47 = vpack.c.bf16 %v744_v45, %v743_v41  ;;  %v715_v50 = vld [vmem:[#allocation2 + $0x210] sm:$0xff]  ;;  %v728_v45 = vld [vmem:[#allocation2 + $0x278] sm:$0xff] }
 0x105   :  { %481 = vmatprep.mubr.f32.mxu0 %v6339_v31  ;;  %v6553_v1 = vpop.permute.xlu0 %283  ;;  %v237_v31 = vsel %vm236_vm1, %v234_v56, %v235_v62  ;;  %5508 = vmatpush3.bf16.msra.mxu0 %v5505_v24  ;;  %v699_v56 = vld [vmem:[#allocation2 + $0x190] sm:$0xff]  ;;  %v5475_v24 = vpack.c.bf16 %v706_v21, %v705_v20 }
 0x106   :  { %v6535_v55 = vpop.permute.xlu1 %198  ;;  %vm8090_vm15 = vcmp.eq.s32.totalorder %v6553_v1, 1  ;;  %5510 = vmatprep.subr.bf16.mxu0 %v5509_v29  ;;  %5458 = vmatprep.subr.bf16.mxu1 %v5457_v38  ;;  %v5481_v38 = vpack.c.bf16 %v726_v37, %v725_v35  ;;  %v727_v41 = vld [vmem:[#allocation2 + $0x270] sm:$0xff] }
 0x107   :  { %vm8079_vm2 = vcmp.eq.s32.totalorder %v6535_v55, 1  ;;  %5460 = vmatpush3.bf16.msra.mxu1 %v5459_v40  ;;  %v5483_v40 = vpack.c.bf16 %v710_v22, %v709_v23 }
 0x108   :  { %3834 = vmatmul.mubr.msk.f32.gmra.mrb[22].mxu0 %vm8079_vm2, %v140_v51  ;;  %v716_v51 = vld [vmem:[#allocation2 + $0x218] sm:$0xff] }
 0x109   :  { %5512 = vmatpush3.bf16.msra.mxu0 %v5509_v29  ;;  %v5461_v52 = vpack.c.bf16 %v716_v51, %v715_v50  ;;  %v5477_v29 = vpack.c.bf16 %v724_v28, %v723_v27  ;;  %v711_v50 = vld [vmem:[#allocation2 + $0x1f0] sm:$0xff]  ;;  %v712_v51 = vld [vmem:[#allocation2 + $0x1f8] sm:$0xff] }
 0x10a   :  { %5514 = vmatprep.subr.bf16.mxu0 %v5513_v9 }
 0x10b   :  { %v6545_v63 = vpop.permute.xlu1 %274  ;;  %5462 = vmatprep.subr.bf16.mxu1 %v5461_v52  ;;  %v5487_v52 = vpack.c.bf16 %v712_v51, %v711_v50 }
 0x10c   :  { %vm8087_vm9 = vcmp.eq.s32.totalorder %v6545_v63, 1 }
 0x10d   :  { %4905 = vmatprep.mubr.msk.f32.mxu1 %vm8087_vm9, %v239_v59  ;;  %5516 = vmatpush3.bf16.msra.mxu0 %v5513_v9  ;;  %v700_v59 = vld [vmem:[#allocation2 + $0x198] sm:$0xff]  ;;  %v5479_v9 = vpack.c.bf16 %v708_v33, %v707_v30 }
 0x10e   :  { %4906 = vmatmul.mubr.msk.f32.gmra.mrb[8].mxu1 %vm8088_vm0, %v238_v0  ;;  %5518 = vmatprep.subr.bf16.mxu0 %v5517_v47  ;;  %v5463_v62 = vpack.c.bf16 %v700_v59, %v699_v56  ;;  %v717_v0 = vld [vmem:[#allocation2 + $0x220] sm:$0xff] }
 0x10f   :  { %v6559_v3 = vpop.permute.xlu1 %280 }
 0x110   :  { %vm8089_vm2 = vcmp.eq.s32.totalorder %v6559_v3, 1  ;;  %5464 = vmatpush3.bf16.msra.mxu1 %v5463_v62 }
 0x111   :  { %4908 = vmatprep.mubr.msk.f32.mxu1 %vm8089_vm2, %v237_v31  ;;  %5520 = vmatpush3.bf16.msra.mxu0 %v5517_v47  ;;  %v718_v31 = vld [vmem:[#allocation2 + $0x228] sm:$0xff]  ;;  %v5485_v47 = vpack.c.bf16 %v728_v45, %v727_v41 }
 0x112   :  { %4909 = vmatmul.mubr.msk.f32.gmra.mrb[10].mxu1 %vm8090_vm15, %v248_v4  ;;  %v5465_v4 = vpack.c.bf16 %v718_v31, %v717_v0 }
 0x114   :  { %5466 = vmatprep.subr.bf16.mxu1 %v5465_v4 }
 0x115   :  { %5468 = vmatpush3.bf16.msra.mxu1 %v5467_v11 }
 0x116   :  { %5470 = vmatprep.subr.bf16.mxu1 %v5469_v13 }
 0x119   :  { %5472 = vmatpush3.bf16.msra.mxu1 %v5471_v15 }
 0x11a   :  { %5474 = vmatprep.subr.bf16.mxu1 %v5473_v19 }
 0x11d   :  { %5476 = vmatpush3.bf16.msra.mxu1 %v5475_v24 }
 0x11e   :  { %5478 = vmatprep.subr.bf16.mxu1 %v5477_v29 }
 0x121   :  { %5480 = vmatpush3.bf16.msra.mxu1 %v5479_v9 }
 0x122   :  { %5482 = vmatprep.subr.bf16.mxu1 %v5481_v38 }
 0x125   :  { %5484 = vmatpush3.bf16.msra.mxu1 %v5483_v40 }
 0x126   :  { %5486 = vmatprep.subr.bf16.mxu1 %v5485_v47 }
 0x129   :  { %5488 = vmatpush3.bf16.msra.mxu1 %v5487_v52 }
 0x1af   :  { %v4061_v56 = vpop.f32.mrb[0].mxu0 }
 0x1b0   :  { %v4062_v59 = vpop.f32.mrb[1].mxu0 }
 0x1b1   :  { %v4063_v62 = vadd.f32 %v4062_v59, %v4061_v56 }
 0x1b3   :  { %v4064_v0 = vpop.f32.mrb[2].mxu0  ;;  %v429_v20 = vadd.f32 %v4063_v62, %v6571_v58 }
 0x1b4   :  { %v4065_v31 = vpop.f32.mrb[3].mxu0 }
 0x1b5   :  { %v4066_v4 = vadd.f32 %v4065_v31, %v4064_v0 }
 0x1b7   :  { %v4067_v6 = vpop.f32.mrb[4].mxu0  ;;  %v434_v17 = vadd.f32 %v4066_v4, %v6571_v58 }
 0x1b8   :  { %v4068_v7 = vpop.f32.mrb[5].mxu0 }
 0x1b9   :  { %v4069_v11 = vadd.f32 %v4068_v7, %v4067_v6 }
 0x1bb   :  { %v4070_v12 = vpop.f32.mrb[6].mxu0  ;;  %v439_v52 = vadd.f32 %v4069_v11, %v6571_v58 }
 0x1bc   :  { %v4071_v2 = vpop.f32.mrb[7].mxu0 }
 0x1bd   :  { %v4072_v13 = vadd.f32 %v4071_v2, %v4070_v12 }
 0x1bf   :  { %v4073_v14 = vpop.f32.mrb[8].mxu0  ;;  %v444_v45 = vadd.f32 %v4072_v13, %v6571_v58 }
 0x1c0   :  { %v4074_v15 = vpop.f32.mrb[9].mxu0 }
 0x1c1   :  { %v4075_v18 = vadd.f32 %v4074_v15, %v4073_v14  ;;  %v4895_v19 = vpop.f32.mrb[0].mxu1 }
 0x1c2   :  { %v559_v21 = vadd.f32 %v4895_v19, %v434_v17  ;;  %v553_v24 = vpop.f32.mrb[1].mxu1 }
 0x1c3   :  { %v554_v27 = vadd.f32 %v553_v24, %v429_v20  ;;  %v4076_v28 = vpop.f32.mrb[10].mxu0  ;;  %v449_v20 = vadd.f32 %v4075_v18, %v6571_v58 }
 0x1c4   :  { %v6575_v29 = vmax.f32 %v559_v21, 0.0  ;;  %v4077_v30 = vpop.f32.mrb[11].mxu0 }
 0x1c5   :  { %v6577_v33 = vmax.f32 %v554_v27, 0.0  ;;  %v4078_v9 = vadd.f32 %v4077_v30, %v4076_v28 }
 0x1c6   :  { %v625_v35 = vrot.slane %v6575_v29, 7  ;;  %v661_v37 = vrot.slane %v6575_v29, 1 }
 0x1c7   :  { %v8082_v38 = vrot.slane %v6577_v33, 7  ;;  %v8081_v23 = vrot.slane %v6577_v33, 1  ;;  %v4079_v22 = vpop.f32.mrb[12].mxu0  ;;  %814 = vmatprep.mubr.f32.mxu1 %v6577_v33  ;;  %v454_v19 = vadd.f32 %v4078_v9, %v6571_v58 }
 0x1c8   :  { %v4080_v40 = vpop.f32.mrb[13].mxu0 }
 0x1c9   :  { %v4081_v41 = vadd.f32 %v4080_v40, %v4079_v22  ;;  %v682_v47 = vsel %vm236_vm1, %v8081_v23, %v661_v37  ;;  %v6593_v50 = vsel %vm139_vm12, %v8082_v38, %v625_v35 }
 0x1ca   :  { %v4898_v51 = vpop.f32.mrb[2].mxu1  ;;  %4943 = vmatprep.mubr.msk.f32.mxu0 %vm285_vm4, %v682_v47 }
 0x1cb   :  { %v569_v56 = vadd.f32 %v4898_v51, %v444_v45  ;;  %v4082_v59 = vpop.f32.mrb[14].mxu0  ;;  %v563_v62 = vpop.f32.mrb[3].mxu1 }
 0x1cc   :  { %v564_v0 = vadd.f32 %v563_v62, %v439_v52  ;;  %v4083_v31 = vpop.f32.mrb[15].mxu0 }
 0x1cd   :  { %v6598_v4 = vmax.f32 %v569_v56, 0.0  ;;  %v4084_v6 = vadd.f32 %v4083_v31, %v4082_v59 }
 0x1ce   :  { %v6600_v7 = vmax.f32 %v564_v0, 0.0  ;;  %v459_v0 = vadd.f32 %v4081_v41, %v6571_v58 }
 0x1cf   :  { %v627_v12 = vrot.slane %v6598_v4, 7  ;;  %v663_v2 = vrot.slane %v6598_v4, 1  ;;  %v4085_v13 = vpop.f32.mrb[16].mxu0  ;;  %v464_v51 = vadd.f32 %v4084_v6, %v6571_v58 }
 0x1d0   :  { %v626_v14 = vrot.slane %v6600_v7, 7  ;;  %v662_v15 = vrot.slane %v6600_v7, 1  ;;  %v4086_v11 = vpop.f32.mrb[17].mxu0 }
 0x1d1   :  { %v4087_v17 = vadd.f32 %v4086_v11, %v4085_v13 }
 0x1d2   :  { %v4901_v21 = vpop.f32.mrb[4].mxu1  ;;  %v681_v24 = vsel %vm236_vm1, %v661_v37, %v662_v15  ;;  %v680_v27 = vsel %vm236_vm1, %v662_v15, %v663_v2  ;;  %v6614_v28 = vsel %vm139_vm12, %v625_v35, %v626_v14  ;;  %v6618_v30 = vsel %vm139_vm12, %v626_v14, %v627_v12 }
 0x1d3   :  { %v579_v22 = vadd.f32 %v4901_v21, %v454_v19  ;;  %v4088_v40 = vpop.f32.mrb[18].mxu0  ;;  %v573_v9 = vpop.f32.mrb[5].mxu1  ;;  %4944 = vmatmul.mubr.msk.f32.vlgmr.msra.gmra.mrb[24].mxu0 %vm286_vm3, %v681_v24 }
 0x1d4   :  { %v574_v18 = vadd.f32 %v573_v9, %v449_v20  ;;  %v4089_v45 = vpop.f32.mrb[19].mxu0  ;;  %4946 = vmatprep.mubr.msk.f32.mxu0 %vm287_vm6, %v680_v27 }
 0x1d5   :  { %v6624_v37 = vmax.f32 %v579_v22, 0.0  ;;  %v4090_v47 = vadd.f32 %v4089_v45, %v4088_v40 }
 0x1d6   :  { %v6626_v35 = vmax.f32 %v574_v18, 0.0 }
 0x1d7   :  { %v629_v52 = vrot.slane %v6624_v37, 7  ;;  %v665_v56 = vrot.slane %v6624_v37, 1  ;;  %v4091_v59 = vpop.f32.mrb[20].mxu0  ;;  %v4904_v62 = vpop.f32.mrb[6].mxu1 }
 0x1d8   :  { %v628_v31 = vrot.slane %v6626_v35, 7  ;;  %v664_v13 = vrot.slane %v6626_v35, 1  ;;  %v589_v14 = vadd.f32 %v4904_v62, %v464_v51  ;;  %v4092_v15 = vpop.f32.mrb[21].mxu0  ;;  %v583_v11 = vpop.f32.mrb[7].mxu1 }
 0x1d9   :  { %v4093_v19 = vadd.f32 %v4092_v15, %v4091_v59  ;;  %v584_v20 = vadd.f32 %v583_v11, %v459_v0 }
 0x1da   :  { %v6634_v21 = vmax.f32 %v589_v14, 0.0  ;;  %v679_v6 = vsel %vm236_vm1, %v663_v2, %v664_v13  ;;  %v678_v24 = vsel %vm236_vm1, %v664_v13, %v665_v56  ;;  %v6642_v41 = vsel %vm139_vm12, %v627_v12, %v628_v31 }
 0x1db   :  { %v6644_v27 = vmax.f32 %v584_v20, 0.0  ;;  %v4094_v22 = vpop.f32.mrb[22].mxu0  ;;  %4947 = vmatmul.mubr.msk.f32.gmra.mrb[26].mxu0 %vm288_vm8, %v679_v6  ;;  %v6650_v40 = vsel %vm139_vm12, %v628_v31, %v629_v52  ;;  %v474_v31 = vadd.f32 %v4090_v47, %v6571_v58 }
 0x1dc   :  { %v631_v9 = vrot.slane %v6634_v21, 7  ;;  %v667_v2 = vrot.slane %v6634_v21, 1  ;;  %v4095_v18 = vpop.f32.mrb[23].mxu0  ;;  %4949 = vmatprep.mubr.msk.f32.mxu0 %vm289_vm10, %v678_v24 }
 0x1dd   :  { %v630_v12 = vrot.slane %v6644_v27, 7  ;;  %v666_v45 = vrot.slane %v6644_v27, 1  ;;  %v4096_v51 = vadd.f32 %v4095_v18, %v4094_v22  ;;  %v479_v18 = vadd.f32 %v4093_v19, %v6571_v58 }
 0x1df   :  { %v677_v59 = vsel %vm236_vm1, %v665_v56, %v666_v45  ;;  %v676_v62 = vsel %vm236_vm1, %v666_v45, %v667_v2  ;;  %v641_v0 = vsel %vm139_vm12, %v629_v52, %v630_v12  ;;  %v640_v13 = vsel %vm139_vm12, %v630_v12, %v631_v9 }
 0x1e0   :  { %4950 = vmatmul.mubr.msk.f32.gmra.mrb[28].mxu0 %vm290_vm7, %v677_v59  ;;  %v469_v56 = vadd.f32 %v4087_v17, %v6571_v58  ;;  %v484_v52 = vadd.f32 %v4096_v51, %v6571_v58 }
 0x1e1   :  { %v4907_v14 = vpop.f32.mrb[8].mxu1  ;;  %4952 = vmatprep.mubr.msk.f32.mxu0 %vm291_vm5, %v676_v62 }
 0x1e2   :  { %v599_v15 = vadd.f32 %v4907_v14, %v474_v31  ;;  %v593_v11 = vpop.f32.mrb[9].mxu1 }
 0x1e3   :  { %v594_v20 = vadd.f32 %v593_v11, %v469_v56 }
 0x1e4   :  { %v621_v6 = vmax.f32 %v599_v15, 0.0 }
 0x1e5   :  { %v620_v24 = vmax.f32 %v594_v20, 0.0  ;;  %v4910_v22 = vpop.f32.mrb[10].mxu1 }
 0x1e6   :  { %v633_v47 = vrot.slane %v621_v6, 7  ;;  %v669_v45 = vrot.slane %v621_v6, 1  ;;  %v609_v59 = vadd.f32 %v4910_v22, %v484_v52  ;;  %v603_v12 = vpop.f32.mrb[11].mxu1  ;;  %v1221_v22 = vld [vmem:[#allocation2 + $0x3a0] sm:$0xff] }
 0x1e7   :  { %v632_v23 = vrot.slane %v620_v24, 7  ;;  %v668_v38 = vrot.slane %v620_v24, 1  ;;  %v604_v46 = vadd.f32 %v603_v12, %v479_v18  ;;  %v1222_v18 = vld [vmem:[#allocation2 + $0x3a8] sm:$0xff]  ;;  %v1237_v12 = vld [vmem:[#allocation2 + $0x420] sm:$0xff] }
 0x1e8   :  { %v623_v62 = vmax.f32 %v609_v59, 0.0  ;;  %v1206_v59 = vld [vmem:[#allocation2 + $0x328] sm:$0xff] }
 0x1e9   :  { %v622_v39 = vmax.f32 %v604_v46, 0.0  ;;  %v675_v17 = vsel %vm236_vm1, %v667_v2, %v668_v38  ;;  %v674_v31 = vsel %vm236_vm1, %v668_v38, %v669_v45  ;;  %v639_v51 = vsel %vm139_vm12, %v631_v9, %v632_v23 }
 0x1ea   :  { %v635_v14 = vrot.slane %v623_v62, 7  ;;  %v671_v58 = vrot.slane %v623_v62, 1  ;;  %4953 = vmatmul.mubr.msk.f32.gmra.mrb[30].mxu0 %vm8091_vm11, %v675_v17  ;;  %v638_v19 = vsel %vm139_vm12, %v632_v23, %v633_v47  ;;  %v8095_v46 = vrot.slane %v6577_v33, 7  ;;  %v1238_v17 = vld [vmem:[#allocation2 + $0x428] sm:$0xff] }
 0x1eb   :  { %v634_v56 = vrot.slane %v622_v39, 7  ;;  %v670_v15 = vrot.slane %v622_v39, 1  ;;  %4955 = vmatprep.mubr.msk.f32.mxu0 %vm8087_vm9, %v674_v31  ;;  %v8096_v9 = vrot.slane %v6577_v33, 1  ;;  %vm8097_vm9 = vcmp.eq.s32.totalorder %v6353_v43, 1  ;;  %v1218_v33 = vld [vmem:[#allocation2 + $0x388] sm:$0xff] }
 0x1ec   :  { %v647_v38 = vsel %vm139_vm12, %v635_v14, %v8095_v46  ;;  %vm8103_vm11 = vcmp.eq.s32.totalorder %v6447_v5, 1  ;;  %v5561_v31 = vpack.c.bf16 %v1238_v17, %v1237_v12  ;;  %v1232_v12 = vld [vmem:[#allocation2 + $0x3f8] sm:$0xff]  ;;  %v1215_v17 = vld [vmem:[#allocation2 + $0x370] sm:$0xff] }
 0x1ed   :  { %v683_v2 = vsel %vm236_vm1, %v671_v58, %v8096_v9  ;;  %3848 = vmatmul.mubr.msk.f32.vlgmr.msra.gmra.mrb[12].mxu1 %vm200_vm13, %v647_v38  ;;  %v673_v23 = vsel %vm236_vm1, %v669_v45, %v670_v15  ;;  %v672_v11 = vsel %vm236_vm1, %v670_v15, %v671_v58  ;;  %v637_v20 = vsel %vm139_vm12, %v633_v47, %v634_v56  ;;  %v1205_v45 = vld [vmem:[#allocation2 + $0x320] sm:$0xff]  ;;  %v1239_v15 = vld [vmem:[#allocation2 + $0x430] sm:$0xff]  ;;  %v1240_v38 = vld [vmem:[#allocation2 + $0x438] sm:$0xff] }
 0x1ee   :  { %v636_v52 = vsel %vm139_vm12, %v634_v56, %v635_v14  ;;  %819 = vmatprep.mubr.f32.mxu1 %v6575_v29  ;;  %4956 = vmatmul.mubr.msk.f32.gmra.mrb[32].mxu0 %vm8088_vm0, %v673_v23  ;;  %vm8098_vm0 = vcmp.eq.s32.totalorder %v6365_v48, 1  ;;  %v1217_v29 = vld [vmem:[#allocation2 + $0x380] sm:$0xff]  ;;  %v5529_v47 = vpack.c.bf16 %v1222_v18, %v1221_v22  ;;  %v1224_v14 = vld [vmem:[#allocation2 + $0x3b8] sm:$0xff]  ;;  %v5565_v9 = vpack.c.bf16 %v1240_v38, %v1239_v15  ;;  %v1226_v23 = vld [vmem:[#allocation2 + $0x3c8] sm:$0xff] }
 0x1ef   :  { %4958 = vmatprep.mubr.msk.f32.mxu0 %vm8089_vm2, %v672_v11  ;;  %vm8099_vm2 = vcmp.eq.s32.totalorder %v6379_v54, 1  ;;  %v1208_v56 = vld [vmem:[#allocation2 + $0x338] sm:$0xff]  ;;  %v1245_v22 = vld [vmem:[#allocation2 + $0x460] sm:$0xff] }
 0x1f1   :  { %3849 = vmatmul.mubr.msk.f32.gmra.mrb[14].mxu1 %vm8092_vm14, %v6593_v50  ;;  %v5521_v50 = vpack.c.bf16 %v1218_v33, %v1217_v29  ;;  %v1241_v29 = vld [vmem:[#allocation2 + $0x440] sm:$0xff] }
 0x1f2   :  { %824 = vmatprep.mubr.f32.mxu1 %v6600_v7  ;;  %4959 = vmatmul.mubr.msk.f32.gmra.mrb[34].mxu0 %vm8090_vm15, %v683_v2  ;;  %vm8100_vm15 = vcmp.eq.s32.totalorder %v6377_v53, 1  ;;  %v1202_v7 = vld [vmem:[#allocation2 + $0x308] sm:$0xff]  ;;  %v1225_v2 = vld [vmem:[#allocation2 + $0x3c0] sm:$0xff] }
 0x1f3   :  { %5522 = vmatprep.subr.bf16.mxu0 %v5521_v50  ;;  %v5537_v11 = vpack.c.bf16 %v1226_v23, %v1225_v2  ;;  %v1242_v50 = vld [vmem:[#allocation2 + $0x448] sm:$0xff] }
 0x1f5   :  { %3850 = vmatmul.mubr.msk.f32.gmra.mrb[16].mxu1 %vm8097_vm9, %v6614_v28  ;;  %vm8101_vm9 = vcmp.eq.s32.totalorder %v6395_v61, 1  ;;  %v1233_v28 = vld [vmem:[#allocation2 + $0x400] sm:$0xff] }
 0x1f6   :  { %829 = vmatprep.mubr.f32.mxu1 %v6598_v4  ;;  %v1201_v4 = vld [vmem:[#allocation2 + $0x300] sm:$0xff] }
 0x1f9   :  { %3851 = vmatmul.mubr.msk.f32.gmra.mrb[18].mxu1 %vm8098_vm0, %v6618_v30  ;;  %vm8102_vm0 = vcmp.eq.s32.totalorder %v6393_v60, 1  ;;  %v5523_v30 = vpack.c.bf16 %v1202_v7, %v1201_v4  ;;  %v5569_v4 = vpack.c.bf16 %v1242_v50, %v1241_v29  ;;  %v1227_v7 = vld [vmem:[#allocation2 + $0x3d0] sm:$0xff] }
 0x1fa   :  { %834 = vmatprep.mubr.f32.mxu1 %v6626_v35 }
 0x1fb   :  { %5524 = vmatpush3.bf16.msra.mxu0 %v5523_v30 }
 0x1fd   :  { %3852 = vmatmul.mubr.msk.f32.gmra.mrb[20].mxu1 %vm8099_vm2, %v6642_v41  ;;  %vm8104_vm2 = vcmp.eq.s32.totalorder %v6466_v25, 1 }
 0x1fe   :  { %839 = vmatprep.mubr.f32.mxu1 %v6624_v37  ;;  %v1234_v37 = vld [vmem:[#allocation2 + $0x408] sm:$0xff] }
 0x1ff   :  { %v5553_v35 = vpack.c.bf16 %v1234_v37, %v1233_v28  ;;  %v1228_v28 = vld [vmem:[#allocation2 + $0x3d8] sm:$0xff]  ;;  %v1211_v37 = vld [vmem:[#allocation2 + $0x350] sm:$0xff] }
 0x200   :  { %v5541_v30 = vpack.c.bf16 %v1228_v28, %v1227_v7 }
 0x201   :  { %3853 = vmatmul.mubr.msk.f32.gmra.mrb[22].mxu1 %vm8100_vm15, %v6650_v40  ;;  %vm8105_vm15 = vcmp.eq.s32.totalorder %v6489_v36, 1  ;;  %5554 = vmatprep.subr.bf16.mxu1 %v5553_v35  ;;  %v1204_v40 = vld [vmem:[#allocation2 + $0x318] sm:$0xff] }
 0x202   :  { %844 = vmatprep.mubr.f32.mxu1 %v6644_v27  ;;  %v1203_v27 = vld [vmem:[#allocation2 + $0x310] sm:$0xff]  ;;  %5556 = vmatpush3.bf16.msra.mxu1 %v5553_v35  ;;  %v1212_v35 = vld [vmem:[#allocation2 + $0x358] sm:$0xff] }
 0x205   :  { %3854 = vmatmul.mubr.msk.f32.gmra.mrb[24].mxu1 %vm8101_vm9, %v641_v0  ;;  %vm8106_vm9 = vcmp.eq.s32.totalorder %v6535_v55, 1  ;;  %v1235_v0 = vld [vmem:[#allocation2 + $0x410] sm:$0xff] }
 0x206   :  { %849 = vmatprep.mubr.f32.mxu1 %v6634_v21  ;;  %v1219_v21 = vld [vmem:[#allocation2 + $0x390] sm:$0xff] }
 0x209   :  { %3855 = vmatmul.mubr.msk.f32.gmra.mrb[26].mxu1 %vm8102_vm0, %v640_v13  ;;  %v5527_v13 = vpack.c.bf16 %v1204_v40, %v1203_v27  ;;  %v1229_v40 = vld [vmem:[#allocation2 + $0x3e0] sm:$0xff]  ;;  %vm8110_vm0 = vcmp.eq.s32.totalorder %v6365_v48, 1 }
 0x20a   :  { %854 = vmatprep.mubr.f32.mxu1 %v620_v24 }
 0x20d   :  { %3856 = vmatmul.mubr.msk.f32.gmra.mrb[28].mxu1 %vm8103_vm11, %v639_v51  ;;  %v1223_v51 = vld [vmem:[#allocation2 + $0x3b0] sm:$0xff]  ;;  %vm8107_vm11 = vcmp.eq.s32.totalorder %v6353_v43, 1 }
 0x20e   :  { %859 = vmatprep.mubr.f32.mxu1 %v621_v6  ;;  %v1236_v6 = vld [vmem:[#allocation2 + $0x418] sm:$0xff]  ;;  %v5533_v58 = vpack.c.bf16 %v1224_v14, %v1223_v51  ;;  %v1247_v51 = vld [vmem:[#allocation2 + $0x470] sm:$0xff] }
 0x20f   :  { %v5557_v24 = vpack.c.bf16 %v1236_v6, %v1235_v0  ;;  %v1230_v0 = vld [vmem:[#allocation2 + $0x3e8] sm:$0xff]  ;;  %v1213_v6 = vld [vmem:[#allocation2 + $0x360] sm:$0xff] }
 0x211   :  { %3857 = vmatmul.mubr.msk.f32.gmra.mrb[30].mxu1 %vm8104_vm2, %v638_v19  ;;  %5558 = vmatprep.subr.bf16.mxu1 %v5557_v24  ;;  %v1207_v19 = vld [vmem:[#allocation2 + $0x330] sm:$0xff]  ;;  %vm8111_vm2 = vcmp.eq.s32.totalorder %v6511_v42, 1 }
 0x212   :  { %864 = vmatprep.mubr.f32.mxu1 %v622_v39  ;;  %v1220_v39 = vld [vmem:[#allocation2 + $0x398] sm:$0xff]  ;;  %5560 = vmatpush3.bf16.msra.mxu1 %v5557_v24  ;;  %v5535_v46 = vpack.c.bf16 %v1208_v56, %v1207_v19  ;;  %v1214_v24 = vld [vmem:[#allocation2 + $0x368] sm:$0xff] }
 0x213   :  { %v5525_v41 = vpack.c.bf16 %v1220_v39, %v1219_v21  ;;  %5562 = vmatprep.subr.bf16.mxu1 %v5561_v31  ;;  %v1243_v21 = vld [vmem:[#allocation2 + $0x450] sm:$0xff]  ;;  %v5543_v39 = vpack.c.bf16 %v1212_v35, %v1211_v37  ;;  %v5547_v18 = vpack.c.bf16 %v1214_v24, %v1213_v6 }
 0x215   :  { %3858 = vmatmul.mubr.msk.f32.gmra.mrb[32].mxu1 %vm8105_vm15, %v637_v20  ;;  %5526 = vmatprep.subr.bf16.mxu0 %v5525_v41  ;;  %v1209_v20 = vld [vmem:[#allocation2 + $0x340] sm:$0xff]  ;;  %v1244_v41 = vld [vmem:[#allocation2 + $0x458] sm:$0xff]  ;;  %vm8112_vm15 = vcmp.eq.s32.totalorder %v6545_v63, 1 }
 0x216   :  { %869 = vmatprep.mubr.f32.mxu1 %v623_v62  ;;  %5528 = vmatpush3.bf16.msra.mxu0 %v5527_v13  ;;  %v5531_v62 = vpack.c.bf16 %v1206_v59, %v1205_v45  ;;  %v5573_v27 = vpack.c.bf16 %v1244_v41, %v1243_v21  ;;  %v5545_v13 = vpack.c.bf16 %v1230_v0, %v1229_v40  ;;  %v1231_v59 = vld [vmem:[#allocation2 + $0x3f0] sm:$0xff] }
 0x217   :  { %5530 = vmatprep.subr.bf16.mxu0 %v5529_v47  ;;  %5564 = vmatpush3.bf16.msra.mxu1 %v5561_v31  ;;  %v1246_v47 = vld [vmem:[#allocation2 + $0x468] sm:$0xff]  ;;  %v1216_v31 = vld [vmem:[#allocation2 + $0x378] sm:$0xff] }
 0x218   :  { %5566 = vmatprep.subr.bf16.mxu1 %v5565_v9  ;;  %v5577_v45 = vpack.c.bf16 %v1246_v47, %v1245_v22  ;;  %v5551_v14 = vpack.c.bf16 %v1216_v31, %v1215_v17 }
 0x219   :  { %3859 = vmatmul.mubr.msk.f32.gmra.mrb[34].mxu1 %vm8106_vm9, %v636_v52  ;;  %v1210_v52 = vld [vmem:[#allocation2 + $0x348] sm:$0xff]  ;;  %vm8113_vm9 = vcmp.eq.s32.totalorder %v6379_v54, 1 }
 0x21a   :  { %5532 = vmatpush3.bf16.msra.mxu0 %v5531_v62  ;;  %v5539_v33 = vpack.c.bf16 %v1210_v52, %v1209_v20  ;;  %v5549_v62 = vpack.c.bf16 %v1232_v12, %v1231_v59  ;;  %v6748_v52 = vld [vmem:[#allocation6 + $0x1] ss:$0 sm:$0xff] }
 0x21b   :  { %5534 = vmatprep.subr.bf16.mxu0 %v5533_v58  ;;  %5568 = vmatpush3.bf16.msra.mxu1 %v5565_v9  ;;  %v1248_v58 = vld [vmem:[#allocation2 + $0x478] sm:$0xff] }
 0x21c   :  { %5570 = vmatprep.subr.bf16.mxu1 %v5569_v4  ;;  %v5581_v19 = vpack.c.bf16 %v1248_v58, %v1247_v51 }
 0x21e   :  { %5536 = vmatpush3.bf16.msra.mxu0 %v5535_v46 }
 0x21f   :  { %5538 = vmatprep.subr.bf16.mxu0 %v5537_v11  ;;  %5572 = vmatpush3.bf16.msra.mxu1 %v5569_v4 }
 0x220   :  { %5574 = vmatprep.subr.bf16.mxu1 %v5573_v27 }
 0x222   :  { %5540 = vmatpush3.bf16.msra.mxu0 %v5539_v33 }
 0x223   :  { %5542 = vmatprep.subr.bf16.mxu0 %v5541_v30  ;;  %5576 = vmatpush3.bf16.msra.mxu1 %v5573_v27 }
 0x224   :  { %5578 = vmatprep.subr.bf16.mxu1 %v5577_v45 }
 0x226   :  { %5544 = vmatpush3.bf16.msra.mxu0 %v5543_v39 }
 0x227   :  { %5546 = vmatprep.subr.bf16.mxu0 %v5545_v13  ;;  %5580 = vmatpush3.bf16.msra.mxu1 %v5577_v45 }
 0x228   :  { %5582 = vmatprep.subr.bf16.mxu1 %v5581_v19 }
 0x22a   :  { %5548 = vmatpush3.bf16.msra.mxu0 %v5547_v18 }
 0x22b   :  { %5550 = vmatprep.subr.bf16.mxu0 %v5549_v62  ;;  %5584 = vmatpush3.bf16.msra.mxu1 %v5581_v19  ;;  %v1621_v19 = vld [vmem:[#allocation2 + $0x580] sm:$0xff] }
 0x22e   :  { %5552 = vmatpush3.bf16.msra.mxu0 %v5551_v14 }
 0x2a6   :  { %v4945_v56 = vpop.f32.mrb[24].mxu0 }
 0x2a7   :  { %v941_v15 = vpop.f32.mrb[25].mxu0 }
 0x2ae   :  { %v4948_v46 = vpop.f32.mrb[26].mxu0 }
 0x2af   :  { %v951_v38 = vpop.f32.mrb[27].mxu0 }
 0x2b3   :  { %v4951_v9 = vpop.f32.mrb[28].mxu0 }
 0x2b4   :  { %v961_v2 = vpop.f32.mrb[29].mxu0 }
 0x2bd   :  { %v6744_v23 = vpop.f32.mrb[30].mxu0 }
 0x2be   :  { %v6746_v11 = vpop.f32.mrb[31].mxu0 }
 0x2c0   :  { %v4157_v20 = vpop.f32.mrb[12].mxu1 }
 0x2c1   :  { %v4158_v29 = vpop.f32.mrb[13].mxu1  ;;  %v6750_v33 = vpop.f32.mrb[32].mxu0 }
 0x2c2   :  { %v4159_v50 = vadd.f32 %v4158_v29, %v4157_v20  ;;  %v6752_v4 = vpop.f32.mrb[33].mxu0 }
 0x2c4   :  { %v817_v7 = vadd.f32 %v4159_v50, %v6748_v52  ;;  %v4160_v28 = vpop.f32.mrb[14].mxu1 }
 0x2c5   :  { %v4161_v30 = vpop.f32.mrb[15].mxu1  ;;  %v6755_v37 = vpop.f32.mrb[34].mxu0 }
 0x2c6   :  { %v942_v35 = vadd.f32 %v941_v15, %v817_v7  ;;  %v4162_v21 = vadd.f32 %v4161_v30, %v4160_v28  ;;  %v6757_v39 = vpop.f32.mrb[35].mxu0 }
 0x2c8   :  { %v822_v41 = vadd.f32 %v4162_v21, %v6748_v52  ;;  %v4163_v27 = vpop.f32.mrb[16].mxu1  ;;  %v6760_v40 = vmax.f32 %v942_v35, 0.0 }
 0x2c9   :  { %v4164_v0 = vpop.f32.mrb[17].mxu1 }
 0x2ca   :  { %v947_v13 = vadd.f32 %v4945_v56, %v822_v41  ;;  %v4165_v6 = vadd.f32 %v4164_v0, %v4163_v27  ;;  %v1032_v47 = vmul.f32 %v6760_v40, %v6760_v40  ;;  %v1622_v56 = vld [vmem:[#allocation2 + $0x588] sm:$0xff] }
 0x2cb   :  { %v6774_v20 = vpack.c.bf16 %v1622_v56, %v1621_v19 }
 0x2cc   :  { %v6762_v24 = vmax.f32 %v947_v13, 0.0  ;;  %v827_v22 = vadd.f32 %v4165_v6, %v6748_v52  ;;  %v4166_v18 = vpop.f32.mrb[18].mxu1 }
 0x2cd   :  { %v4167_v45 = vpop.f32.mrb[19].mxu1  ;;  %5618 = vmatprep.subr.bf16.mxu0 %v6774_v20 }
 0x2ce   :  { %v1015_v59 = vadd.f32 %v6762_v24, %v6760_v40  ;;  %v1033_v12 = vmul.f32 %v6762_v24, %v6762_v24  ;;  %v952_v62 = vadd.f32 %v951_v38, %v827_v22  ;;  %v4168_v17 = vadd.f32 %v4167_v45, %v4166_v18 }
 0x2d0   :  { %v1044_v31 = vadd.f32 %v1033_v12, %v1032_v47  ;;  %v6771_v51 = vmax.f32 %v952_v62, 0.0  ;;  %v832_v14 = vadd.f32 %v4168_v17, %v6748_v52  ;;  %v4169_v58 = vpop.f32.mrb[20].mxu1 }
 0x2d1   :  { %v4170_v15 = vpop.f32.mrb[21].mxu1 }
 0x2d2   :  { %v1016_v29 = vadd.f32 %v1015_v59, %v6771_v51  ;;  %v1034_v50 = vmul.f32 %v6771_v51, %v6771_v51  ;;  %v957_v7 = vadd.f32 %v4948_v46, %v832_v14  ;;  %v4171_v28 = vadd.f32 %v4170_v15, %v4169_v58 }
 0x2d4   :  { %v1045_v38 = vadd.f32 %v1044_v31, %v1034_v50  ;;  %v6780_v30 = vmax.f32 %v957_v7, 0.0  ;;  %v837_v35 = vadd.f32 %v4171_v28, %v6748_v52  ;;  %v4172_v21 = vpop.f32.mrb[22].mxu1 }
 0x2d5   :  { %v4173_v41 = vpop.f32.mrb[23].mxu1 }
 0x2d6   :  { %v1017_v27 = vadd.f32 %v1016_v29, %v6780_v30  ;;  %v1035_v0 = vmul.f32 %v6780_v30, %v6780_v30  ;;  %v962_v13 = vadd.f32 %v961_v2, %v837_v35  ;;  %v4174_v6 = vadd.f32 %v4173_v41, %v4172_v21 }
 0x2d8   :  { %v1046_v22 = vadd.f32 %v1045_v38, %v1035_v0  ;;  %v6786_v18 = vmax.f32 %v962_v13, 0.0  ;;  %v842_v46 = vadd.f32 %v4174_v6, %v6748_v52  ;;  %v4175_v47 = vpop.f32.mrb[24].mxu1 }
 0x2d9   :  { %v4176_v45 = vpop.f32.mrb[25].mxu1 }
 0x2da   :  { %v1018_v59 = vadd.f32 %v1017_v27, %v6786_v18  ;;  %v1036_v12 = vmul.f32 %v6786_v18, %v6786_v18  ;;  %v967_v62 = vadd.f32 %v4951_v9, %v842_v46  ;;  %v4177_v17 = vadd.f32 %v4176_v45, %v4175_v47 }
 0x2dc   :  { %v1047_v31 = vadd.f32 %v1046_v22, %v1036_v12  ;;  %v6792_v14 = vmax.f32 %v967_v62, 0.0  ;;  %v847_v2 = vadd.f32 %v4177_v17, %v6748_v52  ;;  %v4178_v58 = vpop.f32.mrb[26].mxu1 }
 0x2dd   :  { %v4179_v19 = vpop.f32.mrb[27].mxu1 }
 0x2de   :  { %v1019_v56 = vadd.f32 %v1018_v59, %v6792_v14  ;;  %v1037_v15 = vmul.f32 %v6792_v14, %v6792_v14  ;;  %v972_v29 = vadd.f32 %v6746_v11, %v847_v2  ;;  %v4180_v50 = vadd.f32 %v4179_v19, %v4178_v58 }
 0x2e0   :  { %v1048_v7 = vadd.f32 %v1047_v31, %v1037_v15  ;;  %v6799_v28 = vmax.f32 %v972_v29, 0.0  ;;  %v852_v9 = vadd.f32 %v4180_v50, %v6748_v52  ;;  %v4181_v38 = vpop.f32.mrb[28].mxu1 }
 0x2e1   :  { %v4182_v35 = vpop.f32.mrb[29].mxu1 }
 0x2e2   :  { %v1020_v21 = vadd.f32 %v1019_v56, %v6799_v28  ;;  %v1038_v41 = vmul.f32 %v6799_v28, %v6799_v28  ;;  %v977_v27 = vadd.f32 %v6744_v23, %v852_v9  ;;  %v4183_v0 = vadd.f32 %v4182_v35, %v4181_v38 }
 0x2e4   :  { %v1049_v13 = vadd.f32 %v1048_v7, %v1038_v41  ;;  %v6806_v6 = vmax.f32 %v977_v27, 0.0  ;;  %v857_v11 = vadd.f32 %v4183_v0, %v6748_v52  ;;  %v4184_v22 = vpop.f32.mrb[30].mxu1 }
 0x2e5   :  { %v4185_v46 = vpop.f32.mrb[31].mxu1 }
 0x2e6   :  { %v1021_v47 = vadd.f32 %v1020_v21, %v6806_v6  ;;  %v1039_v45 = vmul.f32 %v6806_v6, %v6806_v6  ;;  %v982_v59 = vadd.f32 %v6752_v4, %v857_v11  ;;  %v4186_v12 = vadd.f32 %v4185_v46, %v4184_v22 }
 0x2e8   :  { %v1050_v62 = vadd.f32 %v1049_v13, %v1039_v45  ;;  %v6813_v17 = vmax.f32 %v982_v59, 0.0  ;;  %v862_v23 = vadd.f32 %v4186_v12, %v6748_v52  ;;  %v4187_v31 = vpop.f32.mrb[32].mxu1 }
 0x2e9   :  { %v4188_v2 = vpop.f32.mrb[33].mxu1 }
 0x2ea   :  { %v1022_v58 = vadd.f32 %v1021_v47, %v6813_v17  ;;  %v1040_v19 = vmul.f32 %v6813_v17, %v6813_v17  ;;  %v987_v56 = vadd.f32 %v6750_v33, %v862_v23  ;;  %v4189_v15 = vadd.f32 %v4188_v2, %v4187_v31 }
 0x2ec   :  { %v1051_v29 = vadd.f32 %v1050_v62, %v1040_v19  ;;  %v6820_v50 = vmax.f32 %v987_v56, 0.0  ;;  %v867_v4 = vadd.f32 %v4189_v15, %v6748_v52  ;;  %v4190_v7 = vpop.f32.mrb[34].mxu1 }
 0x2ed   :  { %v4191_v9 = vpop.f32.mrb[35].mxu1 }
 0x2ee   :  { %v1023_v38 = vadd.f32 %v1022_v58, %v6820_v50  ;;  %v1041_v35 = vmul.f32 %v6820_v50, %v6820_v50  ;;  %v992_v21 = vadd.f32 %v6757_v39, %v867_v4  ;;  %v4192_v41 = vadd.f32 %v4191_v9, %v4190_v7 }
 0x2f0   :  { %v1052_v27 = vadd.f32 %v1051_v29, %v1041_v35  ;;  %v6827_v0 = vmax.f32 %v992_v21, 0.0  ;;  %v872_v33 = vadd.f32 %v4192_v41, %v6748_v52 }
 0x2f2   :  { %v1024_v13 = vadd.f32 %v1023_v38, %v6827_v0  ;;  %v1042_v11 = vmul.f32 %v6827_v0, %v6827_v0  ;;  %v997_v22 = vadd.f32 %v6755_v37, %v872_v33 }
 0x2f4   :  { %v1053_v46 = vadd.f32 %v1052_v27, %v1042_v11  ;;  %v1011_v47 = vmax.f32 %v997_v22, 0.0 }
 0x2f6   :  { %v1025_v45 = vadd.f32 %v1024_v13, %v1011_v47  ;;  %v1043_v59 = vmul.f32 %v1011_v47, %v1011_v47 }
 0x2f8   :  { %v1026_v12 = vrot.slane %v1025_v45, 4  ;;  %v1054_v62 = vadd.f32 %v1053_v46, %v1043_v59  ;;  %v1625_v59 = vld [vmem:[#allocation2 + $0x5a0] sm:$0xff] }
 0x2fa   :  { %v1027_v39 = vadd.f32 %v1026_v12, %v1025_v45  ;;  %v1055_v23 = vrot.slane %v1054_v62, 4  ;;  %v1623_v45 = vld [vmem:[#allocation2 + $0x590] sm:$0xff]  ;;  %v1626_v12 = vld [vmem:[#allocation2 + $0x5a8] sm:$0xff] }
 0x2fc   :  { %v1028_v31 = vrot.slane %v1027_v39, 2  ;;  %v1056_v2 = vadd.f32 %v1055_v23, %v1054_v62  ;;  %v6862_v23 = vld [vmem:[#allocation6 + $0x8] ss:$0 sm:$0xff] }
 0x2fe   :  { %v1029_v58 = vadd.f32 %v1028_v31, %v1027_v39  ;;  %v1057_v19 = vrot.slane %v1056_v2, 2 }
 0x300   :  { %v1030_v52 = vrot.slane %v1029_v58, 1  ;;  %v1058_v56 = vadd.f32 %v1057_v19, %v1056_v2  ;;  %v6866_v2 = vpack.c.bf16 %v1626_v12, %v1625_v59 }
 0x302   :  { %v1031_v15 = vadd.f32 %v1030_v52, %v1029_v58  ;;  %v1059_v29 = vrot.slane %v1058_v56, 1 }
 0x304   :  { %v1060_v4 = vadd.f32 %v1059_v29, %v1058_v56  ;;  %v6834_v7 = vmul.f32 0.010416667, %v1031_v15  ;;  %v6868_v15 = vld [vmem:[#allocation6 + $0x9] ss:$0 sm:$0xff] }
 0x306   :  { %v1062_v37 = vmul.f32 0.010416667, %v1060_v4  ;;  %v1063_v9 = vmul.f32 %v6834_v7, %v6834_v7  ;;  %v1077_v38 = vsub.f32 %v1011_v47, %v6834_v7  ;;  %v1066_v35 = vsub.f32 %v6760_v40, %v6834_v7 }
 0x307   :  { %v1067_v21 = vsub.f32 %v6762_v24, %v6834_v7  ;;  %v1068_v41 = vsub.f32 %v6771_v51, %v6834_v7  ;;  %v1069_v27 = vsub.f32 %v6780_v30, %v6834_v7  ;;  %v1070_v33 = vsub.f32 %v6786_v18, %v6834_v7  ;;  %v1014_v24 = vld [vmem:[#allocation6 + $0xa] sm:$0x1] }
 0x308   :  { %v1064_v13 = vsub.f32 %v1062_v37, %v1063_v9  ;;  %v1071_v11 = vsub.f32 %v6792_v14, %v6834_v7  ;;  %v1072_v22 = vsub.f32 %v6799_v28, %v6834_v7  ;;  %v1073_v40 = vsub.f32 %v6806_v6, %v6834_v7  ;;  %v1624_v28 = vld [vmem:[#allocation2 + $0x598] sm:$0xff] }
 0x309   :  { %v1074_v51 = vsub.f32 %v6813_v17, %v6834_v7  ;;  %v1075_v30 = vsub.f32 %v6820_v50, %v6834_v7  ;;  %v1076_v18 = vsub.f32 %v6827_v0, %v6834_v7  ;;  %v1082_v14 = vsub.s32 0, %v6341_v32 }
 0x30a   :  { %v1065_v46 = vmax.f32 %v1064_v13, 0.0  ;;  %v6864_v31 = vpack.c.bf16 %v1624_v28, %v1623_v45  ;;  %v6148_v32 = vmov 0.0|0.0  }
 0x30c   :  { %v1078_v47 = vadd.f32 %v1065_v46, %v1014_v24 }
 0x30e   :  { %6017 = vrsqrt.f32 %v1078_v47 }
 0x318   :  { %v6018_v62 = vpop.eup %6017 }
 0x319   :  { %v1083_v39 = vrot.slane %v6018_v62, %v1082_v14 }
 0x31b   :  { %v1095_v58 = vmul.f32 %v1083_v39, %v1077_v38  ;;  %v1084_v19 = vmul.f32 %v1083_v39, %v1066_v35  ;;  %v1085_v52 = vmul.f32 %v1083_v39, %v1067_v21  ;;  %v1086_v56 = vmul.f32 %v1083_v39, %v1068_v41 }
 0x31c   :  { %v1087_v29 = vmul.f32 %v1083_v39, %v1069_v27  ;;  %v1088_v4 = vmul.f32 %v1083_v39, %v1070_v33  ;;  %v1089_v37 = vmul.f32 %v1083_v39, %v1071_v11  ;;  %v1090_v9 = vmul.f32 %v1083_v39, %v1072_v22 }
 0x31d   :  { %v1111_v13 = vmul.f32 %v6862_v23, %v1095_v58  ;;  %v1100_v24 = vmul.f32 %v6862_v23, %v1084_v19  ;;  %v1101_v46 = vmul.f32 %v6862_v23, %v1085_v52  ;;  %v1102_v47 = vmul.f32 %v6862_v23, %v1086_v56 }
 0x31e   :  { %v1103_v14 = vmul.f32 %v6862_v23, %v1087_v29  ;;  %v1104_v38 = vmul.f32 %v6862_v23, %v1088_v4  ;;  %v1105_v35 = vmul.f32 %v6862_v23, %v1089_v37  ;;  %v1106_v21 = vmul.f32 %v6862_v23, %v1090_v9 }
 0x31f   :  { %v6879_v41 = vadd.f32 %v6868_v15, %v1111_v13  ;;  %v1116_v27 = vadd.f32 %v6868_v15, %v1100_v24  ;;  %v1117_v33 = vadd.f32 %v6868_v15, %v1101_v46  ;;  %v1118_v11 = vadd.f32 %v6868_v15, %v1102_v47 }
 0x320   :  { %v6885_v22 = vadd.f32 %v6868_v15, %v1103_v14  ;;  %v6888_v45 = vadd.f32 %v6868_v15, %v1104_v38  ;;  %v6891_v28 = vadd.f32 %v6868_v15, %v1105_v35  ;;  %v6894_v59 = vadd.f32 %v6868_v15, %v1106_v21 }
 0x321   :  { %v1128_v12 = vrot.slane %v1116_v27, 7  ;;  %1318 = vmatprep.mubr.f32.mxu0 %v1116_v27  ;;  %v1139_v62 = vrot.slane %v6879_v41, 7  ;;  %v1164_v58 = vrot.slane %v1116_v27, 1  ;;  %v1165_v19 = vrot.slane %v1117_v33, 1 }
 0x322   :  { %v1166_v52 = vrot.slane %v1118_v11, 1  ;;  %v1167_v56 = vrot.slane %v6885_v22, 1  ;;  %v1129_v29 = vrot.slane %v1117_v33, 7  ;;  %v1168_v4 = vrot.slane %v6888_v45, 1 }
 0x323   :  { %v1151_v37 = vsel %vm139_vm12, %v1139_v62, %v1128_v12  ;;  %v1186_v9 = vsel %vm236_vm1, %v1164_v58, %v1165_v19  ;;  %v1169_v13 = vrot.slane %v6891_v28, 1  ;;  %v1130_v24 = vrot.slane %v1118_v11, 7 }
 0x324   :  { %3875 = vmatmul.mubr.msk.f32.vlgmr.msra.gmra.mrb[36].mxu0 %vm200_vm13, %v1151_v37  ;;  %4993 = vmatprep.mubr.msk.f32.mxu1 %vm285_vm4, %v1186_v9  ;;  %v1185_v46 = vsel %vm236_vm1, %v1165_v19, %v1166_v52  ;;  %v1184_v47 = vsel %vm236_vm1, %v1166_v52, %v1167_v56  ;;  %v1150_v14 = vsel %vm139_vm12, %v1128_v12, %v1129_v29  ;;  %v1170_v38 = vrot.slane %v6894_v59, 1 }
 0x325   :  { %1323 = vmatprep.mubr.f32.mxu0 %v1117_v33  ;;  %4994 = vmatmul.mubr.msk.f32.vlgmr.msra.gmra.mrb[36].mxu1 %vm286_vm3, %v1185_v46  ;;  %v1183_v35 = vsel %vm236_vm1, %v1167_v56, %v1168_v4  ;;  %v1182_v21 = vsel %vm236_vm1, %v1168_v4, %v1169_v13  ;;  %v1149_v27 = vsel %vm139_vm12, %v1129_v29, %v1130_v24  ;;  %v1131_v19 = vrot.slane %v6885_v22, 7 }
 0x326   :  { %4996 = vmatprep.mubr.msk.f32.mxu1 %vm287_vm6, %v1184_v47  ;;  %v1181_v33 = vsel %vm236_vm1, %v1169_v13, %v1170_v38  ;;  %v1091_v12 = vmul.f32 %v1083_v39, %v1073_v40  ;;  %v1092_v52 = vmul.f32 %v1083_v39, %v1074_v51  ;;  %v1093_v56 = vmul.f32 %v1083_v39, %v1075_v30 }
 0x327   :  { %v1148_v29 = vsel %vm139_vm12, %v1130_v24, %v1131_v19  ;;  %v1132_v4 = vrot.slane %v6888_v45, 7  ;;  %v1094_v37 = vmul.f32 %v1083_v39, %v1076_v18  ;;  %v1175_v6 = vrot.slane %v6879_v41, 1  ;;  %5620 = vmatpush3.bf16.msra.mxu0 %v6774_v20 }
 0x328   :  { %3876 = vmatmul.mubr.msk.f32.gmra.mrb[38].mxu0 %vm8092_vm14, %v1150_v14  ;;  %v1107_v17 = vmul.f32 %v6862_v23, %v1091_v12  ;;  %v1108_v50 = vmul.f32 %v6862_v23, %v1092_v52  ;;  %v1109_v40 = vmul.f32 %v6862_v23, %v1093_v56  ;;  %v1133_v51 = vrot.slane %v6891_v28, 7  ;;  %5622 = vmatprep.subr.bf16.mxu0 %v6864_v31 }
 0x329   :  { %1328 = vmatprep.mubr.f32.mxu0 %v1118_v11  ;;  %4997 = vmatmul.mubr.msk.f32.gmra.mrb[38].mxu1 %vm288_vm8, %v1183_v35  ;;  %v1147_v20 = vsel %vm139_vm12, %v1131_v19, %v1132_v4  ;;  %v1110_v0 = vmul.f32 %v6862_v23, %v1094_v37  ;;  %v1187_v7 = vsel %vm236_vm1, %v1175_v6, %v1164_v58  ;;  %v1134_v30 = vrot.slane %v6894_v59, 7 }
 0x32a   :  { %4999 = vmatprep.mubr.msk.f32.mxu1 %vm289_vm10, %v1182_v21  ;;  %v1123_v18 = vadd.f32 %v6868_v15, %v1107_v17  ;;  %v1124_v39 = vadd.f32 %v6868_v15, %v1108_v50  ;;  %v1125_v11 = vadd.f32 %v6868_v15, %v1109_v40  ;;  %v1146_v9 = vsel %vm139_vm12, %v1132_v4, %v1133_v51  ;;  %v1632_v50 = vld [vmem:[#allocation2 + $0x5d8] sm:$0xff] }
 0x32b   :  { %v1126_v13 = vadd.f32 %v6868_v15, %v1110_v0  ;;  %v1145_v23 = vsel %vm139_vm12, %v1133_v51, %v1134_v30  ;;  %5624 = vmatpush3.bf16.msra.mxu0 %v6864_v31  ;;  %vm8116_vm14 = vcmp.eq.s32.totalorder %v6377_v53, 1  ;;  %v1633_v51 = vld [vmem:[#allocation2 + $0x5e0] sm:$0xff]  ;;  %v1635_v0 = vld [vmem:[#allocation2 + $0x5f0] sm:$0xff] }
 0x32c   :  { %3877 = vmatmul.mubr.msk.f32.gmra.mrb[40].mxu0 %vm8107_vm11, %v1149_v27  ;;  %v1171_v58 = vrot.slane %v1123_v18, 1  ;;  %v1172_v24 = vrot.slane %v1124_v39, 1  ;;  %v1173_v46 = vrot.slane %v1125_v11, 1  ;;  %v1135_v47 = vrot.slane %v1123_v18, 7  ;;  %5626 = vmatprep.subr.bf16.mxu0 %v6866_v2 }
 0x32d   :  { %1333 = vmatprep.mubr.f32.mxu0 %v6885_v22  ;;  %5000 = vmatmul.mubr.msk.f32.gmra.mrb[40].mxu1 %vm290_vm7, %v1181_v33  ;;  %v1174_v15 = vrot.slane %v1126_v13, 1  ;;  %v1136_v35 = vrot.slane %v1124_v39, 7  ;;  %v1137_v21 = vrot.slane %v1125_v11, 7  ;;  %v1138_v19 = vrot.slane %v1126_v13, 7 }
 0x32e   :  { %v1180_v31 = vsel %vm236_vm1, %v1170_v38, %v1171_v58  ;;  %v1179_v27 = vsel %vm236_vm1, %v1171_v58, %v1172_v24  ;;  %v1178_v12 = vsel %vm236_vm1, %v1172_v24, %v1173_v46  ;;  %v1144_v52 = vsel %vm139_vm12, %v1134_v30, %v1135_v47  ;;  %v1607_v58 = vld [vmem:[#allocation2 + $0x510] sm:$0xff]  ;;  %v1608_v24 = vld [vmem:[#allocation2 + $0x518] sm:$0xff] }
 0x32f   :  { %5002 = vmatprep.mubr.msk.f32.mxu1 %vm291_vm5, %v1180_v31  ;;  %v1177_v33 = vsel %vm236_vm1, %v1173_v46, %v1174_v15  ;;  %v1176_v56 = vsel %vm236_vm1, %v1174_v15, %v1175_v6  ;;  %v1143_v38 = vsel %vm139_vm12, %v1135_v47, %v1136_v35  ;;  %v1142_v4 = vsel %vm139_vm12, %v1136_v35, %v1137_v21  ;;  %v1631_v6 = vld [vmem:[#allocation2 + $0x5d0] sm:$0xff]  ;;  %v1592_v15 = vld [vmem:[#allocation2 + $0x498] sm:$0xff]  ;;  %v1593_v31 = vld [vmem:[#allocation2 + $0x4a0] sm:$0xff] }
 0x330   :  { %3878 = vmatmul.mubr.msk.f32.gmra.mrb[42].mxu0 %vm8110_vm0, %v1148_v29  ;;  %v1141_v37 = vsel %vm139_vm12, %v1137_v21, %v1138_v19  ;;  %v1140_v17 = vsel %vm139_vm12, %v1138_v19, %v1139_v62  ;;  %vm8114_vm11 = vcmp.eq.s32.totalorder %v6538_v57, 1  ;;  %vm8115_vm0 = vcmp.eq.s32.totalorder %v6559_v3, 1  ;;  %v1630_v62 = vld [vmem:[#allocation2 + $0x5c8] sm:$0xff]  ;;  %v1591_v46 = vld [vmem:[#allocation2 + $0x490] sm:$0xff]  ;;  %v1609_v21 = vld [vmem:[#allocation2 + $0x520] sm:$0xff] }
 0x331   :  { %1338 = vmatprep.mubr.f32.mxu0 %v6888_v45  ;;  %5003 = vmatmul.mubr.msk.f32.gmra.mrb[42].mxu1 %vm8111_vm2, %v1179_v27  ;;  %vm8117_vm2 = vcmp.eq.s32.totalorder %v6553_v1, 1  ;;  %v1628_v45 = vld [vmem:[#allocation2 + $0x5b8] sm:$0xff]  ;;  %v5637_v40 = vpack.c.bf16 %v1632_v50, %v1631_v6  ;;  %v5589_v47 = vpack.c.bf16 %v1608_v24, %v1607_v58  ;;  %v5591_v35 = vpack.c.bf16 %v1592_v15, %v1591_v46  ;;  %v1610_v19 = vld [vmem:[#allocation2 + $0x528] sm:$0xff]  ;;  %v1615_v6 = vld [vmem:[#allocation2 + $0x550] sm:$0xff] }
 0x332   :  { %5005 = vmatprep.mubr.msk.f32.mxu1 %vm8112_vm15, %v1178_v12  ;;  %5628 = vmatpush3.bf16.msra.mxu0 %v6866_v2  ;;  %vm8118_vm15 = vcmp.eq.s32.totalorder %v6395_v61, 1  ;;  %v1627_v2 = vld [vmem:[#allocation2 + $0x5b0] sm:$0xff]  ;;  %v5593_v27 = vpack.c.bf16 %v1610_v19, %v1609_v21  ;;  %v1594_v12 = vld [vmem:[#allocation2 + $0x4a8] sm:$0xff]  ;;  %v1616_v50 = vld [vmem:[#allocation2 + $0x558] sm:$0xff] }
 0x333   :  { %v1603_v58 = vld [vmem:[#allocation2 + $0x4f0] sm:$0xff]  ;;  %v1604_v24 = vld [vmem:[#allocation2 + $0x4f8] sm:$0xff]  ;;  %v7036_v21 = vld [vmem:[#allocation6 + $0x2] ss:$0 sm:$0xff] }
 0x334   :  { %3879 = vmatmul.mubr.msk.f32.gmra.mrb[44].mxu0 %vm8113_vm9, %v1147_v20  ;;  %vm8119_vm9 = vcmp.eq.s32.totalorder %v6393_v60, 1  ;;  %v1634_v20 = vld [vmem:[#allocation2 + $0x5e8] sm:$0xff]  ;;  %v5615_v46 = vpack.c.bf16 %v1604_v24, %v1603_v58 }
 0x335   :  { %1343 = vmatprep.mubr.f32.mxu0 %v6891_v28  ;;  %5006 = vmatmul.mubr.msk.f32.gmra.mrb[44].mxu1 %vm8114_vm11, %v1177_v33  ;;  %vm8120_vm11 = vcmp.eq.s32.totalorder %v6447_v5, 1  ;;  %v5629_v28 = vpack.c.bf16 %v1628_v45, %v1627_v2  ;;  %v1611_v33 = vld [vmem:[#allocation2 + $0x530] sm:$0xff]  ;;  %v1613_v2 = vld [vmem:[#allocation2 + $0x540] sm:$0xff]  ;;  %v1614_v45 = vld [vmem:[#allocation2 + $0x548] sm:$0xff] }
 0x336   :  { %5008 = vmatprep.mubr.msk.f32.mxu1 %vm8115_vm0, %v1176_v56  ;;  %vm8121_vm0 = vcmp.eq.s32.totalorder %v6466_v25, 1  ;;  %v1612_v56 = vld [vmem:[#allocation2 + $0x538] sm:$0xff] }
 0x337   :  { %5630 = vmatprep.subr.bf16.mxu0 %v5629_v28 }
 0x338   :  { %3880 = vmatmul.mubr.msk.f32.gmra.mrb[46].mxu0 %vm8116_vm14, %v1146_v9  ;;  %vm8122_vm14 = vcmp.eq.s32.totalorder %v6489_v36, 1 }
 0x339   :  { %1348 = vmatprep.mubr.f32.mxu0 %v6894_v59  ;;  %5009 = vmatmul.mubr.msk.f32.gmra.mrb[46].mxu1 %vm8117_vm2, %v1187_v7  ;;  %vm8123_vm2 = vcmp.eq.s32.totalorder %v6535_v55, 1  ;;  %v1629_v59 = vld [vmem:[#allocation2 + $0x5c0] sm:$0xff]  ;;  %v1636_v7 = vld [vmem:[#allocation2 + $0x5f8] sm:$0xff] }
 0x33a   :  { %5632 = vmatpush3.bf16.msra.mxu0 %v5629_v28  ;;  %v5633_v29 = vpack.c.bf16 %v1630_v62, %v1629_v59  ;;  %v5645_v30 = vpack.c.bf16 %v1636_v7, %v1635_v0  ;;  %v1597_v28 = vld [vmem:[#allocation2 + $0x4c0] sm:$0xff]  ;;  %v5601_v59 = vpack.c.bf16 %v1614_v45, %v1613_v2  ;;  %v1598_v62 = vld [vmem:[#allocation2 + $0x4c8] sm:$0xff] }
 0x33b   :  { %v1618_v0 = vld [vmem:[#allocation2 + $0x568] sm:$0xff] }
 0x33c   :  { %3881 = vmatmul.mubr.msk.f32.gmra.mrb[48].mxu0 %vm8118_vm15, %v1145_v23  ;;  %5634 = vmatprep.subr.bf16.mxu0 %v5633_v29  ;;  %vm8124_vm15 = vcmp.eq.s32.totalorder %v6511_v42, 1 }
 0x33d   :  { %1353 = vmatprep.mubr.f32.mxu0 %v1123_v18  ;;  %v1605_v18 = vld [vmem:[#allocation2 + $0x500] sm:$0xff] }
 0x33e   :  { %5636 = vmatpush3.bf16.msra.mxu0 %v5633_v29  ;;  %v5603_v29 = vpack.c.bf16 %v1598_v62, %v1597_v28 }
 0x33f   :  { %5638 = vmatprep.subr.bf16.mxu0 %v5637_v40 }
 0x340   :  { %3882 = vmatmul.mubr.msk.f32.gmra.mrb[50].mxu0 %vm8119_vm9, %v1144_v52  ;;  %v5595_v52 = vpack.c.bf16 %v1594_v12, %v1593_v31  ;;  %vm8125_vm9 = vcmp.eq.s32.totalorder %v6545_v63, 1 }
 0x341   :  { %1358 = vmatprep.mubr.f32.mxu0 %v1124_v39  ;;  %v1606_v39 = vld [vmem:[#allocation2 + $0x508] sm:$0xff] }
 0x342   :  { %5640 = vmatpush3.bf16.msra.mxu0 %v5637_v40  ;;  %v5585_v9 = vpack.c.bf16 %v1606_v39, %v1605_v18  ;;  %v1599_v40 = vld [vmem:[#allocation2 + $0x4d0] sm:$0xff]  ;;  %v1601_v18 = vld [vmem:[#allocation2 + $0x4e0] sm:$0xff]  ;;  %v1602_v39 = vld [vmem:[#allocation2 + $0x4e8] sm:$0xff] }
 0x344   :  { %3883 = vmatmul.mubr.msk.f32.gmra.mrb[52].mxu0 %vm8120_vm11, %v1143_v38  ;;  %5586 = vmatprep.subr.bf16.mxu1 %v5585_v9  ;;  %v1595_v38 = vld [vmem:[#allocation2 + $0x4b0] sm:$0xff]  ;;  %v1620_v9 = vld [vmem:[#allocation2 + $0x578] sm:$0xff]  ;;  %vm8126_vm11 = vcmp.eq.s32.totalorder %v6538_v57, 1 }
 0x345   :  { %1363 = vmatprep.mubr.f32.mxu0 %v1125_v11  ;;  %v1589_v11 = vld [vmem:[#allocation2 + $0x480] sm:$0xff] }
 0x348   :  { %3884 = vmatmul.mubr.msk.f32.gmra.mrb[54].mxu0 %vm8121_vm0, %v1142_v4  ;;  %v5597_v4 = vpack.c.bf16 %v1612_v56, %v1611_v33  ;;  %vm8127_vm0 = vcmp.eq.s32.totalorder %v6559_v3, 1 }
 0x349   :  { %1368 = vmatprep.mubr.f32.mxu0 %v1126_v13  ;;  %v1590_v13 = vld [vmem:[#allocation2 + $0x488] sm:$0xff] }
 0x34a   :  { %v5587_v23 = vpack.c.bf16 %v1590_v13, %v1589_v11  ;;  %v1619_v11 = vld [vmem:[#allocation2 + $0x570] sm:$0xff]  ;;  %v5611_v13 = vpack.c.bf16 %v1602_v39, %v1601_v18 }
 0x34c   :  { %3885 = vmatmul.mubr.msk.f32.gmra.mrb[56].mxu0 %vm8122_vm14, %v1141_v37  ;;  %5588 = vmatpush3.bf16.msra.mxu1 %v5587_v23  ;;  %v1596_v37 = vld [vmem:[#allocation2 + $0x4b8] sm:$0xff]  ;;  %v5613_v23 = vpack.c.bf16 %v1620_v9, %v1619_v11  ;;  %vm8128_vm14 = vcmp.eq.s32.totalorder %v6553_v1, 1 }
 0x34d   :  { %1373 = vmatprep.mubr.f32.mxu0 %v6879_v41  ;;  %v5641_v41 = vpack.c.bf16 %v1634_v20, %v1633_v51  ;;  %5590 = vmatprep.subr.bf16.mxu1 %v5589_v47  ;;  %v5605_v51 = vpack.c.bf16 %v1616_v50, %v1615_v6  ;;  %v1600_v20 = vld [vmem:[#allocation2 + $0x4d8] sm:$0xff] }
 0x34e   :  { %v5607_v7 = vpack.c.bf16 %v1600_v20, %v1599_v40 }
 0x34f   :  { %5642 = vmatprep.subr.bf16.mxu0 %v5641_v41 }
 0x350   :  { %3886 = vmatmul.mubr.msk.f32.gmra.mrb[58].mxu0 %vm8123_vm2, %v1140_v17  ;;  %5592 = vmatpush3.bf16.msra.mxu1 %v5591_v35  ;;  %v5599_v17 = vpack.c.bf16 %v1596_v37, %v1595_v38  ;;  %vm8129_vm2 = vcmp.eq.s32.totalorder %v6367_v49, 1 }
 0x351   :  { %5644 = vmatpush3.bf16.msra.mxu0 %v5641_v41  ;;  %5594 = vmatprep.subr.bf16.mxu1 %v5593_v27  ;;  %v1617_v41 = vld [vmem:[#allocation2 + $0x560] sm:$0xff] }
 0x352   :  { %5646 = vmatprep.subr.bf16.mxu0 %v5645_v30 }
 0x354   :  { %5596 = vmatpush3.bf16.msra.mxu1 %v5595_v52 }
 0x355   :  { %5648 = vmatpush3.bf16.msra.mxu0 %v5645_v30  ;;  %5598 = vmatprep.subr.bf16.mxu1 %v5597_v4  ;;  %v5609_v30 = vpack.c.bf16 %v1618_v0, %v1617_v41 }
 0x358   :  { %5600 = vmatpush3.bf16.msra.mxu1 %v5599_v17 }
 0x359   :  { %5602 = vmatprep.subr.bf16.mxu1 %v5601_v59 }
 0x35c   :  { %5604 = vmatpush3.bf16.msra.mxu1 %v5603_v29 }
 0x35d   :  { %5606 = vmatprep.subr.bf16.mxu1 %v5605_v51 }
 0x360   :  { %5608 = vmatpush3.bf16.msra.mxu1 %v5607_v7 }
 0x361   :  { %5610 = vmatprep.subr.bf16.mxu1 %v5609_v30 }
 0x364   :  { %5612 = vmatpush3.bf16.msra.mxu1 %v5611_v13 }
 0x365   :  { %5614 = vmatprep.subr.bf16.mxu1 %v5613_v23 }
 0x368   :  { %5616 = vmatpush3.bf16.msra.mxu1 %v5615_v46 }
 0x3f7   :  { %v4253_v47 = vpop.f32.mrb[36].mxu0 }
 0x3f8   :  { %v4254_v15 = vpop.f32.mrb[37].mxu0  ;;  %v4995_v35 = vpop.f32.mrb[36].mxu1 }
 0x3f9   :  { %v4255_v19 = vadd.f32 %v4254_v15, %v4253_v47  ;;  %v1445_v31 = vpop.f32.mrb[37].mxu1 }
 0x3fb   :  { %v1321_v27 = vadd.f32 %v4255_v19, %v7036_v21  ;;  %v4256_v12 = vpop.f32.mrb[38].mxu0 }
 0x3fc   :  { %v4257_v52 = vpop.f32.mrb[39].mxu0  ;;  %v4998_v33 = vpop.f32.mrb[38].mxu1 }
 0x3fd   :  { %v1446_v56 = vadd.f32 %v1445_v31, %v1321_v27  ;;  %v4258_v38 = vadd.f32 %v4257_v52, %v4256_v12  ;;  %v1455_v4 = vpop.f32.mrb[39].mxu1 }
 0x3ff   :  { %v7039_v37 = vmax.f32 %v1446_v56, 0.0  ;;  %v1326_v17 = vadd.f32 %v4258_v38, %v7036_v21  ;;  %v4259_v2 = vpop.f32.mrb[40].mxu0 }
 0x400   :  { %v4260_v45 = vpop.f32.mrb[41].mxu0  ;;  %v5001_v28 = vpop.f32.mrb[40].mxu1 }
 0x401   :  { %v1451_v59 = vadd.f32 %v4995_v35, %v1326_v17  ;;  %v4261_v62 = vadd.f32 %v4260_v45, %v4259_v2  ;;  %v1465_v29 = vpop.f32.mrb[41].mxu1  ;;  %1706 = vmatprep.mubr.f32.mxu1 %v7039_v37  ;;  %v1516_v51 = vrot.slane %v7039_v37, 7  ;;  %v1552_v20 = vrot.slane %v7039_v37, 1  ;;  %v2009_v37 = vld [vmem:[#allocation2 + $0x700] sm:$0xff] }
 0x403   :  { %v7043_v6 = vmax.f32 %v1451_v59, 0.0  ;;  %v1331_v50 = vadd.f32 %v4261_v62, %v7036_v21  ;;  %v4262_v40 = vpop.f32.mrb[42].mxu0 }
 0x404   :  { %v4263_v41 = vpop.f32.mrb[43].mxu0  ;;  %v5004_v0 = vpop.f32.mrb[42].mxu1 }
 0x405   :  { %v1456_v7 = vadd.f32 %v1455_v4, %v1331_v50  ;;  %v4264_v30 = vadd.f32 %v4263_v41, %v4262_v40  ;;  %v1475_v18 = vpop.f32.mrb[43].mxu1  ;;  %v1553_v39 = vrot.slane %v7043_v6, 1  ;;  %v1517_v11 = vrot.slane %v7043_v6, 7 }
 0x407   :  { %v7050_v9 = vmax.f32 %v1456_v7, 0.0  ;;  %v1336_v13 = vadd.f32 %v4264_v30, %v7036_v21  ;;  %v4265_v23 = vpop.f32.mrb[44].mxu0  ;;  %v1574_v58 = vsel %vm236_vm1, %v1552_v20, %v1553_v39  ;;  %v7061_v24 = vsel %vm139_vm12, %v1516_v51, %v1517_v11 }
 0x408   :  { %v4266_v46 = vpop.f32.mrb[45].mxu0  ;;  %v7063_v47 = vpop.f32.mrb[44].mxu1  ;;  %5043 = vmatprep.mubr.msk.f32.mxu0 %vm285_vm4, %v1574_v58 }
 0x409   :  { %v1554_v15 = vrot.slane %v7050_v9, 1  ;;  %v1461_v35 = vadd.f32 %v4998_v33, %v1336_v13  ;;  %v4267_v19 = vadd.f32 %v4266_v46, %v4265_v23  ;;  %v1485_v31 = vpop.f32.mrb[45].mxu1  ;;  %v1518_v27 = vrot.slane %v7050_v9, 7 }
 0x40b   :  { %v7069_v12 = vmax.f32 %v1461_v35, 0.0  ;;  %v1341_v52 = vadd.f32 %v4267_v19, %v7036_v21  ;;  %v4268_v56 = vpop.f32.mrb[46].mxu0  ;;  %v1573_v38 = vsel %vm236_vm1, %v1553_v39, %v1554_v15  ;;  %v7076_v4 = vsel %vm139_vm12, %v1517_v11, %v1518_v27 }
 0x40c   :  { %v4269_v17 = vpop.f32.mrb[47].mxu0  ;;  %v7078_v2 = vpop.f32.mrb[46].mxu1  ;;  %5044 = vmatmul.mubr.msk.f32.vlgmr.msra.gmra.mrb[60].mxu0 %vm286_vm3, %v1573_v38 }
 0x40d   :  { %v1466_v33 = vadd.f32 %v1465_v29, %v1341_v52  ;;  %v4270_v45 = vadd.f32 %v4269_v17, %v4268_v56  ;;  %v7082_v59 = vpop.f32.mrb[47].mxu1  ;;  %v1555_v62 = vrot.slane %v7069_v12, 1  ;;  %v1519_v50 = vrot.slane %v7069_v12, 7 }
 0x40f   :  { %v7086_v40 = vmax.f32 %v1466_v33, 0.0  ;;  %v1346_v41 = vadd.f32 %v4270_v45, %v7036_v21  ;;  %v4271_v7 = vpop.f32.mrb[48].mxu0  ;;  %v1572_v30 = vsel %vm236_vm1, %v1554_v15, %v1555_v62  ;;  %v7093_v39 = vsel %vm139_vm12, %v1518_v27, %v1519_v50 }
 0x410   :  { %v4272_v29 = vpop.f32.mrb[49].mxu0  ;;  %5046 = vmatprep.mubr.msk.f32.mxu0 %vm287_vm6, %v1572_v30 }
 0x411   :  { %v1471_v11 = vadd.f32 %v5001_v28, %v1346_v41  ;;  %v4273_v13 = vadd.f32 %v4272_v29, %v4271_v7  ;;  %v1556_v23 = vrot.slane %v7086_v40, 1  ;;  %v1520_v58 = vrot.slane %v7086_v40, 7 }
 0x413   :  { %v7099_v46 = vmax.f32 %v1471_v11, 0.0  ;;  %v1351_v35 = vadd.f32 %v4273_v13, %v7036_v21  ;;  %v4274_v19 = vpop.f32.mrb[50].mxu0  ;;  %v1571_v15 = vsel %vm236_vm1, %v1555_v62, %v1556_v23  ;;  %v7106_v27 = vsel %vm139_vm12, %v1519_v50, %v1520_v58 }
 0x414   :  { %v4275_v52 = vpop.f32.mrb[51].mxu0  ;;  %5047 = vmatmul.mubr.msk.f32.gmra.mrb[62].mxu0 %vm288_vm8, %v1571_v15 }
 0x415   :  { %v1476_v28 = vadd.f32 %v1475_v18, %v1351_v35  ;;  %v4276_v56 = vadd.f32 %v4275_v52, %v4274_v19  ;;  %v1557_v38 = vrot.slane %v7099_v46, 1  ;;  %v1521_v17 = vrot.slane %v7099_v46, 7 }
 0x417   :  { %v7112_v33 = vmax.f32 %v1476_v28, 0.0  ;;  %v1356_v45 = vadd.f32 %v4276_v56, %v7036_v21  ;;  %v4277_v41 = vpop.f32.mrb[52].mxu0  ;;  %v1570_v62 = vsel %vm236_vm1, %v1556_v23, %v1557_v38  ;;  %v7119_v50 = vsel %vm139_vm12, %v1520_v58, %v1521_v17 }
 0x418   :  { %v4278_v7 = vpop.f32.mrb[53].mxu0  ;;  %5049 = vmatprep.mubr.msk.f32.mxu0 %vm289_vm10, %v1570_v62 }
 0x419   :  { %v1481_v18 = vadd.f32 %v5004_v0, %v1356_v45  ;;  %v4279_v30 = vadd.f32 %v4278_v7, %v4277_v41  ;;  %v1558_v29 = vrot.slane %v7112_v33, 1  ;;  %v1522_v11 = vrot.slane %v7112_v33, 7 }
 0x41b   :  { %v7125_v13 = vmax.f32 %v1481_v18, 0.0  ;;  %v1361_v35 = vadd.f32 %v4279_v30, %v7036_v21  ;;  %v4280_v19 = vpop.f32.mrb[54].mxu0  ;;  %v1569_v23 = vsel %vm236_vm1, %v1557_v38, %v1558_v29  ;;  %v1533_v58 = vsel %vm139_vm12, %v1521_v17, %v1522_v11 }
 0x41c   :  { %v4281_v15 = vpop.f32.mrb[55].mxu0  ;;  %5050 = vmatmul.mubr.msk.f32.gmra.mrb[64].mxu0 %vm290_vm7, %v1569_v23 }
 0x41d   :  { %v1486_v0 = vadd.f32 %v1485_v31, %v1361_v35  ;;  %v4282_v52 = vadd.f32 %v4281_v15, %v4280_v19  ;;  %v1559_v28 = vrot.slane %v7125_v13, 1  ;;  %v1523_v56 = vrot.slane %v7125_v13, 7 }
 0x41f   :  { %v1512_v45 = vmax.f32 %v1486_v0, 0.0  ;;  %v1366_v41 = vadd.f32 %v4282_v52, %v7036_v21  ;;  %v4283_v62 = vpop.f32.mrb[56].mxu0  ;;  %v1568_v38 = vsel %vm236_vm1, %v1558_v29, %v1559_v28  ;;  %v1532_v17 = vsel %vm139_vm12, %v1522_v11, %v1523_v56 }
 0x420   :  { %v4284_v7 = vpop.f32.mrb[57].mxu0  ;;  %5052 = vmatprep.mubr.msk.f32.mxu0 %vm291_vm5, %v1568_v38 }
 0x421   :  { %v1491_v31 = vadd.f32 %v7063_v47, %v1366_v41  ;;  %v4285_v18 = vadd.f32 %v4284_v7, %v4283_v62  ;;  %v1560_v30 = vrot.slane %v1512_v45, 1  ;;  %v1524_v35 = vrot.slane %v1512_v45, 7 }
 0x423   :  { %v1513_v19 = vmax.f32 %v1491_v31, 0.0  ;;  %v1371_v23 = vadd.f32 %v4285_v18, %v7036_v21  ;;  %v4286_v15 = vpop.f32.mrb[58].mxu0  ;;  %v1567_v0 = vsel %vm236_vm1, %v1559_v28, %v1560_v30  ;;  %v1531_v29 = vsel %vm139_vm12, %v1523_v56, %v1524_v35 }
 0x424   :  { %v4287_v11 = vpop.f32.mrb[59].mxu0  ;;  %5053 = vmatmul.mubr.msk.f32.gmra.mrb[66].mxu0 %vm8124_vm15, %v1567_v0  ;;  %vm8130_vm15 = vcmp.eq.s32.totalorder %v6353_v43, 1 }
 0x425   :  { %v1496_v52 = vadd.f32 %v7082_v59, %v1371_v23  ;;  %v4288_v47 = vadd.f32 %v4287_v11, %v4286_v15  ;;  %v1561_v41 = vrot.slane %v1513_v19, 1  ;;  %v1525_v62 = vrot.slane %v1513_v19, 7 }
 0x427   :  { %v1514_v38 = vmax.f32 %v1496_v52, 0.0  ;;  %v1376_v7 = vadd.f32 %v4288_v47, %v7036_v21  ;;  %v1566_v31 = vsel %vm236_vm1, %v1560_v30, %v1561_v41  ;;  %v1530_v28 = vsel %vm139_vm12, %v1524_v35, %v1525_v62 }
 0x428   :  { %5055 = vmatprep.mubr.msk.f32.mxu0 %vm8125_vm9, %v1566_v31  ;;  %vm8131_vm9 = vcmp.eq.s32.totalorder %v6365_v48, 1  ;;  %v1994_v31 = vld [vmem:[#allocation2 + $0x688] sm:$0xff] }
 0x429   :  { %v1501_v56 = vadd.f32 %v7078_v2, %v1376_v7  ;;  %v1562_v18 = vrot.slane %v1514_v38, 1  ;;  %v1526_v0 = vrot.slane %v1514_v38, 7  ;;  %v1993_v7 = vld [vmem:[#allocation2 + $0x680] sm:$0xff] }
 0x42b   :  { %v1515_v59 = vmax.f32 %v1501_v56, 0.0  ;;  %v1565_v23 = vsel %vm236_vm1, %v1561_v41, %v1562_v18  ;;  %v1529_v21 = vsel %vm139_vm12, %v1525_v62, %v1526_v0  ;;  %v2023_v41 = vld [vmem:[#allocation2 + $0x770] sm:$0xff]  ;;  %v2024_v62 = vld [vmem:[#allocation2 + $0x778] sm:$0xff]  ;;  %v5649_v56 = vpack.c.bf16 %v1994_v31, %v1993_v7  ;;  %v1989_v7 = vld [vmem:[#allocation2 + $0x660] sm:$0xff] }
 0x42c   :  { %5056 = vmatmul.mubr.msk.f32.gmra.mrb[68].mxu0 %vm8126_vm11, %v1565_v23  ;;  %vm8132_vm11 = vcmp.eq.s32.totalorder %v6379_v54, 1  ;;  %v1996_v23 = vld [vmem:[#allocation2 + $0x698] sm:$0xff]  ;;  %v1990_v31 = vld [vmem:[#allocation2 + $0x668] sm:$0xff] }
 0x42d   :  { %v1527_v30 = vrot.slane %v1515_v59, 7  ;;  %v1563_v15 = vrot.slane %v1515_v59, 1  ;;  %5650 = vmatprep.subr.bf16.mxu0 %v5649_v56  ;;  %v2008_v56 = vld [vmem:[#allocation2 + $0x6f8] sm:$0xff] }
 0x42f   :  { %v1539_v35 = vsel %vm139_vm12, %v1527_v30, %v1516_v51  ;;  %v1564_v2 = vsel %vm236_vm1, %v1562_v18, %v1563_v15  ;;  %v1575_v11 = vsel %vm236_vm1, %v1563_v15, %v1552_v20  ;;  %v1528_v52 = vsel %vm139_vm12, %v1526_v0, %v1527_v30  ;;  %v2011_v51 = vld [vmem:[#allocation2 + $0x710] sm:$0xff]  ;;  %v1978_v18 = vld [vmem:[#allocation2 + $0x608] sm:$0xff]  ;;  %v1980_v15 = vld [vmem:[#allocation2 + $0x618] sm:$0xff] }
 0x430   :  { %3900 = vmatmul.mubr.msk.f32.vlgmr.msra.gmra.mrb[48].mxu1 %vm200_vm13, %v1539_v35  ;;  %5058 = vmatprep.mubr.msk.f32.mxu0 %vm8127_vm0, %v1564_v2  ;;  %vm8133_vm0 = vcmp.eq.s32.totalorder %v6377_v53, 1  ;;  %v1997_v2 = vld [vmem:[#allocation2 + $0x6a0] sm:$0xff] }
 0x431   :  { %1711 = vmatprep.mubr.f32.mxu1 %v7043_v6  ;;  %5059 = vmatmul.mubr.msk.f32.gmra.mrb[70].mxu0 %vm8128_vm14, %v1575_v11  ;;  %vm8134_vm14 = vcmp.eq.s32.totalorder %v6395_v61, 1  ;;  %v2010_v6 = vld [vmem:[#allocation2 + $0x708] sm:$0xff] }
 0x432   :  { %v5681_v20 = vpack.c.bf16 %v2010_v6, %v2009_v37  ;;  %v1998_v11 = vld [vmem:[#allocation2 + $0x6a8] sm:$0xff] }
 0x433   :  { %v5657_v37 = vpack.c.bf16 %v1998_v11, %v1997_v2  ;;  %v1982_v6 = vld [vmem:[#allocation2 + $0x628] sm:$0xff] }
 0x434   :  { %3901 = vmatmul.mubr.msk.f32.gmra.mrb[50].mxu1 %vm8129_vm2, %v7061_v24  ;;  %vm8135_vm2 = vcmp.eq.s32.totalorder %v6393_v60, 1  ;;  %5682 = vmatprep.subr.bf16.mxu1 %v5681_v20 }
 0x435   :  { %1716 = vmatprep.mubr.f32.mxu1 %v7050_v9  ;;  %v2012_v9 = vld [vmem:[#allocation2 + $0x718] sm:$0xff]  ;;  %5684 = vmatpush3.bf16.msra.mxu1 %v5681_v20  ;;  %v1999_v20 = vld [vmem:[#allocation2 + $0x6b0] sm:$0xff] }
 0x436   :  { %v5685_v24 = vpack.c.bf16 %v2012_v9, %v2011_v51  ;;  %v2000_v9 = vld [vmem:[#allocation2 + $0x6b8] sm:$0xff] }
 0x438   :  { %3902 = vmatmul.mubr.msk.f32.gmra.mrb[52].mxu1 %vm8130_vm15, %v7076_v4  ;;  %vm8136_vm15 = vcmp.eq.s32.totalorder %v6447_v5, 1  ;;  %5686 = vmatprep.subr.bf16.mxu1 %v5685_v24  ;;  %v2014_v4 = vld [vmem:[#allocation2 + $0x728] sm:$0xff] }
 0x439   :  { %1721 = vmatprep.mubr.f32.mxu1 %v7069_v12  ;;  %5688 = vmatpush3.bf16.msra.mxu1 %v5685_v24  ;;  %v2013_v12 = vld [vmem:[#allocation2 + $0x720] sm:$0xff]  ;;  %v1983_v24 = vld [vmem:[#allocation2 + $0x630] sm:$0xff] }
 0x43c   :  { %3903 = vmatmul.mubr.msk.f32.gmra.mrb[54].mxu1 %vm8131_vm9, %v7093_v39  ;;  %vm8137_vm9 = vcmp.eq.s32.totalorder %v6466_v25, 1  ;;  %v2015_v39 = vld [vmem:[#allocation2 + $0x730] sm:$0xff] }
 0x43d   :  { %1726 = vmatprep.mubr.f32.mxu1 %v7086_v40  ;;  %v5689_v40 = vpack.c.bf16 %v2014_v4, %v2013_v12  ;;  %v5661_v12 = vpack.c.bf16 %v2000_v9, %v1999_v20  ;;  %v1984_v4 = vld [vmem:[#allocation2 + $0x638] sm:$0xff] }
 0x43f   :  { %5690 = vmatprep.subr.bf16.mxu1 %v5689_v40 }
 0x440   :  { %3904 = vmatmul.mubr.msk.f32.gmra.mrb[56].mxu1 %vm8132_vm11, %v7106_v27  ;;  %vm8138_vm11 = vcmp.eq.s32.totalorder %v6489_v36, 1 }
 0x441   :  { %1731 = vmatprep.mubr.f32.mxu1 %v7099_v46  ;;  %5692 = vmatpush3.bf16.msra.mxu1 %v5689_v40  ;;  %v2016_v46 = vld [vmem:[#allocation2 + $0x738] sm:$0xff]  ;;  %v5663_v40 = vpack.c.bf16 %v1984_v4, %v1983_v24  ;;  %v7228_v24 = vld [vmem:[#allocation6 + $0x3] ss:$0 sm:$0xff] }
 0x442   :  { %v5693_v27 = vpack.c.bf16 %v2016_v46, %v2015_v39  ;;  %v2001_v39 = vld [vmem:[#allocation2 + $0x6c0] sm:$0xff]  ;;  %v2002_v46 = vld [vmem:[#allocation2 + $0x6c8] sm:$0xff] }
 0x444   :  { %3905 = vmatmul.mubr.msk.f32.gmra.mrb[58].mxu1 %vm8133_vm0, %v7119_v50  ;;  %vm8139_vm0 = vcmp.eq.s32.totalorder %v6535_v55, 1  ;;  %5694 = vmatprep.subr.bf16.mxu1 %v5693_v27  ;;  %v2018_v50 = vld [vmem:[#allocation2 + $0x748] sm:$0xff] }
 0x445   :  { %1736 = vmatprep.mubr.f32.mxu1 %v7112_v33  ;;  %5696 = vmatpush3.bf16.msra.mxu1 %v5693_v27  ;;  %v2017_v33 = vld [vmem:[#allocation2 + $0x740] sm:$0xff] }
 0x446   :  { %v1985_v27 = vld [vmem:[#allocation2 + $0x640] sm:$0xff] }
 0x448   :  { %3906 = vmatmul.mubr.msk.f32.gmra.mrb[60].mxu1 %vm8134_vm14, %v1533_v58  ;;  %v2019_v58 = vld [vmem:[#allocation2 + $0x750] sm:$0xff]  ;;  %vm8140_vm14 = vcmp.eq.s32.totalorder %v6511_v42, 1 }
 0x449   :  { %1741 = vmatprep.mubr.f32.mxu1 %v7125_v13  ;;  %v5697_v13 = vpack.c.bf16 %v2018_v50, %v2017_v33  ;;  %v5665_v33 = vpack.c.bf16 %v2002_v46, %v2001_v39  ;;  %v1986_v50 = vld [vmem:[#allocation2 + $0x648] sm:$0xff] }
 0x44b   :  { %5698 = vmatprep.subr.bf16.mxu1 %v5697_v13 }
 0x44c   :  { %3907 = vmatmul.mubr.msk.f32.gmra.mrb[62].mxu1 %vm8135_vm2, %v1532_v17  ;;  %vm8141_vm2 = vcmp.eq.s32.totalorder %v6545_v63, 1 }
 0x44d   :  { %1746 = vmatprep.mubr.f32.mxu1 %v1512_v45  ;;  %5700 = vmatpush3.bf16.msra.mxu1 %v5697_v13  ;;  %v2020_v45 = vld [vmem:[#allocation2 + $0x758] sm:$0xff]  ;;  %v5667_v13 = vpack.c.bf16 %v1986_v50, %v1985_v27 }
 0x44e   :  { %v5701_v17 = vpack.c.bf16 %v2020_v45, %v2019_v58  ;;  %v2003_v58 = vld [vmem:[#allocation2 + $0x6d0] sm:$0xff]  ;;  %v2004_v45 = vld [vmem:[#allocation2 + $0x6d8] sm:$0xff] }
 0x450   :  { %3908 = vmatmul.mubr.msk.f32.gmra.mrb[64].mxu1 %vm8136_vm15, %v1531_v29  ;;  %v2022_v29 = vld [vmem:[#allocation2 + $0x768] sm:$0xff]  ;;  %5702 = vmatprep.subr.bf16.mxu1 %v5701_v17  ;;  %vm8142_vm15 = vcmp.eq.s32.totalorder %v6538_v57, 1 }
 0x451   :  { %1751 = vmatprep.mubr.f32.mxu1 %v1513_v19  ;;  %v2021_v19 = vld [vmem:[#allocation2 + $0x760] sm:$0xff]  ;;  %5704 = vmatpush3.bf16.msra.mxu1 %v5701_v17  ;;  %v1987_v17 = vld [vmem:[#allocation2 + $0x650] sm:$0xff] }
 0x452   :  { %v5705_v47 = vpack.c.bf16 %v2022_v29, %v2021_v19  ;;  %v5669_v19 = vpack.c.bf16 %v2004_v45, %v2003_v58  ;;  %v1988_v29 = vld [vmem:[#allocation2 + $0x658] sm:$0xff] }
 0x454   :  { %3909 = vmatmul.mubr.msk.f32.gmra.mrb[66].mxu1 %vm8137_vm9, %v1530_v28  ;;  %5706 = vmatprep.subr.bf16.mxu1 %v5705_v47  ;;  %v1977_v28 = vld [vmem:[#allocation2 + $0x600] sm:$0xff]  ;;  %vm8143_vm9 = vcmp.eq.s32.totalorder %v6559_v3, 1 }
 0x455   :  { %1756 = vmatprep.mubr.f32.mxu1 %v1514_v38  ;;  %v5709_v38 = vpack.c.bf16 %v2024_v62, %v2023_v41  ;;  %5708 = vmatpush3.bf16.msra.mxu1 %v5705_v47  ;;  %v5651_v0 = vpack.c.bf16 %v1978_v18, %v1977_v28  ;;  %v2005_v47 = vld [vmem:[#allocation2 + $0x6e0] sm:$0xff]  ;;  %v2006_v41 = vld [vmem:[#allocation2 + $0x6e8] sm:$0xff]  ;;  %v5671_v62 = vpack.c.bf16 %v1988_v29, %v1987_v17  ;;  %v2007_v28 = vld [vmem:[#allocation2 + $0x6f0] sm:$0xff] }
 0x456   :  { %v5675_v18 = vpack.c.bf16 %v1990_v31, %v1989_v7 }
 0x457   :  { %5710 = vmatprep.subr.bf16.mxu1 %v5709_v38  ;;  %5652 = vmatpush3.bf16.msra.mxu0 %v5651_v0  ;;  %v5677_v0 = vpack.c.bf16 %v2008_v56, %v2007_v28 }
 0x458   :  { %3910 = vmatmul.mubr.msk.f32.gmra.mrb[68].mxu1 %vm8138_vm11, %v1529_v21  ;;  %v1979_v21 = vld [vmem:[#allocation2 + $0x610] sm:$0xff]  ;;  %vm8144_vm11 = vcmp.eq.s32.totalorder %v6553_v1, 1 }
 0x459   :  { %1761 = vmatprep.mubr.f32.mxu1 %v1515_v59  ;;  %5712 = vmatpush3.bf16.msra.mxu1 %v5709_v38  ;;  %v1995_v59 = vld [vmem:[#allocation2 + $0x690] sm:$0xff]  ;;  %v5655_v35 = vpack.c.bf16 %v1980_v15, %v1979_v21  ;;  %v5673_v38 = vpack.c.bf16 %v2006_v41, %v2005_v47 }
 0x45a   :  { %v5653_v30 = vpack.c.bf16 %v1996_v23, %v1995_v59  ;;  %v1991_v59 = vld [vmem:[#allocation2 + $0x670] sm:$0xff]  ;;  %v1992_v23 = vld [vmem:[#allocation2 + $0x678] sm:$0xff] }
 0x45b   :  { %v5679_v21 = vpack.c.bf16 %v1992_v23, %v1991_v59 }
 0x45c   :  { %3911 = vmatmul.mubr.msk.f32.gmra.mrb[70].mxu1 %vm8139_vm0, %v1528_v52  ;;  %5654 = vmatprep.subr.bf16.mxu0 %v5653_v30  ;;  %v1981_v52 = vld [vmem:[#allocation2 + $0x620] sm:$0xff]  ;;  %vm8145_vm0 = vcmp.eq.s32.totalorder %v6367_v49, 1 }
 0x45d   :  { %5656 = vmatpush3.bf16.msra.mxu0 %v5655_v35  ;;  %v5659_v51 = vpack.c.bf16 %v1982_v6, %v1981_v52 }
 0x45e   :  { %5658 = vmatprep.subr.bf16.mxu0 %v5657_v37 }
 0x461   :  { %5660 = vmatpush3.bf16.msra.mxu0 %v5659_v51 }
 0x462   :  { %5662 = vmatprep.subr.bf16.mxu0 %v5661_v12 }
 0x465   :  { %5664 = vmatpush3.bf16.msra.mxu0 %v5663_v40 }
 0x466   :  { %5666 = vmatprep.subr.bf16.mxu0 %v5665_v33 }
 0x469   :  { %5668 = vmatpush3.bf16.msra.mxu0 %v5667_v13 }
 0x46a   :  { %5670 = vmatprep.subr.bf16.mxu0 %v5669_v19 }
 0x46d   :  { %5672 = vmatpush3.bf16.msra.mxu0 %v5671_v62 }
 0x46e   :  { %5674 = vmatprep.subr.bf16.mxu0 %v5673_v38 }
 0x471   :  { %5676 = vmatpush3.bf16.msra.mxu0 %v5675_v18 }
 0x472   :  { %5678 = vmatprep.subr.bf16.mxu0 %v5677_v0 }
 0x475   :  { %5680 = vmatpush3.bf16.msra.mxu0 %v5679_v21 }
 0x4df   :  { %v5045_v30 = vpop.f32.mrb[60].mxu0 }
 0x4e0   :  { %v1833_v15 = vpop.f32.mrb[61].mxu0 }
 0x4e7   :  { %v5048_v35 = vpop.f32.mrb[62].mxu0 }
 0x4e8   :  { %v1843_v2 = vpop.f32.mrb[63].mxu0 }
 0x4ef   :  { %v7218_v11 = vpop.f32.mrb[64].mxu0 }
 0x4f0   :  { %v1853_v52 = vpop.f32.mrb[65].mxu0 }
 0x4f7   :  { %v7220_v37 = vpop.f32.mrb[66].mxu0 }
 0x4f8   :  { %v7222_v6 = vpop.f32.mrb[67].mxu0 }
 0x4ff   :  { %v7224_v51 = vpop.f32.mrb[68].mxu0 }
 0x500   :  { %v7226_v20 = vpop.f32.mrb[69].mxu0 }
 0x503   :  { %v4349_v9 = vpop.f32.mrb[48].mxu1 }
 0x504   :  { %v4350_v12 = vpop.f32.mrb[49].mxu1  ;;  %v7230_v4 = vpop.f32.mrb[70].mxu0 }
 0x505   :  { %v4351_v40 = vadd.f32 %v4350_v12, %v4349_v9  ;;  %v7232_v39 = vpop.f32.mrb[71].mxu0 }
 0x507   :  { %v1709_v46 = vadd.f32 %v4351_v40, %v7228_v24  ;;  %v4352_v27 = vpop.f32.mrb[50].mxu1 }
 0x508   :  { %v4353_v33 = vpop.f32.mrb[51].mxu1 }
 0x509   :  { %v4354_v50 = vadd.f32 %v4353_v33, %v4352_v27  ;;  %v1834_v13 = vadd.f32 %v1833_v15, %v1709_v46 }
 0x50b   :  { %v1714_v58 = vadd.f32 %v4354_v50, %v7228_v24  ;;  %v4355_v45 = vpop.f32.mrb[52].mxu1  ;;  %v7236_v17 = vmax.f32 %v1834_v13, 0.0 }
 0x50c   :  { %v4356_v19 = vpop.f32.mrb[53].mxu1 }
 0x50d   :  { %v1839_v29 = vadd.f32 %v5045_v30, %v1714_v58  ;;  %v4357_v47 = vadd.f32 %v4356_v19, %v4355_v45  ;;  %2094 = vmatprep.mubr.f32.mxu0 %v7236_v17  ;;  %v1904_v7 = vrot.slane %v7236_v17, 7  ;;  %v1940_v28 = vrot.slane %v7236_v17, 1  ;;  %v2397_v17 = vld [vmem:[#allocation2 + $0x880] sm:$0xff] }
 0x50f   :  { %v7239_v41 = vmax.f32 %v1839_v29, 0.0  ;;  %v1719_v62 = vadd.f32 %v4357_v47, %v7228_v24  ;;  %v4358_v38 = vpop.f32.mrb[54].mxu1 }
 0x510   :  { %v4359_v31 = vpop.f32.mrb[55].mxu1 }
 0x511   :  { %v1844_v56 = vadd.f32 %v1843_v2, %v1719_v62  ;;  %v4360_v18 = vadd.f32 %v4359_v31, %v4358_v38  ;;  %v1941_v0 = vrot.slane %v7239_v41, 1  ;;  %v1905_v59 = vrot.slane %v7239_v41, 7 }
 0x513   :  { %v7246_v23 = vmax.f32 %v1844_v56, 0.0  ;;  %v1724_v21 = vadd.f32 %v4360_v18, %v7228_v24  ;;  %v4361_v30 = vpop.f32.mrb[56].mxu1  ;;  %v1962_v15 = vsel %vm236_vm1, %v1940_v28, %v1941_v0  ;;  %v7257_v2 = vsel %vm139_vm12, %v1904_v7, %v1905_v59 }
 0x514   :  { %v4362_v9 = vpop.f32.mrb[57].mxu1  ;;  %5093 = vmatprep.mubr.msk.f32.mxu1 %vm285_vm4, %v1962_v15 }
 0x515   :  { %v1942_v12 = vrot.slane %v7246_v23, 1  ;;  %v1849_v40 = vadd.f32 %v5048_v35, %v1724_v21  ;;  %v4363_v46 = vadd.f32 %v4362_v9, %v4361_v30  ;;  %v1906_v27 = vrot.slane %v7246_v23, 7 }
 0x517   :  { %v7263_v33 = vmax.f32 %v1849_v40, 0.0  ;;  %v1729_v50 = vadd.f32 %v4363_v46, %v7228_v24  ;;  %v4364_v13 = vpop.f32.mrb[58].mxu1  ;;  %v1961_v58 = vsel %vm236_vm1, %v1941_v0, %v1942_v12  ;;  %v7270_v45 = vsel %vm139_vm12, %v1905_v59, %v1906_v27 }
 0x518   :  { %v4365_v19 = vpop.f32.mrb[59].mxu1  ;;  %5094 = vmatmul.mubr.msk.f32.vlgmr.msra.gmra.mrb[72].mxu1 %vm286_vm3, %v1961_v58 }
 0x519   :  { %v1854_v35 = vadd.f32 %v1853_v52, %v1729_v50  ;;  %v4366_v29 = vadd.f32 %v4365_v19, %v4364_v13  ;;  %v1943_v47 = vrot.slane %v7263_v33, 1  ;;  %v1907_v62 = vrot.slane %v7263_v33, 7 }
 0x51b   :  { %v7276_v38 = vmax.f32 %v1854_v35, 0.0  ;;  %v1734_v31 = vadd.f32 %v4366_v29, %v7228_v24  ;;  %v4367_v56 = vpop.f32.mrb[60].mxu1  ;;  %v1960_v18 = vsel %vm236_vm1, %v1942_v12, %v1943_v47  ;;  %v7283_v0 = vsel %vm139_vm12, %v1906_v27, %v1907_v62 }
 0x51c   :  { %v4368_v59 = vpop.f32.mrb[61].mxu1  ;;  %5096 = vmatprep.mubr.msk.f32.mxu1 %vm287_vm6, %v1960_v18 }
 0x51d   :  { %v1859_v52 = vadd.f32 %v7218_v11, %v1734_v31  ;;  %v4369_v21 = vadd.f32 %v4368_v59, %v4367_v56  ;;  %v1944_v30 = vrot.slane %v7276_v38, 1  ;;  %v1908_v15 = vrot.slane %v7276_v38, 7 }
 0x51f   :  { %v7290_v9 = vmax.f32 %v1859_v52, 0.0  ;;  %v1739_v40 = vadd.f32 %v4369_v21, %v7228_v24  ;;  %v4370_v12 = vpop.f32.mrb[62].mxu1  ;;  %v1959_v46 = vsel %vm236_vm1, %v1943_v47, %v1944_v30  ;;  %v7297_v27 = vsel %vm139_vm12, %v1907_v62, %v1908_v15 }
 0x520   :  { %v4371_v50 = vpop.f32.mrb[63].mxu1  ;;  %5097 = vmatmul.mubr.msk.f32.gmra.mrb[74].mxu1 %vm288_vm8, %v1959_v46 }
 0x521   :  { %v1864_v11 = vadd.f32 %v7222_v6, %v1739_v40  ;;  %v4372_v13 = vadd.f32 %v4371_v50, %v4370_v12  ;;  %v1945_v58 = vrot.slane %v7290_v9, 1  ;;  %v1909_v19 = vrot.slane %v7290_v9, 7 }
 0x523   :  { %v7304_v35 = vmax.f32 %v1864_v11, 0.0  ;;  %v1744_v29 = vadd.f32 %v4372_v13, %v7228_v24  ;;  %v4373_v47 = vpop.f32.mrb[64].mxu1  ;;  %v1958_v62 = vsel %vm236_vm1, %v1944_v30, %v1945_v58  ;;  %v7311_v31 = vsel %vm139_vm12, %v1908_v15, %v1909_v19 }
 0x524   :  { %v4374_v56 = vpop.f32.mrb[65].mxu1  ;;  %5099 = vmatprep.mubr.msk.f32.mxu1 %vm289_vm10, %v1958_v62 }
 0x525   :  { %v1869_v6 = vadd.f32 %v7220_v37, %v1744_v29  ;;  %v4375_v18 = vadd.f32 %v4374_v56, %v4373_v47  ;;  %v1946_v59 = vrot.slane %v7304_v35, 1  ;;  %v1910_v52 = vrot.slane %v7304_v35, 7 }
 0x527   :  { %v7318_v21 = vmax.f32 %v1869_v6, 0.0  ;;  %v1749_v40 = vadd.f32 %v4375_v18, %v7228_v24  ;;  %v4376_v30 = vpop.f32.mrb[66].mxu1  ;;  %v1957_v15 = vsel %vm236_vm1, %v1945_v58, %v1946_v59  ;;  %v1921_v12 = vsel %vm139_vm12, %v1909_v19, %v1910_v52 }
 0x528   :  { %v4377_v46 = vpop.f32.mrb[67].mxu1  ;;  %5100 = vmatmul.mubr.msk.f32.gmra.mrb[76].mxu1 %vm290_vm7, %v1957_v15 }
 0x529   :  { %v1874_v37 = vadd.f32 %v7226_v20, %v1749_v40  ;;  %v4378_v50 = vadd.f32 %v4377_v46, %v4376_v30  ;;  %v1947_v11 = vrot.slane %v7318_v21, 1  ;;  %v1911_v13 = vrot.slane %v7318_v21, 7 }
 0x52b   :  { %v1900_v29 = vmax.f32 %v1874_v37, 0.0  ;;  %v1754_v47 = vadd.f32 %v4378_v50, %v7228_v24  ;;  %v4379_v62 = vpop.f32.mrb[68].mxu1  ;;  %v1956_v58 = vsel %vm236_vm1, %v1946_v59, %v1947_v11  ;;  %v1920_v19 = vsel %vm139_vm12, %v1910_v52, %v1911_v13 }
 0x52c   :  { %v4380_v56 = vpop.f32.mrb[69].mxu1  ;;  %5102 = vmatprep.mubr.msk.f32.mxu1 %vm291_vm5, %v1956_v58 }
 0x52d   :  { %v1879_v20 = vadd.f32 %v7224_v51, %v1754_v47  ;;  %v4381_v6 = vadd.f32 %v4380_v56, %v4379_v62  ;;  %v1948_v18 = vrot.slane %v1900_v29, 1  ;;  %v1912_v40 = vrot.slane %v1900_v29, 7 }
 0x52f   :  { %v1901_v30 = vmax.f32 %v1879_v20, 0.0  ;;  %v1759_v15 = vadd.f32 %v4381_v6, %v7228_v24  ;;  %v4382_v46 = vpop.f32.mrb[70].mxu1  ;;  %v1955_v37 = vsel %vm236_vm1, %v1947_v11, %v1948_v18  ;;  %v1919_v59 = vsel %vm139_vm12, %v1911_v13, %v1912_v40 }
 0x530   :  { %v4383_v52 = vpop.f32.mrb[71].mxu1  ;;  %5103 = vmatmul.mubr.msk.f32.gmra.mrb[78].mxu1 %vm8140_vm14, %v1955_v37  ;;  %vm8146_vm14 = vcmp.eq.s32.totalorder %v6353_v43, 1 }
 0x531   :  { %v1884_v50 = vadd.f32 %v7232_v39, %v1759_v15  ;;  %v4384_v51 = vadd.f32 %v4383_v52, %v4382_v46  ;;  %v1949_v47 = vrot.slane %v1901_v30, 1  ;;  %v1913_v62 = vrot.slane %v1901_v30, 7 }
 0x533   :  { %v1902_v58 = vmax.f32 %v1884_v50, 0.0  ;;  %v1764_v56 = vadd.f32 %v4384_v51, %v7228_v24  ;;  %v1954_v20 = vsel %vm236_vm1, %v1948_v18, %v1949_v47  ;;  %v1918_v11 = vsel %vm139_vm12, %v1912_v40, %v1913_v62 }
 0x534   :  { %5105 = vmatprep.mubr.msk.f32.mxu1 %vm8141_vm2, %v1954_v20  ;;  %vm8147_vm2 = vcmp.eq.s32.totalorder %v6365_v48, 1  ;;  %v2382_v20 = vld [vmem:[#allocation2 + $0x808] sm:$0xff] }
 0x535   :  { %v1889_v13 = vadd.f32 %v7230_v4, %v1764_v56  ;;  %v1950_v6 = vrot.slane %v1902_v58, 1  ;;  %v1914_v37 = vrot.slane %v1902_v58, 7  ;;  %v2381_v56 = vld [vmem:[#allocation2 + $0x800] sm:$0xff] }
 0x537   :  { %v1903_v39 = vmax.f32 %v1889_v13, 0.0  ;;  %v1953_v15 = vsel %vm236_vm1, %v1949_v47, %v1950_v6  ;;  %v1917_v24 = vsel %vm139_vm12, %v1913_v62, %v1914_v37  ;;  %v2411_v47 = vld [vmem:[#allocation2 + $0x8f0] sm:$0xff]  ;;  %v2412_v62 = vld [vmem:[#allocation2 + $0x8f8] sm:$0xff]  ;;  %v5713_v13 = vpack.c.bf16 %v2382_v20, %v2381_v56  ;;  %v2377_v56 = vld [vmem:[#allocation2 + $0x7e0] sm:$0xff] }
 0x538   :  { %5106 = vmatmul.mubr.msk.f32.gmra.mrb[80].mxu1 %vm8142_vm15, %v1953_v15  ;;  %vm8148_vm15 = vcmp.eq.s32.totalorder %v6379_v54, 1  ;;  %v2384_v15 = vld [vmem:[#allocation2 + $0x818] sm:$0xff]  ;;  %v2378_v20 = vld [vmem:[#allocation2 + $0x7e8] sm:$0xff] }
 0x539   :  { %v1915_v18 = vrot.slane %v1903_v39, 7  ;;  %v1951_v46 = vrot.slane %v1903_v39, 1  ;;  %5714 = vmatprep.subr.bf16.mxu1 %v5713_v13  ;;  %v2396_v13 = vld [vmem:[#allocation2 + $0x878] sm:$0xff] }
 0x53b   :  { %v1927_v40 = vsel %vm139_vm12, %v1915_v18, %v1904_v7  ;;  %v1952_v4 = vsel %vm236_vm1, %v1950_v6, %v1951_v46  ;;  %v1963_v52 = vsel %vm236_vm1, %v1951_v46, %v1940_v28  ;;  %v1916_v50 = vsel %vm139_vm12, %v1914_v37, %v1915_v18  ;;  %v2399_v7 = vld [vmem:[#allocation2 + $0x890] sm:$0xff]  ;;  %v2366_v6 = vld [vmem:[#allocation2 + $0x788] sm:$0xff]  ;;  %v2368_v46 = vld [vmem:[#allocation2 + $0x798] sm:$0xff] }
 0x53c   :  { %3925 = vmatmul.mubr.msk.f32.vlgmr.msra.gmra.mrb[72].mxu0 %vm200_vm13, %v1927_v40  ;;  %5108 = vmatprep.mubr.msk.f32.mxu1 %vm8143_vm9, %v1952_v4  ;;  %vm8149_vm9 = vcmp.eq.s32.totalorder %v6377_v53, 1  ;;  %v2385_v4 = vld [vmem:[#allocation2 + $0x820] sm:$0xff] }
 0x53d   :  { %2099 = vmatprep.mubr.f32.mxu0 %v7239_v41  ;;  %5109 = vmatmul.mubr.msk.f32.gmra.mrb[82].mxu1 %vm8144_vm11, %v1963_v52  ;;  %vm8150_vm11 = vcmp.eq.s32.totalorder %v6395_v61, 1  ;;  %v2398_v41 = vld [vmem:[#allocation2 + $0x888] sm:$0xff] }
 0x53e   :  { %v5745_v28 = vpack.c.bf16 %v2398_v41, %v2397_v17  ;;  %v2386_v52 = vld [vmem:[#allocation2 + $0x828] sm:$0xff] }
 0x53f   :  { %v5721_v17 = vpack.c.bf16 %v2386_v52, %v2385_v4  ;;  %v2370_v41 = vld [vmem:[#allocation2 + $0x7a8] sm:$0xff] }
 0x540   :  { %3926 = vmatmul.mubr.msk.f32.gmra.mrb[74].mxu0 %vm8145_vm0, %v7257_v2  ;;  %vm8151_vm0 = vcmp.eq.s32.totalorder %v6393_v60, 1  ;;  %5746 = vmatprep.subr.bf16.mxu0 %v5745_v28 }
 0x541   :  { %2104 = vmatprep.mubr.f32.mxu0 %v7246_v23  ;;  %v2400_v23 = vld [vmem:[#allocation2 + $0x898] sm:$0xff]  ;;  %5748 = vmatpush3.bf16.msra.mxu0 %v5745_v28  ;;  %v2387_v28 = vld [vmem:[#allocation2 + $0x830] sm:$0xff] }
 0x542   :  { %v5749_v2 = vpack.c.bf16 %v2400_v23, %v2399_v7  ;;  %v2388_v23 = vld [vmem:[#allocation2 + $0x838] sm:$0xff] }
 0x544   :  { %3927 = vmatmul.mubr.msk.f32.gmra.mrb[76].mxu0 %vm8146_vm14, %v7270_v45  ;;  %vm8152_vm14 = vcmp.eq.s32.totalorder %v6447_v5, 1  ;;  %5750 = vmatprep.subr.bf16.mxu0 %v5749_v2  ;;  %v2402_v45 = vld [vmem:[#allocation2 + $0x8a8] sm:$0xff] }
 0x545   :  { %2109 = vmatprep.mubr.f32.mxu0 %v7263_v33  ;;  %5752 = vmatpush3.bf16.msra.mxu0 %v5749_v2  ;;  %v2401_v33 = vld [vmem:[#allocation2 + $0x8a0] sm:$0xff]  ;;  %v2371_v2 = vld [vmem:[#allocation2 + $0x7b0] sm:$0xff] }
 0x548   :  { %3928 = vmatmul.mubr.msk.f32.gmra.mrb[78].mxu0 %vm8147_vm2, %v7283_v0  ;;  %vm8153_vm2 = vcmp.eq.s32.totalorder %v6466_v25, 1  ;;  %v2403_v0 = vld [vmem:[#allocation2 + $0x8b0] sm:$0xff] }
 0x549   :  { %2114 = vmatprep.mubr.f32.mxu0 %v7276_v38  ;;  %v5753_v38 = vpack.c.bf16 %v2402_v45, %v2401_v33  ;;  %v5725_v33 = vpack.c.bf16 %v2388_v23, %v2387_v28  ;;  %v2372_v45 = vld [vmem:[#allocation2 + $0x7b8] sm:$0xff] }
 0x54b   :  { %5754 = vmatprep.subr.bf16.mxu0 %v5753_v38 }
 0x54c   :  { %3929 = vmatmul.mubr.msk.f32.gmra.mrb[80].mxu0 %vm8148_vm15, %v7297_v27  ;;  %vm8154_vm15 = vcmp.eq.s32.totalorder %v6489_v36, 1 }
 0x54d   :  { %2119 = vmatprep.mubr.f32.mxu0 %v7290_v9  ;;  %5756 = vmatpush3.bf16.msra.mxu0 %v5753_v38  ;;  %v2404_v9 = vld [vmem:[#allocation2 + $0x8b8] sm:$0xff]  ;;  %v5727_v38 = vpack.c.bf16 %v2372_v45, %v2371_v2  ;;  %v7422_v2 = vld [vmem:[#allocation6 + $0x4] ss:$0 sm:$0xff] }
 0x54e   :  { %v5757_v27 = vpack.c.bf16 %v2404_v9, %v2403_v0  ;;  %v2389_v0 = vld [vmem:[#allocation2 + $0x840] sm:$0xff]  ;;  %v2390_v9 = vld [vmem:[#allocation2 + $0x848] sm:$0xff] }
 0x550   :  { %3930 = vmatmul.mubr.msk.f32.gmra.mrb[82].mxu0 %vm8149_vm9, %v7311_v31  ;;  %vm8155_vm9 = vcmp.eq.s32.totalorder %v6535_v55, 1  ;;  %5758 = vmatprep.subr.bf16.mxu0 %v5757_v27  ;;  %v2406_v31 = vld [vmem:[#allocation2 + $0x8c8] sm:$0xff] }
 0x551   :  { %2124 = vmatprep.mubr.f32.mxu0 %v7304_v35  ;;  %5760 = vmatpush3.bf16.msra.mxu0 %v5757_v27  ;;  %v2405_v35 = vld [vmem:[#allocation2 + $0x8c0] sm:$0xff] }
 0x552   :  { %v2373_v27 = vld [vmem:[#allocation2 + $0x7c0] sm:$0xff] }
 0x554   :  { %3931 = vmatmul.mubr.msk.f32.gmra.mrb[84].mxu0 %vm8150_vm11, %v1921_v12  ;;  %v2407_v12 = vld [vmem:[#allocation2 + $0x8d0] sm:$0xff]  ;;  %vm8156_vm11 = vcmp.eq.s32.totalorder %v6511_v42, 1 }
 0x555   :  { %2129 = vmatprep.mubr.f32.mxu0 %v7318_v21  ;;  %v5761_v21 = vpack.c.bf16 %v2406_v31, %v2405_v35  ;;  %v5729_v35 = vpack.c.bf16 %v2390_v9, %v2389_v0  ;;  %v2374_v31 = vld [vmem:[#allocation2 + $0x7c8] sm:$0xff] }
 0x557   :  { %5762 = vmatprep.subr.bf16.mxu0 %v5761_v21 }
 0x558   :  { %3932 = vmatmul.mubr.msk.f32.gmra.mrb[86].mxu0 %vm8151_vm0, %v1920_v19  ;;  %vm8157_vm0 = vcmp.eq.s32.totalorder %v6545_v63, 1 }
 0x559   :  { %2134 = vmatprep.mubr.f32.mxu0 %v1900_v29  ;;  %5764 = vmatpush3.bf16.msra.mxu0 %v5761_v21  ;;  %v2408_v29 = vld [vmem:[#allocation2 + $0x8d8] sm:$0xff]  ;;  %v5731_v21 = vpack.c.bf16 %v2374_v31, %v2373_v27 }
 0x55a   :  { %v5765_v19 = vpack.c.bf16 %v2408_v29, %v2407_v12  ;;  %v2391_v12 = vld [vmem:[#allocation2 + $0x850] sm:$0xff]  ;;  %v2392_v29 = vld [vmem:[#allocation2 + $0x858] sm:$0xff] }
 0x55c   :  { %3933 = vmatmul.mubr.msk.f32.gmra.mrb[88].mxu0 %vm8152_vm14, %v1919_v59  ;;  %v2410_v59 = vld [vmem:[#allocation2 + $0x8e8] sm:$0xff]  ;;  %5766 = vmatprep.subr.bf16.mxu0 %v5765_v19  ;;  %vm8158_vm14 = vcmp.eq.s32.totalorder %v6538_v57, 1 }
 0x55d   :  { %2139 = vmatprep.mubr.f32.mxu0 %v1901_v30  ;;  %v2409_v30 = vld [vmem:[#allocation2 + $0x8e0] sm:$0xff]  ;;  %5768 = vmatpush3.bf16.msra.mxu0 %v5765_v19  ;;  %v2375_v19 = vld [vmem:[#allocation2 + $0x7d0] sm:$0xff] }
 0x55e   :  { %v5769_v51 = vpack.c.bf16 %v2410_v59, %v2409_v30  ;;  %v5733_v30 = vpack.c.bf16 %v2392_v29, %v2391_v12  ;;  %v2376_v59 = vld [vmem:[#allocation2 + $0x7d8] sm:$0xff] }
 0x560   :  { %3934 = vmatmul.mubr.msk.f32.gmra.mrb[90].mxu0 %vm8153_vm2, %v1918_v11  ;;  %5770 = vmatprep.subr.bf16.mxu0 %v5769_v51  ;;  %v2365_v11 = vld [vmem:[#allocation2 + $0x780] sm:$0xff]  ;;  %vm8159_vm2 = vcmp.eq.s32.totalorder %v6559_v3, 1 }
 0x561   :  { %2144 = vmatprep.mubr.f32.mxu0 %v1902_v58  ;;  %v5773_v58 = vpack.c.bf16 %v2412_v62, %v2411_v47  ;;  %5772 = vmatpush3.bf16.msra.mxu0 %v5769_v51  ;;  %v5715_v37 = vpack.c.bf16 %v2366_v6, %v2365_v11  ;;  %v2393_v51 = vld [vmem:[#allocation2 + $0x860] sm:$0xff]  ;;  %v2394_v47 = vld [vmem:[#allocation2 + $0x868] sm:$0xff]  ;;  %v5735_v62 = vpack.c.bf16 %v2376_v59, %v2375_v19  ;;  %v2395_v11 = vld [vmem:[#allocation2 + $0x870] sm:$0xff] }
 0x562   :  { %v5739_v6 = vpack.c.bf16 %v2378_v20, %v2377_v56 }
 0x563   :  { %5774 = vmatprep.subr.bf16.mxu0 %v5773_v58  ;;  %5716 = vmatpush3.bf16.msra.mxu1 %v5715_v37  ;;  %v5741_v37 = vpack.c.bf16 %v2396_v13, %v2395_v11 }
 0x564   :  { %3935 = vmatmul.mubr.msk.f32.gmra.mrb[92].mxu0 %vm8154_vm15, %v1917_v24  ;;  %v2367_v24 = vld [vmem:[#allocation2 + $0x790] sm:$0xff]  ;;  %vm8160_vm15 = vcmp.eq.s32.totalorder %v6553_v1, 1 }
 0x565   :  { %2149 = vmatprep.mubr.f32.mxu0 %v1903_v39  ;;  %5776 = vmatpush3.bf16.msra.mxu0 %v5773_v58  ;;  %v2383_v39 = vld [vmem:[#allocation2 + $0x810] sm:$0xff]  ;;  %v5719_v40 = vpack.c.bf16 %v2368_v46, %v2367_v24  ;;  %v5737_v58 = vpack.c.bf16 %v2394_v47, %v2393_v51 }
 0x566   :  { %v5717_v18 = vpack.c.bf16 %v2384_v15, %v2383_v39  ;;  %v2379_v39 = vld [vmem:[#allocation2 + $0x7f0] sm:$0xff]  ;;  %v2380_v15 = vld [vmem:[#allocation2 + $0x7f8] sm:$0xff] }
 0x567   :  { %v5743_v24 = vpack.c.bf16 %v2380_v15, %v2379_v39 }
 0x568   :  { %3936 = vmatmul.mubr.msk.f32.gmra.mrb[94].mxu0 %vm8155_vm9, %v1916_v50  ;;  %5718 = vmatprep.subr.bf16.mxu1 %v5717_v18  ;;  %v2369_v50 = vld [vmem:[#allocation2 + $0x7a0] sm:$0xff]  ;;  %vm8161_vm9 = vcmp.eq.s32.totalorder %v6367_v49, 1 }
 0x569   :  { %5720 = vmatpush3.bf16.msra.mxu1 %v5719_v40  ;;  %v5723_v7 = vpack.c.bf16 %v2370_v41, %v2369_v50 }
 0x56a   :  { %5722 = vmatprep.subr.bf16.mxu1 %v5721_v17 }
 0x56d   :  { %5724 = vmatpush3.bf16.msra.mxu1 %v5723_v7 }
 0x56e   :  { %5726 = vmatprep.subr.bf16.mxu1 %v5725_v33 }
 0x571   :  { %5728 = vmatpush3.bf16.msra.mxu1 %v5727_v38 }
 0x572   :  { %5730 = vmatprep.subr.bf16.mxu1 %v5729_v35 }
 0x575   :  { %5732 = vmatpush3.bf16.msra.mxu1 %v5731_v21 }
 0x576   :  { %5734 = vmatprep.subr.bf16.mxu1 %v5733_v30 }
 0x579   :  { %5736 = vmatpush3.bf16.msra.mxu1 %v5735_v62 }
 0x57a   :  { %5738 = vmatprep.subr.bf16.mxu1 %v5737_v58 }
 0x57d   :  { %5740 = vmatpush3.bf16.msra.mxu1 %v5739_v6 }
 0x57e   :  { %5742 = vmatprep.subr.bf16.mxu1 %v5741_v37 }
 0x581   :  { %5744 = vmatpush3.bf16.msra.mxu1 %v5743_v24 }
 0x5eb   :  { %v5095_v18 = vpop.f32.mrb[72].mxu1 }
 0x5ec   :  { %v2221_v46 = vpop.f32.mrb[73].mxu1 }
 0x5f3   :  { %v5098_v40 = vpop.f32.mrb[74].mxu1 }
 0x5f4   :  { %v2231_v4 = vpop.f32.mrb[75].mxu1 }
 0x5fb   :  { %v7412_v52 = vpop.f32.mrb[76].mxu1 }
 0x5fc   :  { %v2241_v50 = vpop.f32.mrb[77].mxu1 }
 0x603   :  { %v7414_v17 = vpop.f32.mrb[78].mxu1 }
 0x604   :  { %v7416_v41 = vpop.f32.mrb[79].mxu1 }
 0x60b   :  { %v7418_v7 = vpop.f32.mrb[80].mxu1 }
 0x60c   :  { %v7420_v28 = vpop.f32.mrb[81].mxu1 }
 0x60f   :  { %v4445_v23 = vpop.f32.mrb[72].mxu0 }
 0x610   :  { %v4446_v33 = vpop.f32.mrb[73].mxu0  ;;  %v7424_v45 = vpop.f32.mrb[82].mxu1 }
 0x611   :  { %v4447_v38 = vadd.f32 %v4446_v33, %v4445_v23  ;;  %v7426_v0 = vpop.f32.mrb[83].mxu1 }
 0x613   :  { %v2097_v9 = vadd.f32 %v4447_v38, %v7422_v2  ;;  %v4448_v27 = vpop.f32.mrb[74].mxu0 }
 0x614   :  { %v4449_v35 = vpop.f32.mrb[75].mxu0 }
 0x615   :  { %v4450_v31 = vadd.f32 %v4449_v35, %v4448_v27  ;;  %v2222_v21 = vadd.f32 %v2221_v46, %v2097_v9 }
 0x617   :  { %v2102_v12 = vadd.f32 %v4450_v31, %v7422_v2  ;;  %v4451_v29 = vpop.f32.mrb[76].mxu0  ;;  %v7430_v19 = vmax.f32 %v2222_v21, 0.0 }
 0x618   :  { %v4452_v30 = vpop.f32.mrb[77].mxu0 }
 0x619   :  { %v2227_v59 = vadd.f32 %v5095_v18, %v2102_v12  ;;  %v4453_v51 = vadd.f32 %v4452_v30, %v4451_v29  ;;  %2482 = vmatprep.mubr.f32.mxu1 %v7430_v19  ;;  %v2292_v56 = vrot.slane %v7430_v19, 7  ;;  %v2328_v11 = vrot.slane %v7430_v19, 1  ;;  %v2785_v19 = vld [vmem:[#allocation2 + $0xa00] sm:$0xff] }
 0x61b   :  { %v7433_v47 = vmax.f32 %v2227_v59, 0.0  ;;  %v2107_v62 = vadd.f32 %v4453_v51, %v7422_v2  ;;  %v4454_v58 = vpop.f32.mrb[78].mxu0 }
 0x61c   :  { %v4455_v20 = vpop.f32.mrb[79].mxu0 }
 0x61d   :  { %v2232_v13 = vadd.f32 %v2231_v4, %v2107_v62  ;;  %v4456_v6 = vadd.f32 %v4455_v20, %v4454_v58  ;;  %v2329_v37 = vrot.slane %v7433_v47, 1  ;;  %v2293_v39 = vrot.slane %v7433_v47, 7 }
 0x61f   :  { %v7440_v15 = vmax.f32 %v2232_v13, 0.0  ;;  %v2112_v24 = vadd.f32 %v4456_v6, %v7422_v2  ;;  %v4457_v18 = vpop.f32.mrb[80].mxu0  ;;  %v2350_v46 = vsel %vm236_vm1, %v2328_v11, %v2329_v37  ;;  %v7451_v4 = vsel %vm139_vm12, %v2292_v56, %v2293_v39 }
 0x620   :  { %v4458_v23 = vpop.f32.mrb[81].mxu0  ;;  %5143 = vmatprep.mubr.msk.f32.mxu0 %vm285_vm4, %v2350_v46 }
 0x621   :  { %v2330_v33 = vrot.slane %v7440_v15, 1  ;;  %v2237_v38 = vadd.f32 %v5098_v40, %v2112_v24  ;;  %v4459_v9 = vadd.f32 %v4458_v23, %v4457_v18  ;;  %v2294_v27 = vrot.slane %v7440_v15, 7 }
 0x623   :  { %v7457_v35 = vmax.f32 %v2237_v38, 0.0  ;;  %v2117_v31 = vadd.f32 %v4459_v9, %v7422_v2  ;;  %v4460_v21 = vpop.f32.mrb[82].mxu0  ;;  %v2349_v12 = vsel %vm236_vm1, %v2329_v37, %v2330_v33  ;;  %v7464_v29 = vsel %vm139_vm12, %v2293_v39, %v2294_v27 }
 0x624   :  { %v4461_v30 = vpop.f32.mrb[83].mxu0  ;;  %5144 = vmatmul.mubr.msk.f32.vlgmr.msra.gmra.mrb[96].mxu0 %vm286_vm3, %v2349_v12 }
 0x625   :  { %v2242_v40 = vadd.f32 %v2241_v50, %v2117_v31  ;;  %v4462_v59 = vadd.f32 %v4461_v30, %v4460_v21  ;;  %v2331_v51 = vrot.slane %v7457_v35, 1  ;;  %v2295_v62 = vrot.slane %v7457_v35, 7 }
 0x627   :  { %v7470_v58 = vmax.f32 %v2242_v40, 0.0  ;;  %v2122_v20 = vadd.f32 %v4462_v59, %v7422_v2  ;;  %v4463_v13 = vpop.f32.mrb[84].mxu0  ;;  %v2348_v6 = vsel %vm236_vm1, %v2330_v33, %v2331_v51  ;;  %v7477_v37 = vsel %vm139_vm12, %v2294_v27, %v2295_v62 }
 0x628   :  { %v4464_v39 = vpop.f32.mrb[85].mxu0  ;;  %5146 = vmatprep.mubr.msk.f32.mxu0 %vm287_vm6, %v2348_v6 }
 0x629   :  { %v2247_v50 = vadd.f32 %v7412_v52, %v2122_v20  ;;  %v4465_v24 = vadd.f32 %v4464_v39, %v4463_v13  ;;  %v2332_v18 = vrot.slane %v7470_v58, 1  ;;  %v2296_v46 = vrot.slane %v7470_v58, 7 }
 0x62b   :  { %v7484_v23 = vmax.f32 %v2247_v50, 0.0  ;;  %v2127_v38 = vadd.f32 %v4465_v24, %v7422_v2  ;;  %v4466_v33 = vpop.f32.mrb[86].mxu0  ;;  %v2347_v9 = vsel %vm236_vm1, %v2331_v51, %v2332_v18  ;;  %v7491_v27 = vsel %vm139_vm12, %v2295_v62, %v2296_v46 }
 0x62c   :  { %v4467_v31 = vpop.f32.mrb[87].mxu0  ;;  %5147 = vmatmul.mubr.msk.f32.gmra.mrb[98].mxu0 %vm288_vm8, %v2347_v9 }
 0x62d   :  { %v2252_v52 = vadd.f32 %v7416_v41, %v2127_v38  ;;  %v4468_v21 = vadd.f32 %v4467_v31, %v4466_v33  ;;  %v2333_v12 = vrot.slane %v7484_v23, 1  ;;  %v2297_v30 = vrot.slane %v7484_v23, 7 }
 0x62f   :  { %v7498_v40 = vmax.f32 %v2252_v52, 0.0  ;;  %v2132_v59 = vadd.f32 %v4468_v21, %v7422_v2  ;;  %v4469_v51 = vpop.f32.mrb[88].mxu0  ;;  %v2346_v62 = vsel %vm236_vm1, %v2332_v18, %v2333_v12  ;;  %v7505_v20 = vsel %vm139_vm12, %v2296_v46, %v2297_v30 }
 0x630   :  { %v4470_v13 = vpop.f32.mrb[89].mxu0  ;;  %5149 = vmatprep.mubr.msk.f32.mxu0 %vm289_vm10, %v2346_v62 }
 0x631   :  { %v2257_v41 = vadd.f32 %v7414_v17, %v2132_v59  ;;  %v4471_v6 = vadd.f32 %v4470_v13, %v4469_v51  ;;  %v2334_v39 = vrot.slane %v7498_v40, 1  ;;  %v2298_v50 = vrot.slane %v7498_v40, 7 }
 0x633   :  { %v7512_v24 = vmax.f32 %v2257_v41, 0.0  ;;  %v2137_v38 = vadd.f32 %v4471_v6, %v7422_v2  ;;  %v4472_v18 = vpop.f32.mrb[90].mxu0  ;;  %v2345_v46 = vsel %vm236_vm1, %v2333_v12, %v2334_v39  ;;  %v2309_v33 = vsel %vm139_vm12, %v2297_v30, %v2298_v50 }
 0x634   :  { %v4473_v9 = vpop.f32.mrb[91].mxu0  ;;  %5150 = vmatmul.mubr.msk.f32.gmra.mrb[100].mxu0 %vm290_vm7, %v2345_v46 }
 0x635   :  { %v2262_v17 = vadd.f32 %v7420_v28, %v2137_v38  ;;  %v4474_v31 = vadd.f32 %v4473_v9, %v4472_v18  ;;  %v2335_v52 = vrot.slane %v7512_v24, 1  ;;  %v2299_v21 = vrot.slane %v7512_v24, 7 }
 0x637   :  { %v2288_v59 = vmax.f32 %v2262_v17, 0.0  ;;  %v2142_v51 = vadd.f32 %v4474_v31, %v7422_v2  ;;  %v4475_v62 = vpop.f32.mrb[92].mxu0  ;;  %v2344_v12 = vsel %vm236_vm1, %v2334_v39, %v2335_v52  ;;  %v2308_v30 = vsel %vm139_vm12, %v2298_v50, %v2299_v21 }
 0x638   :  { %v4476_v13 = vpop.f32.mrb[93].mxu0  ;;  %5152 = vmatprep.mubr.msk.f32.mxu0 %vm291_vm5, %v2344_v12 }
 0x639   :  { %v2267_v28 = vadd.f32 %v7418_v7, %v2142_v51  ;;  %v4477_v41 = vadd.f32 %v4476_v13, %v4475_v62  ;;  %v2336_v6 = vrot.slane %v2288_v59, 1  ;;  %v2300_v38 = vrot.slane %v2288_v59, 7 }
 0x63b   :  { %v2289_v18 = vmax.f32 %v2267_v28, 0.0  ;;  %v2147_v46 = vadd.f32 %v4477_v41, %v7422_v2  ;;  %v4478_v9 = vpop.f32.mrb[94].mxu0  ;;  %v2343_v17 = vsel %vm236_vm1, %v2335_v52, %v2336_v6  ;;  %v2307_v39 = vsel %vm139_vm12, %v2299_v21, %v2300_v38 }
 0x63c   :  { %v4479_v50 = vpop.f32.mrb[95].mxu0  ;;  %5153 = vmatmul.mubr.msk.f32.gmra.mrb[102].mxu0 %vm8156_vm11, %v2343_v17  ;;  %vm8162_vm11 = vcmp.eq.s32.totalorder %v6353_v43, 1 }
 0x63d   :  { %v2272_v31 = vadd.f32 %v7426_v0, %v2147_v46  ;;  %v4480_v7 = vadd.f32 %v4479_v50, %v4478_v9  ;;  %v2337_v51 = vrot.slane %v2289_v18, 1  ;;  %v2301_v62 = vrot.slane %v2289_v18, 7 }
 0x63f   :  { %v2290_v12 = vmax.f32 %v2272_v31, 0.0  ;;  %v2152_v13 = vadd.f32 %v4480_v7, %v7422_v2  ;;  %v2342_v28 = vsel %vm236_vm1, %v2336_v6, %v2337_v51  ;;  %v2306_v52 = vsel %vm139_vm12, %v2300_v38, %v2301_v62 }
 0x640   :  { %5155 = vmatprep.mubr.msk.f32.mxu0 %vm8157_vm0, %v2342_v28  ;;  %vm8163_vm0 = vcmp.eq.s32.totalorder %v6365_v48, 1  ;;  %v2770_v28 = vld [vmem:[#allocation2 + $0x988] sm:$0xff] }
 0x641   :  { %v2277_v21 = vadd.f32 %v7424_v45, %v2152_v13  ;;  %v2338_v41 = vrot.slane %v2290_v12, 1  ;;  %v2302_v17 = vrot.slane %v2290_v12, 7  ;;  %v2769_v13 = vld [vmem:[#allocation2 + $0x980] sm:$0xff] }
 0x643   :  { %v2291_v0 = vmax.f32 %v2277_v21, 0.0  ;;  %v2341_v46 = vsel %vm236_vm1, %v2337_v51, %v2338_v41  ;;  %v2305_v2 = vsel %vm139_vm12, %v2301_v62, %v2302_v17  ;;  %v2799_v51 = vld [vmem:[#allocation2 + $0xa70] sm:$0xff]  ;;  %v2800_v62 = vld [vmem:[#allocation2 + $0xa78] sm:$0xff]  ;;  %v5777_v21 = vpack.c.bf16 %v2770_v28, %v2769_v13  ;;  %v2765_v13 = vld [vmem:[#allocation2 + $0x960] sm:$0xff] }
 0x644   :  { %5156 = vmatmul.mubr.msk.f32.gmra.mrb[104].mxu0 %vm8158_vm14, %v2341_v46  ;;  %vm8164_vm14 = vcmp.eq.s32.totalorder %v6379_v54, 1  ;;  %v2772_v46 = vld [vmem:[#allocation2 + $0x998] sm:$0xff]  ;;  %v2766_v28 = vld [vmem:[#allocation2 + $0x968] sm:$0xff] }
 0x645   :  { %v2303_v6 = vrot.slane %v2291_v0, 7  ;;  %v2339_v9 = vrot.slane %v2291_v0, 1  ;;  %5778 = vmatprep.subr.bf16.mxu0 %v5777_v21  ;;  %v2784_v21 = vld [vmem:[#allocation2 + $0x9f8] sm:$0xff] }
 0x647   :  { %v2315_v38 = vsel %vm139_vm12, %v2303_v6, %v2292_v56  ;;  %v2340_v45 = vsel %vm236_vm1, %v2338_v41, %v2339_v9  ;;  %v2351_v50 = vsel %vm236_vm1, %v2339_v9, %v2328_v11  ;;  %v2304_v31 = vsel %vm139_vm12, %v2302_v17, %v2303_v6  ;;  %v2787_v56 = vld [vmem:[#allocation2 + $0xa10] sm:$0xff]  ;;  %v2754_v41 = vld [vmem:[#allocation2 + $0x908] sm:$0xff]  ;;  %v2756_v9 = vld [vmem:[#allocation2 + $0x918] sm:$0xff] }
 0x648   :  { %3950 = vmatmul.mubr.msk.f32.vlgmr.msra.gmra.mrb[84].mxu1 %vm200_vm13, %v2315_v38  ;;  %5158 = vmatprep.mubr.msk.f32.mxu0 %vm8159_vm2, %v2340_v45  ;;  %vm8165_vm2 = vcmp.eq.s32.totalorder %v6377_v53, 1  ;;  %v2773_v45 = vld [vmem:[#allocation2 + $0x9a0] sm:$0xff] }
 0x649   :  { %2487 = vmatprep.mubr.f32.mxu1 %v7433_v47  ;;  %5159 = vmatmul.mubr.msk.f32.gmra.mrb[106].mxu0 %vm8160_vm15, %v2351_v50  ;;  %vm8166_vm15 = vcmp.eq.s32.totalorder %v6395_v61, 1  ;;  %v2786_v47 = vld [vmem:[#allocation2 + $0xa08] sm:$0xff] }
 0x64a   :  { %v5809_v11 = vpack.c.bf16 %v2786_v47, %v2785_v19  ;;  %v2774_v50 = vld [vmem:[#allocation2 + $0x9a8] sm:$0xff] }
 0x64b   :  { %v5785_v19 = vpack.c.bf16 %v2774_v50, %v2773_v45  ;;  %v2758_v47 = vld [vmem:[#allocation2 + $0x928] sm:$0xff] }
 0x64c   :  { %3951 = vmatmul.mubr.msk.f32.gmra.mrb[86].mxu1 %vm8161_vm9, %v7451_v4  ;;  %vm8167_vm9 = vcmp.eq.s32.totalorder %v6393_v60, 1  ;;  %5810 = vmatprep.subr.bf16.mxu1 %v5809_v11 }
 0x64d   :  { %2492 = vmatprep.mubr.f32.mxu1 %v7440_v15  ;;  %v2788_v15 = vld [vmem:[#allocation2 + $0xa18] sm:$0xff]  ;;  %5812 = vmatpush3.bf16.msra.mxu1 %v5809_v11  ;;  %v2775_v11 = vld [vmem:[#allocation2 + $0x9b0] sm:$0xff] }
 0x64e   :  { %v5813_v4 = vpack.c.bf16 %v2788_v15, %v2787_v56  ;;  %v2776_v15 = vld [vmem:[#allocation2 + $0x9b8] sm:$0xff] }
 0x650   :  { %3952 = vmatmul.mubr.msk.f32.gmra.mrb[88].mxu1 %vm8162_vm11, %v7464_v29  ;;  %vm8168_vm11 = vcmp.eq.s32.totalorder %v6447_v5, 1  ;;  %5814 = vmatprep.subr.bf16.mxu1 %v5813_v4  ;;  %v2790_v29 = vld [vmem:[#allocation2 + $0xa28] sm:$0xff] }
 0x651   :  { %2497 = vmatprep.mubr.f32.mxu1 %v7457_v35  ;;  %5816 = vmatpush3.bf16.msra.mxu1 %v5813_v4  ;;  %v2789_v35 = vld [vmem:[#allocation2 + $0xa20] sm:$0xff]  ;;  %v2759_v4 = vld [vmem:[#allocation2 + $0x930] sm:$0xff] }
 0x654   :  { %3953 = vmatmul.mubr.msk.f32.gmra.mrb[90].mxu1 %vm8163_vm0, %v7477_v37  ;;  %vm8169_vm0 = vcmp.eq.s32.totalorder %v6466_v25, 1  ;;  %v2791_v37 = vld [vmem:[#allocation2 + $0xa30] sm:$0xff] }
 0x655   :  { %2502 = vmatprep.mubr.f32.mxu1 %v7470_v58  ;;  %v5817_v58 = vpack.c.bf16 %v2790_v29, %v2789_v35  ;;  %v5789_v35 = vpack.c.bf16 %v2776_v15, %v2775_v11  ;;  %v2760_v29 = vld [vmem:[#allocation2 + $0x938] sm:$0xff] }
 0x657   :  { %5818 = vmatprep.subr.bf16.mxu1 %v5817_v58 }
 0x658   :  { %3954 = vmatmul.mubr.msk.f32.gmra.mrb[92].mxu1 %vm8164_vm14, %v7491_v27  ;;  %vm8170_vm14 = vcmp.eq.s32.totalorder %v6489_v36, 1 }
 0x659   :  { %2507 = vmatprep.mubr.f32.mxu1 %v7484_v23  ;;  %5820 = vmatpush3.bf16.msra.mxu1 %v5817_v58  ;;  %v2792_v23 = vld [vmem:[#allocation2 + $0xa38] sm:$0xff]  ;;  %v5791_v58 = vpack.c.bf16 %v2760_v29, %v2759_v4  ;;  %v7616_v4 = vld [vmem:[#allocation6 + $0x5] ss:$0 sm:$0xff] }
 0x65a   :  { %v5821_v27 = vpack.c.bf16 %v2792_v23, %v2791_v37  ;;  %v2777_v37 = vld [vmem:[#allocation2 + $0x9c0] sm:$0xff]  ;;  %v2778_v23 = vld [vmem:[#allocation2 + $0x9c8] sm:$0xff] }
 0x65c   :  { %3955 = vmatmul.mubr.msk.f32.gmra.mrb[94].mxu1 %vm8165_vm2, %v7505_v20  ;;  %vm8171_vm2 = vcmp.eq.s32.totalorder %v6535_v55, 1  ;;  %5822 = vmatprep.subr.bf16.mxu1 %v5821_v27  ;;  %v2794_v20 = vld [vmem:[#allocation2 + $0xa48] sm:$0xff] }
 0x65d   :  { %2512 = vmatprep.mubr.f32.mxu1 %v7498_v40  ;;  %5824 = vmatpush3.bf16.msra.mxu1 %v5821_v27  ;;  %v2793_v40 = vld [vmem:[#allocation2 + $0xa40] sm:$0xff] }
 0x65e   :  { %v2761_v27 = vld [vmem:[#allocation2 + $0x940] sm:$0xff] }
 0x660   :  { %3956 = vmatmul.mubr.msk.f32.gmra.mrb[96].mxu1 %vm8166_vm15, %v2309_v33  ;;  %v2795_v33 = vld [vmem:[#allocation2 + $0xa50] sm:$0xff]  ;;  %vm8172_vm15 = vcmp.eq.s32.totalorder %v6511_v42, 1 }
 0x661   :  { %2517 = vmatprep.mubr.f32.mxu1 %v7512_v24  ;;  %v5825_v24 = vpack.c.bf16 %v2794_v20, %v2793_v40  ;;  %v5793_v40 = vpack.c.bf16 %v2778_v23, %v2777_v37  ;;  %v2762_v20 = vld [vmem:[#allocation2 + $0x948] sm:$0xff] }
 0x663   :  { %5826 = vmatprep.subr.bf16.mxu1 %v5825_v24 }
 0x664   :  { %3957 = vmatmul.mubr.msk.f32.gmra.mrb[98].mxu1 %vm8167_vm9, %v2308_v30  ;;  %vm8173_vm9 = vcmp.eq.s32.totalorder %v6545_v63, 1 }
 0x665   :  { %2522 = vmatprep.mubr.f32.mxu1 %v2288_v59  ;;  %5828 = vmatpush3.bf16.msra.mxu1 %v5825_v24  ;;  %v2796_v59 = vld [vmem:[#allocation2 + $0xa58] sm:$0xff]  ;;  %v5795_v24 = vpack.c.bf16 %v2762_v20, %v2761_v27 }
 0x666   :  { %v5829_v30 = vpack.c.bf16 %v2796_v59, %v2795_v33  ;;  %v2779_v33 = vld [vmem:[#allocation2 + $0x9d0] sm:$0xff]  ;;  %v2780_v59 = vld [vmem:[#allocation2 + $0x9d8] sm:$0xff] }
 0x668   :  { %3958 = vmatmul.mubr.msk.f32.gmra.mrb[100].mxu1 %vm8168_vm11, %v2307_v39  ;;  %v2798_v39 = vld [vmem:[#allocation2 + $0xa68] sm:$0xff]  ;;  %5830 = vmatprep.subr.bf16.mxu1 %v5829_v30  ;;  %vm8174_vm11 = vcmp.eq.s32.totalorder %v6538_v57, 1 }
 0x669   :  { %2527 = vmatprep.mubr.f32.mxu1 %v2289_v18  ;;  %v2797_v18 = vld [vmem:[#allocation2 + $0xa60] sm:$0xff]  ;;  %5832 = vmatpush3.bf16.msra.mxu1 %v5829_v30  ;;  %v2763_v30 = vld [vmem:[#allocation2 + $0x950] sm:$0xff] }
 0x66a   :  { %v5833_v7 = vpack.c.bf16 %v2798_v39, %v2797_v18  ;;  %v5797_v18 = vpack.c.bf16 %v2780_v59, %v2779_v33  ;;  %v2764_v39 = vld [vmem:[#allocation2 + $0x958] sm:$0xff] }
 0x66c   :  { %3959 = vmatmul.mubr.msk.f32.gmra.mrb[102].mxu1 %vm8169_vm0, %v2306_v52  ;;  %5834 = vmatprep.subr.bf16.mxu1 %v5833_v7  ;;  %v2753_v52 = vld [vmem:[#allocation2 + $0x900] sm:$0xff]  ;;  %vm8175_vm0 = vcmp.eq.s32.totalorder %v6559_v3, 1 }
 0x66d   :  { %2532 = vmatprep.mubr.f32.mxu1 %v2290_v12  ;;  %v5837_v12 = vpack.c.bf16 %v2800_v62, %v2799_v51  ;;  %5836 = vmatpush3.bf16.msra.mxu1 %v5833_v7  ;;  %v5779_v17 = vpack.c.bf16 %v2754_v41, %v2753_v52  ;;  %v2781_v7 = vld [vmem:[#allocation2 + $0x9e0] sm:$0xff]  ;;  %v2782_v51 = vld [vmem:[#allocation2 + $0x9e8] sm:$0xff]  ;;  %v5799_v62 = vpack.c.bf16 %v2764_v39, %v2763_v30  ;;  %v2783_v52 = vld [vmem:[#allocation2 + $0x9f0] sm:$0xff] }
 0x66e   :  { %v5803_v41 = vpack.c.bf16 %v2766_v28, %v2765_v13 }
 0x66f   :  { %5838 = vmatprep.subr.bf16.mxu1 %v5837_v12  ;;  %5780 = vmatpush3.bf16.msra.mxu0 %v5779_v17  ;;  %v5805_v17 = vpack.c.bf16 %v2784_v21, %v2783_v52 }
 0x670   :  { %3960 = vmatmul.mubr.msk.f32.gmra.mrb[104].mxu1 %vm8170_vm14, %v2305_v2  ;;  %v2755_v2 = vld [vmem:[#allocation2 + $0x910] sm:$0xff]  ;;  %vm8176_vm14 = vcmp.eq.s32.totalorder %v6553_v1, 1 }
 0x671   :  { %2537 = vmatprep.mubr.f32.mxu1 %v2291_v0  ;;  %5840 = vmatpush3.bf16.msra.mxu1 %v5837_v12  ;;  %v2771_v0 = vld [vmem:[#allocation2 + $0x990] sm:$0xff]  ;;  %v5783_v38 = vpack.c.bf16 %v2756_v9, %v2755_v2  ;;  %v5801_v12 = vpack.c.bf16 %v2782_v51, %v2781_v7 }
 0x672   :  { %v5781_v6 = vpack.c.bf16 %v2772_v46, %v2771_v0  ;;  %v2767_v0 = vld [vmem:[#allocation2 + $0x970] sm:$0xff]  ;;  %v2768_v46 = vld [vmem:[#allocation2 + $0x978] sm:$0xff] }
 0x673   :  { %v5807_v2 = vpack.c.bf16 %v2768_v46, %v2767_v0 }
 0x674   :  { %3961 = vmatmul.mubr.msk.f32.gmra.mrb[106].mxu1 %vm8171_vm2, %v2304_v31  ;;  %5782 = vmatprep.subr.bf16.mxu0 %v5781_v6  ;;  %v2757_v31 = vld [vmem:[#allocation2 + $0x920] sm:$0xff]  ;;  %vm8177_vm2 = vcmp.eq.s32.totalorder %v6367_v49, 1 }
 0x675   :  { %5784 = vmatpush3.bf16.msra.mxu0 %v5783_v38  ;;  %v5787_v56 = vpack.c.bf16 %v2758_v47, %v2757_v31 }
 0x676   :  { %5786 = vmatprep.subr.bf16.mxu0 %v5785_v19 }
 0x679   :  { %5788 = vmatpush3.bf16.msra.mxu0 %v5787_v56 }
 0x67a   :  { %5790 = vmatprep.subr.bf16.mxu0 %v5789_v35 }
 0x67d   :  { %5792 = vmatpush3.bf16.msra.mxu0 %v5791_v58 }
 0x67e   :  { %5794 = vmatprep.subr.bf16.mxu0 %v5793_v40 }
 0x681   :  { %5796 = vmatpush3.bf16.msra.mxu0 %v5795_v24 }
 0x682   :  { %5798 = vmatprep.subr.bf16.mxu0 %v5797_v18 }
 0x685   :  { %5800 = vmatpush3.bf16.msra.mxu0 %v5799_v62 }
 0x686   :  { %5802 = vmatprep.subr.bf16.mxu0 %v5801_v12 }
 0x689   :  { %5804 = vmatpush3.bf16.msra.mxu0 %v5803_v41 }
 0x68a   :  { %5806 = vmatprep.subr.bf16.mxu0 %v5805_v17 }
 0x68d   :  { %5808 = vmatpush3.bf16.msra.mxu0 %v5807_v2 }
 0x6f7   :  { %v5145_v6 = vpop.f32.mrb[96].mxu0 }
 0x6f8   :  { %v2609_v9 = vpop.f32.mrb[97].mxu0 }
 0x6ff   :  { %v5148_v38 = vpop.f32.mrb[98].mxu0 }
 0x700   :  { %v2619_v45 = vpop.f32.mrb[99].mxu0 }
 0x707   :  { %v7606_v50 = vpop.f32.mrb[100].mxu0 }
 0x708   :  { %v2629_v31 = vpop.f32.mrb[101].mxu0 }
 0x70f   :  { %v7608_v19 = vpop.f32.mrb[102].mxu0 }
 0x710   :  { %v7610_v47 = vpop.f32.mrb[103].mxu0 }
 0x717   :  { %v7612_v56 = vpop.f32.mrb[104].mxu0 }
 0x718   :  { %v7614_v11 = vpop.f32.mrb[105].mxu0 }
 0x71b   :  { %v4541_v15 = vpop.f32.mrb[84].mxu1 }
 0x71c   :  { %v4542_v35 = vpop.f32.mrb[85].mxu1  ;;  %v7618_v29 = vpop.f32.mrb[106].mxu0 }
 0x71d   :  { %v4543_v58 = vadd.f32 %v4542_v35, %v4541_v15  ;;  %v7620_v37 = vpop.f32.mrb[107].mxu0 }
 0x71f   :  { %v2485_v23 = vadd.f32 %v4543_v58, %v7616_v4  ;;  %v4544_v27 = vpop.f32.mrb[86].mxu1 }
 0x720   :  { %v4545_v40 = vpop.f32.mrb[87].mxu1 }
 0x721   :  { %v4546_v20 = vadd.f32 %v4545_v40, %v4544_v27  ;;  %v2610_v24 = vadd.f32 %v2609_v9, %v2485_v23 }
 0x723   :  { %v2490_v33 = vadd.f32 %v4546_v20, %v7616_v4  ;;  %v4547_v59 = vpop.f32.mrb[88].mxu1  ;;  %v7624_v30 = vmax.f32 %v2610_v24, 0.0 }
 0x724   :  { %v4548_v18 = vpop.f32.mrb[89].mxu1 }
 0x725   :  { %v2615_v39 = vadd.f32 %v5145_v6, %v2490_v33  ;;  %v4549_v7 = vadd.f32 %v4548_v18, %v4547_v59  ;;  %2870 = vmatprep.mubr.f32.mxu0 %v7624_v30  ;;  %v2680_v13 = vrot.slane %v7624_v30, 7  ;;  %v2716_v52 = vrot.slane %v7624_v30, 1  ;;  %v3173_v30 = vld [vmem:[#allocation2 + $0xb80] sm:$0xff] }
 0x727   :  { %v7627_v51 = vmax.f32 %v2615_v39, 0.0  ;;  %v2495_v62 = vadd.f32 %v4549_v7, %v7616_v4  ;;  %v4550_v12 = vpop.f32.mrb[90].mxu1 }
 0x728   :  { %v4551_v28 = vpop.f32.mrb[91].mxu1 }
 0x729   :  { %v2620_v21 = vadd.f32 %v2619_v45, %v2495_v62  ;;  %v4552_v41 = vadd.f32 %v4551_v28, %v4550_v12  ;;  %v2717_v17 = vrot.slane %v7627_v51, 1  ;;  %v2681_v0 = vrot.slane %v7627_v51, 7 }
 0x72b   :  { %v7634_v46 = vmax.f32 %v2620_v21, 0.0  ;;  %v2500_v2 = vadd.f32 %v4552_v41, %v7616_v4  ;;  %v4553_v6 = vpop.f32.mrb[92].mxu1  ;;  %v2738_v9 = vsel %vm236_vm1, %v2716_v52, %v2717_v17  ;;  %v7645_v45 = vsel %vm139_vm12, %v2680_v13, %v2681_v0 }
 0x72c   :  { %v4554_v15 = vpop.f32.mrb[93].mxu1  ;;  %5193 = vmatprep.mubr.msk.f32.mxu1 %vm285_vm4, %v2738_v9 }
 0x72d   :  { %v2718_v35 = vrot.slane %v7634_v46, 1  ;;  %v2625_v58 = vadd.f32 %v5148_v38, %v2500_v2  ;;  %v4555_v23 = vadd.f32 %v4554_v15, %v4553_v6  ;;  %v2682_v27 = vrot.slane %v7634_v46, 7 }
 0x72f   :  { %v7651_v40 = vmax.f32 %v2625_v58, 0.0  ;;  %v2505_v20 = vadd.f32 %v4555_v23, %v7616_v4  ;;  %v4556_v24 = vpop.f32.mrb[94].mxu1  ;;  %v2737_v33 = vsel %vm236_vm1, %v2717_v17, %v2718_v35  ;;  %v7658_v59 = vsel %vm139_vm12, %v2681_v0, %v2682_v27 }
 0x730   :  { %v4557_v18 = vpop.f32.mrb[95].mxu1  ;;  %5194 = vmatmul.mubr.msk.f32.vlgmr.msra.gmra.mrb[108].mxu1 %vm286_vm3, %v2737_v33 }
 0x731   :  { %v2630_v38 = vadd.f32 %v2629_v31, %v2505_v20  ;;  %v4558_v39 = vadd.f32 %v4557_v18, %v4556_v24  ;;  %v2719_v7 = vrot.slane %v7651_v40, 1  ;;  %v2683_v62 = vrot.slane %v7651_v40, 7 }
 0x733   :  { %v7664_v12 = vmax.f32 %v2630_v38, 0.0  ;;  %v2510_v28 = vadd.f32 %v4558_v39, %v7616_v4  ;;  %v4559_v21 = vpop.f32.mrb[96].mxu1  ;;  %v2736_v41 = vsel %vm236_vm1, %v2718_v35, %v2719_v7  ;;  %v7671_v17 = vsel %vm139_vm12, %v2682_v27, %v2683_v62 }
 0x734   :  { %v4560_v0 = vpop.f32.mrb[97].mxu1  ;;  %5196 = vmatprep.mubr.msk.f32.mxu1 %vm287_vm6, %v2736_v41 }
 0x735   :  { %v2635_v31 = vadd.f32 %v7606_v50, %v2510_v28  ;;  %v4561_v2 = vadd.f32 %v4560_v0, %v4559_v21  ;;  %v2720_v6 = vrot.slane %v7664_v12, 1  ;;  %v2684_v9 = vrot.slane %v7664_v12, 7 }
 0x737   :  { %v7678_v15 = vmax.f32 %v2635_v31, 0.0  ;;  %v2515_v58 = vadd.f32 %v4561_v2, %v7616_v4  ;;  %v4562_v35 = vpop.f32.mrb[98].mxu1  ;;  %v2735_v23 = vsel %vm236_vm1, %v2719_v7, %v2720_v6  ;;  %v7685_v27 = vsel %vm139_vm12, %v2683_v62, %v2684_v9 }
 0x738   :  { %v4563_v20 = vpop.f32.mrb[99].mxu1  ;;  %5197 = vmatmul.mubr.msk.f32.gmra.mrb[110].mxu1 %vm288_vm8, %v2735_v23 }
 0x739   :  { %v2640_v50 = vadd.f32 %v7610_v47, %v2515_v58  ;;  %v4564_v24 = vadd.f32 %v4563_v20, %v4562_v35  ;;  %v2721_v33 = vrot.slane %v7678_v15, 1  ;;  %v2685_v18 = vrot.slane %v7678_v15, 7 }
 0x73b   :  { %v7692_v38 = vmax.f32 %v2640_v50, 0.0  ;;  %v2520_v39 = vadd.f32 %v4564_v24, %v7616_v4  ;;  %v4565_v7 = vpop.f32.mrb[100].mxu1  ;;  %v2734_v62 = vsel %vm236_vm1, %v2720_v6, %v2721_v33  ;;  %v7699_v28 = vsel %vm139_vm12, %v2684_v9, %v2685_v18 }
 0x73c   :  { %v4566_v21 = vpop.f32.mrb[101].mxu1  ;;  %5199 = vmatprep.mubr.msk.f32.mxu1 %vm289_vm10, %v2734_v62 }
 0x73d   :  { %v2645_v47 = vadd.f32 %v7608_v19, %v2520_v39  ;;  %v4567_v41 = vadd.f32 %v4566_v21, %v4565_v7  ;;  %v2722_v0 = vrot.slane %v7692_v38, 1  ;;  %v2686_v31 = vrot.slane %v7692_v38, 7 }
 0x73f   :  { %v7706_v2 = vmax.f32 %v2645_v47, 0.0  ;;  %v2525_v58 = vadd.f32 %v4567_v41, %v7616_v4  ;;  %v4568_v6 = vpop.f32.mrb[102].mxu1  ;;  %v2733_v9 = vsel %vm236_vm1, %v2721_v33, %v2722_v0  ;;  %v2697_v35 = vsel %vm139_vm12, %v2685_v18, %v2686_v31 }
 0x740   :  { %v4569_v23 = vpop.f32.mrb[103].mxu1  ;;  %5200 = vmatmul.mubr.msk.f32.gmra.mrb[112].mxu1 %vm290_vm7, %v2733_v9 }
 0x741   :  { %v2650_v19 = vadd.f32 %v7614_v11, %v2525_v58  ;;  %v4570_v20 = vadd.f32 %v4569_v23, %v4568_v6  ;;  %v2723_v50 = vrot.slane %v7706_v2, 1  ;;  %v2687_v24 = vrot.slane %v7706_v2, 7 }
 0x743   :  { %v2676_v39 = vmax.f32 %v2650_v19, 0.0  ;;  %v2530_v7 = vadd.f32 %v4570_v20, %v7616_v4  ;;  %v4571_v62 = vpop.f32.mrb[104].mxu1  ;;  %v2732_v33 = vsel %vm236_vm1, %v2722_v0, %v2723_v50  ;;  %v2696_v18 = vsel %vm139_vm12, %v2686_v31, %v2687_v24 }
 0x744   :  { %v4572_v21 = vpop.f32.mrb[105].mxu1  ;;  %5202 = vmatprep.mubr.msk.f32.mxu1 %vm291_vm5, %v2732_v33 }
 0x745   :  { %v2655_v11 = vadd.f32 %v7612_v56, %v2530_v7  ;;  %v4573_v47 = vadd.f32 %v4572_v21, %v4571_v62  ;;  %v2724_v41 = vrot.slane %v2676_v39, 1  ;;  %v2688_v58 = vrot.slane %v2676_v39, 7 }
 0x747   :  { %v2677_v6 = vmax.f32 %v2655_v11, 0.0  ;;  %v2535_v9 = vadd.f32 %v4573_v47, %v7616_v4  ;;  %v4574_v23 = vpop.f32.mrb[106].mxu1  ;;  %v2731_v19 = vsel %vm236_vm1, %v2723_v50, %v2724_v41  ;;  %v2695_v0 = vsel %vm139_vm12, %v2687_v24, %v2688_v58 }
 0x748   :  { %v4575_v31 = vpop.f32.mrb[107].mxu1  ;;  %5203 = vmatmul.mubr.msk.f32.gmra.mrb[114].mxu1 %vm8172_vm15, %v2731_v19  ;;  %vm8178_vm15 = vcmp.eq.s32.totalorder %v6353_v43, 1 }
 0x749   :  { %v2660_v20 = vadd.f32 %v7620_v37, %v2535_v9  ;;  %v4576_v56 = vadd.f32 %v4575_v31, %v4574_v23  ;;  %v2725_v7 = vrot.slane %v2677_v6, 1  ;;  %v2689_v62 = vrot.slane %v2677_v6, 7 }
 0x74b   :  { %v2678_v33 = vmax.f32 %v2660_v20, 0.0  ;;  %v2540_v21 = vadd.f32 %v4576_v56, %v7616_v4  ;;  %v2730_v11 = vsel %vm236_vm1, %v2724_v41, %v2725_v7  ;;  %v2694_v50 = vsel %vm139_vm12, %v2688_v58, %v2689_v62 }
 0x74c   :  { %5205 = vmatprep.mubr.msk.f32.mxu1 %vm8173_vm9, %v2730_v11  ;;  %vm8179_vm9 = vcmp.eq.s32.totalorder %v6365_v48, 1  ;;  %v3158_v11 = vld [vmem:[#allocation2 + $0xb08] sm:$0xff] }
 0x74d   :  { %v2665_v24 = vadd.f32 %v7618_v29, %v2540_v21  ;;  %v2726_v47 = vrot.slane %v2678_v33, 1  ;;  %v2690_v19 = vrot.slane %v2678_v33, 7  ;;  %v3157_v21 = vld [vmem:[#allocation2 + $0xb00] sm:$0xff] }
 0x74f   :  { %v2679_v37 = vmax.f32 %v2665_v24, 0.0  ;;  %v2729_v9 = vsel %vm236_vm1, %v2725_v7, %v2726_v47  ;;  %v2693_v4 = vsel %vm139_vm12, %v2689_v62, %v2690_v19  ;;  %v3187_v7 = vld [vmem:[#allocation2 + $0xbf0] sm:$0xff]  ;;  %v3188_v62 = vld [vmem:[#allocation2 + $0xbf8] sm:$0xff]  ;;  %v5841_v24 = vpack.c.bf16 %v3158_v11, %v3157_v21  ;;  %v3153_v21 = vld [vmem:[#allocation2 + $0xae0] sm:$0xff] }
 0x750   :  { %5206 = vmatmul.mubr.msk.f32.gmra.mrb[116].mxu1 %vm8174_vm11, %v2729_v9  ;;  %vm8180_vm11 = vcmp.eq.s32.totalorder %v6379_v54, 1  ;;  %v3160_v9 = vld [vmem:[#allocation2 + $0xb18] sm:$0xff]  ;;  %v3154_v11 = vld [vmem:[#allocation2 + $0xae8] sm:$0xff] }
 0x751   :  { %v2691_v41 = vrot.slane %v2679_v37, 7  ;;  %v2727_v23 = vrot.slane %v2679_v37, 1  ;;  %5842 = vmatprep.subr.bf16.mxu1 %v5841_v24  ;;  %v3172_v24 = vld [vmem:[#allocation2 + $0xb78] sm:$0xff] }
 0x753   :  { %v2703_v58 = vsel %vm139_vm12, %v2691_v41, %v2680_v13  ;;  %v2728_v29 = vsel %vm236_vm1, %v2726_v47, %v2727_v23  ;;  %v2739_v31 = vsel %vm236_vm1, %v2727_v23, %v2716_v52  ;;  %v2692_v20 = vsel %vm139_vm12, %v2690_v19, %v2691_v41  ;;  %v3175_v13 = vld [vmem:[#allocation2 + $0xb90] sm:$0xff]  ;;  %v3142_v47 = vld [vmem:[#allocation2 + $0xa88] sm:$0xff]  ;;  %v3144_v23 = vld [vmem:[#allocation2 + $0xa98] sm:$0xff] }
 0x754   :  { %3975 = vmatmul.mubr.msk.f32.vlgmr.msra.gmra.mrb[108].mxu0 %vm200_vm13, %v2703_v58  ;;  %5208 = vmatprep.mubr.msk.f32.mxu1 %vm8175_vm0, %v2728_v29  ;;  %vm8181_vm0 = vcmp.eq.s32.totalorder %v6377_v53, 1  ;;  %v3161_v29 = vld [vmem:[#allocation2 + $0xb20] sm:$0xff] }
 0x755   :  { %2875 = vmatprep.mubr.f32.mxu0 %v7627_v51  ;;  %5209 = vmatmul.mubr.msk.f32.gmra.mrb[118].mxu1 %vm8176_vm14, %v2739_v31  ;;  %vm8182_vm14 = vcmp.eq.s32.totalorder %v6395_v61, 1  ;;  %v3174_v51 = vld [vmem:[#allocation2 + $0xb88] sm:$0xff]  ;;  %v3535_v61 = vld [vmem:[#allocation4 + $0x20] sm:$0xff] }
 0x756   :  { %v5873_v52 = vpack.c.bf16 %v3174_v51, %v3173_v30  ;;  %v3162_v31 = vld [vmem:[#allocation2 + $0xb28] sm:$0xff] }
 0x757   :  { %v5849_v30 = vpack.c.bf16 %v3162_v31, %v3161_v29  ;;  %v3146_v51 = vld [vmem:[#allocation2 + $0xaa8] sm:$0xff] }
 0x758   :  { %3976 = vmatmul.mubr.msk.f32.gmra.mrb[110].mxu0 %vm8177_vm2, %v7645_v45  ;;  %vm8183_vm2 = vcmp.eq.s32.totalorder %v6393_v60, 1  ;;  %5874 = vmatprep.subr.bf16.mxu0 %v5873_v52 }
 0x759   :  { %2880 = vmatprep.mubr.f32.mxu0 %v7634_v46  ;;  %v3176_v46 = vld [vmem:[#allocation2 + $0xb98] sm:$0xff]  ;;  %5876 = vmatpush3.bf16.msra.mxu0 %v5873_v52  ;;  %v3163_v52 = vld [vmem:[#allocation2 + $0xb30] sm:$0xff] }
 0x75a   :  { %v5877_v45 = vpack.c.bf16 %v3176_v46, %v3175_v13  ;;  %v3164_v46 = vld [vmem:[#allocation2 + $0xb38] sm:$0xff] }
 0x75c   :  { %3977 = vmatmul.mubr.msk.f32.gmra.mrb[112].mxu0 %vm8178_vm15, %v7658_v59  ;;  %vm8184_vm15 = vcmp.eq.s32.totalorder %v6447_v5, 1  ;;  %5878 = vmatprep.subr.bf16.mxu0 %v5877_v45  ;;  %v3178_v59 = vld [vmem:[#allocation2 + $0xba8] sm:$0xff] }
 0x75d   :  { %2885 = vmatprep.mubr.f32.mxu0 %v7651_v40  ;;  %5880 = vmatpush3.bf16.msra.mxu0 %v5877_v45  ;;  %v3177_v40 = vld [vmem:[#allocation2 + $0xba0] sm:$0xff]  ;;  %v3147_v45 = vld [vmem:[#allocation2 + $0xab0] sm:$0xff]  ;;  %v3536_v5 = vld [vmem:[#allocation4 + $0x28] sm:$0xff] }
 0x760   :  { %3978 = vmatmul.mubr.msk.f32.gmra.mrb[114].mxu0 %vm8179_vm9, %v7671_v17  ;;  %vm8185_vm9 = vcmp.eq.s32.totalorder %v6466_v25, 1  ;;  %v3179_v17 = vld [vmem:[#allocation2 + $0xbb0] sm:$0xff]  ;;  %v5930_v25 = vpack.c.bf16 %v3536_v5, %v3535_v61 }
 0x761   :  { %2890 = vmatprep.mubr.f32.mxu0 %v7664_v12  ;;  %v5881_v12 = vpack.c.bf16 %v3178_v59, %v3177_v40  ;;  %v5853_v40 = vpack.c.bf16 %v3164_v46, %v3163_v52  ;;  %v3148_v59 = vld [vmem:[#allocation2 + $0xab8] sm:$0xff] }
 0x763   :  { %5882 = vmatprep.subr.bf16.mxu0 %v5881_v12 }
 0x764   :  { %3979 = vmatmul.mubr.msk.f32.gmra.mrb[116].mxu0 %vm8180_vm11, %v7685_v27  ;;  %vm8186_vm11 = vcmp.eq.s32.totalorder %v6489_v36, 1  ;;  %v3537_v36 = vld [vmem:[#allocation4 + $0x30] sm:$0xff] }
 0x765   :  { %2895 = vmatprep.mubr.f32.mxu0 %v7678_v15  ;;  %5884 = vmatpush3.bf16.msra.mxu0 %v5881_v12  ;;  %v3180_v15 = vld [vmem:[#allocation2 + $0xbb8] sm:$0xff]  ;;  %v5855_v12 = vpack.c.bf16 %v3148_v59, %v3147_v45  ;;  %v7810_v45 = vld [vmem:[#allocation6 + $0x6] ss:$0 sm:$0xff] }
 0x766   :  { %v5885_v27 = vpack.c.bf16 %v3180_v15, %v3179_v17  ;;  %v3165_v17 = vld [vmem:[#allocation2 + $0xb40] sm:$0xff]  ;;  %v3166_v15 = vld [vmem:[#allocation2 + $0xb48] sm:$0xff] }
 0x768   :  { %3980 = vmatmul.mubr.msk.f32.gmra.mrb[118].mxu0 %vm8181_vm0, %v7699_v28  ;;  %vm8187_vm0 = vcmp.eq.s32.totalorder %v6535_v55, 1  ;;  %5886 = vmatprep.subr.bf16.mxu0 %v5885_v27  ;;  %v3182_v28 = vld [vmem:[#allocation2 + $0xbc8] sm:$0xff]  ;;  %v3538_v55 = vld [vmem:[#allocation4 + $0x38] sm:$0xff] }
 0x769   :  { %2900 = vmatprep.mubr.f32.mxu0 %v7692_v38  ;;  %5888 = vmatpush3.bf16.msra.mxu0 %v5885_v27  ;;  %v3181_v38 = vld [vmem:[#allocation2 + $0xbc0] sm:$0xff] }
 0x76a   :  { %v3149_v27 = vld [vmem:[#allocation2 + $0xac0] sm:$0xff] }
 0x76c   :  { %3981 = vmatmul.mubr.msk.f32.gmra.mrb[120].mxu0 %vm8182_vm14, %v2697_v35  ;;  %v3183_v35 = vld [vmem:[#allocation2 + $0xbd0] sm:$0xff] }
 0x76d   :  { %2905 = vmatprep.mubr.f32.mxu0 %v7706_v2  ;;  %v5889_v2 = vpack.c.bf16 %v3182_v28, %v3181_v38  ;;  %v5857_v38 = vpack.c.bf16 %v3166_v15, %v3165_v17  ;;  %v3150_v28 = vld [vmem:[#allocation2 + $0xac8] sm:$0xff] }
 0x76f   :  { %5890 = vmatprep.subr.bf16.mxu0 %v5889_v2 }
 0x770   :  { %3982 = vmatmul.mubr.msk.f32.gmra.mrb[122].mxu0 %vm8183_vm2, %v2696_v18 }
 0x771   :  { %2910 = vmatprep.mubr.f32.mxu0 %v2676_v39  ;;  %5892 = vmatpush3.bf16.msra.mxu0 %v5889_v2  ;;  %v3184_v39 = vld [vmem:[#allocation2 + $0xbd8] sm:$0xff]  ;;  %v5859_v2 = vpack.c.bf16 %v3150_v28, %v3149_v27 }
 0x772   :  { %v5893_v18 = vpack.c.bf16 %v3184_v39, %v3183_v35  ;;  %v3167_v35 = vld [vmem:[#allocation2 + $0xb50] sm:$0xff]  ;;  %v3168_v39 = vld [vmem:[#allocation2 + $0xb58] sm:$0xff] }
 0x774   :  { %3983 = vmatmul.mubr.msk.f32.gmra.mrb[124].mxu0 %vm8184_vm15, %v2695_v0  ;;  %v3186_v0 = vld [vmem:[#allocation2 + $0xbe8] sm:$0xff]  ;;  %5894 = vmatprep.subr.bf16.mxu0 %v5893_v18 }
 0x775   :  { %2915 = vmatprep.mubr.f32.mxu0 %v2677_v6  ;;  %v3185_v6 = vld [vmem:[#allocation2 + $0xbe0] sm:$0xff]  ;;  %5896 = vmatpush3.bf16.msra.mxu0 %v5893_v18  ;;  %v3151_v18 = vld [vmem:[#allocation2 + $0xad0] sm:$0xff] }
 0x776   :  { %v5897_v56 = vpack.c.bf16 %v3186_v0, %v3185_v6  ;;  %v5861_v6 = vpack.c.bf16 %v3168_v39, %v3167_v35  ;;  %v3152_v0 = vld [vmem:[#allocation2 + $0xad8] sm:$0xff] }
 0x778   :  { %3984 = vmatmul.mubr.msk.f32.gmra.mrb[126].mxu0 %vm8185_vm9, %v2694_v50  ;;  %5898 = vmatprep.subr.bf16.mxu0 %v5897_v56  ;;  %v3141_v50 = vld [vmem:[#allocation2 + $0xa80] sm:$0xff] }
 0x779   :  { %2920 = vmatprep.mubr.f32.mxu0 %v2678_v33  ;;  %v5901_v33 = vpack.c.bf16 %v3188_v62, %v3187_v7  ;;  %5900 = vmatpush3.bf16.msra.mxu0 %v5897_v56  ;;  %v5843_v19 = vpack.c.bf16 %v3142_v47, %v3141_v50  ;;  %v3169_v56 = vld [vmem:[#allocation2 + $0xb60] sm:$0xff]  ;;  %v3170_v7 = vld [vmem:[#allocation2 + $0xb68] sm:$0xff]  ;;  %v5863_v62 = vpack.c.bf16 %v3152_v0, %v3151_v18  ;;  %v3171_v50 = vld [vmem:[#allocation2 + $0xb70] sm:$0xff] }
 0x77a   :  { %v5867_v47 = vpack.c.bf16 %v3154_v11, %v3153_v21 }
 0x77b   :  { %5902 = vmatprep.subr.bf16.mxu0 %v5901_v33  ;;  %5844 = vmatpush3.bf16.msra.mxu1 %v5843_v19  ;;  %v5869_v19 = vpack.c.bf16 %v3172_v24, %v3171_v50 }
 0x77c   :  { %3985 = vmatmul.mubr.msk.f32.gmra.mrb[128].mxu0 %vm8186_vm11, %v2693_v4  ;;  %v3143_v4 = vld [vmem:[#allocation2 + $0xa90] sm:$0xff] }
 0x77d   :  { %2925 = vmatprep.mubr.f32.mxu0 %v2679_v37  ;;  %5904 = vmatpush3.bf16.msra.mxu0 %v5901_v33  ;;  %v3159_v37 = vld [vmem:[#allocation2 + $0xb10] sm:$0xff]  ;;  %v5847_v58 = vpack.c.bf16 %v3144_v23, %v3143_v4  ;;  %v5865_v33 = vpack.c.bf16 %v3170_v7, %v3169_v56 }
 0x77e   :  { %v5845_v41 = vpack.c.bf16 %v3160_v9, %v3159_v37  ;;  %v3155_v37 = vld [vmem:[#allocation2 + $0xaf0] sm:$0xff]  ;;  %v3156_v9 = vld [vmem:[#allocation2 + $0xaf8] sm:$0xff]  ;;  %5905 = vmatprep.subr.bf16.mxu0 %v6148_v32 }
 0x77f   :  { %v5871_v4 = vpack.c.bf16 %v3156_v9, %v3155_v37 }
 0x780   :  { %3986 = vmatmul.mubr.msk.f32.gmra.mrb[130].mxu0 %vm8187_vm0, %v2692_v20  ;;  %5846 = vmatprep.subr.bf16.mxu1 %v5845_v41  ;;  %v3145_v20 = vld [vmem:[#allocation2 + $0xaa0] sm:$0xff] }
 0x781   :  { %5848 = vmatpush3.bf16.msra.mxu1 %v5847_v58  ;;  %v5851_v13 = vpack.c.bf16 %v3146_v51, %v3145_v20 }
 0x782   :  { %5850 = vmatprep.subr.bf16.mxu1 %v5849_v30 }
 0x785   :  { %5852 = vmatpush3.bf16.msra.mxu1 %v5851_v13 }
 0x786   :  { %5854 = vmatprep.subr.bf16.mxu1 %v5853_v40 }
 0x789   :  { %5856 = vmatpush3.bf16.msra.mxu1 %v5855_v12 }
 0x78a   :  { %5858 = vmatprep.subr.bf16.mxu1 %v5857_v38 }
 0x78d   :  { %5860 = vmatpush3.bf16.msra.mxu1 %v5859_v2 }
 0x78e   :  { %5862 = vmatprep.subr.bf16.mxu1 %v5861_v6 }
 0x791   :  { %5864 = vmatpush3.bf16.msra.mxu1 %v5863_v62 }
 0x792   :  { %5866 = vmatprep.subr.bf16.mxu1 %v5865_v33 }
 0x795   :  { %5868 = vmatpush3.bf16.msra.mxu1 %v5867_v47 }
 0x796   :  { %5870 = vmatprep.subr.bf16.mxu1 %v5869_v19 }
 0x799   :  { %5872 = vmatpush3.bf16.msra.mxu1 %v5871_v4 }
 0x79a   :  { %5923 = vmatprep.subr.bf16.mxu1 %v6148_v32 }
 0x803   :  { %v5195_v41 = vpop.f32.mrb[108].mxu1 }
 0x804   :  { %v2997_v23 = vpop.f32.mrb[109].mxu1 }
 0x80b   :  { %v5198_v58 = vpop.f32.mrb[110].mxu1 }
 0x80c   :  { %v3007_v29 = vpop.f32.mrb[111].mxu1 }
 0x813   :  { %v7800_v31 = vpop.f32.mrb[112].mxu1 }
 0x814   :  { %v3017_v20 = vpop.f32.mrb[113].mxu1 }
 0x81b   :  { %v7802_v30 = vpop.f32.mrb[114].mxu1 }
 0x81c   :  { %v7804_v51 = vpop.f32.mrb[115].mxu1 }
 0x823   :  { %v7806_v13 = vpop.f32.mrb[116].mxu1 }
 0x824   :  { %v7808_v52 = vpop.f32.mrb[117].mxu1 }
 0x827   :  { %v4637_v46 = vpop.f32.mrb[108].mxu0 }
 0x828   :  { %v4638_v40 = vpop.f32.mrb[109].mxu0  ;;  %v7812_v59 = vpop.f32.mrb[118].mxu1 }
 0x829   :  { %v4639_v12 = vadd.f32 %v4638_v40, %v4637_v46  ;;  %v7814_v17 = vpop.f32.mrb[119].mxu1 }
 0x82b   :  { %v2873_v15 = vadd.f32 %v4639_v12, %v7810_v45  ;;  %v4640_v27 = vpop.f32.mrb[110].mxu0 }
 0x82c   :  { %v4641_v38 = vpop.f32.mrb[111].mxu0 }
 0x82d   :  { %v4642_v28 = vadd.f32 %v4641_v38, %v4640_v27  ;;  %v2998_v2 = vadd.f32 %v2997_v23, %v2873_v15 }
 0x82f   :  { %v2878_v35 = vadd.f32 %v4642_v28, %v7810_v45  ;;  %v4643_v39 = vpop.f32.mrb[112].mxu0  ;;  %v7818_v18 = vmax.f32 %v2998_v2, 0.0 }
 0x830   :  { %v4644_v6 = vpop.f32.mrb[113].mxu0 }
 0x831   :  { %v3003_v0 = vadd.f32 %v5195_v41, %v2878_v35  ;;  %v4645_v56 = vadd.f32 %v4644_v6, %v4643_v39  ;;  %3258 = vmatprep.mubr.f32.mxu1 %v7818_v18  ;;  %v3068_v21 = vrot.slane %v7818_v18, 7  ;;  %v3104_v50 = vrot.slane %v7818_v18, 1 }
 0x833   :  { %v7821_v7 = vmax.f32 %v3003_v0, 0.0  ;;  %v2883_v62 = vadd.f32 %v4645_v56, %v7810_v45  ;;  %v4646_v33 = vpop.f32.mrb[114].mxu0 }
 0x834   :  { %v4647_v11 = vpop.f32.mrb[115].mxu0 }
 0x835   :  { %v3008_v24 = vadd.f32 %v3007_v29, %v2883_v62  ;;  %v4648_v47 = vadd.f32 %v4647_v11, %v4646_v33  ;;  %v3105_v19 = vrot.slane %v7821_v7, 1  ;;  %v3069_v37 = vrot.slane %v7821_v7, 7 }
 0x837   :  { %v7828_v9 = vmax.f32 %v3008_v24, 0.0  ;;  %v2888_v4 = vadd.f32 %v4648_v47, %v7810_v45  ;;  %v4649_v41 = vpop.f32.mrb[116].mxu0  ;;  %v3126_v23 = vsel %vm236_vm1, %v3104_v50, %v3105_v19  ;;  %v7839_v29 = vsel %vm139_vm12, %v3068_v21, %v3069_v37 }
 0x838   :  { %v4650_v46 = vpop.f32.mrb[117].mxu0  ;;  %5243 = vmatprep.mubr.msk.f32.mxu0 %vm285_vm4, %v3126_v23  ;;  %vm8189_vm4 = vcmp.eq.s32.totalorder %v6545_v63, 1 }
 0x839   :  { %v3106_v40 = vrot.slane %v7828_v9, 1  ;;  %v3013_v12 = vadd.f32 %v5198_v58, %v2888_v4  ;;  %v4651_v15 = vadd.f32 %v4650_v46, %v4649_v41  ;;  %v3070_v27 = vrot.slane %v7828_v9, 7 }
 0x83b   :  { %v7845_v38 = vmax.f32 %v3013_v12, 0.0  ;;  %v2893_v28 = vadd.f32 %v4651_v15, %v7810_v45  ;;  %v4652_v2 = vpop.f32.mrb[118].mxu0  ;;  %v3125_v35 = vsel %vm236_vm1, %v3105_v19, %v3106_v40  ;;  %v7852_v39 = vsel %vm139_vm12, %v3069_v37, %v3070_v27 }
 0x83c   :  { %v4653_v10 = vpop.f32.mrb[119].mxu0  ;;  %5244 = vmatmul.mubr.msk.f32.vlgmr.msra.gmra.mrb[132].mxu0 %vm286_vm3, %v3125_v35  ;;  %vm8188_vm3 = vcmp.eq.s32.totalorder %v6511_v42, 1 }
 0x83d   :  { %v3018_v58 = vadd.f32 %v3017_v20, %v2893_v28  ;;  %v4654_v6 = vadd.f32 %v4653_v10, %v4652_v2  ;;  %v3107_v0 = vrot.slane %v7845_v38, 1  ;;  %v3071_v56 = vrot.slane %v7845_v38, 7 }
 0x83f   :  { %v7858_v62 = vmax.f32 %v3018_v58, 0.0  ;;  %v2898_v33 = vadd.f32 %v4654_v6, %v7810_v45  ;;  %v4655_v11 = vpop.f32.mrb[120].mxu0  ;;  %v3124_v24 = vsel %vm236_vm1, %v3106_v40, %v3107_v0  ;;  %v7865_v47 = vsel %vm139_vm12, %v3070_v27, %v3071_v56 }
 0x840   :  { %v4656_v8 = vpop.f32.mrb[121].mxu0  ;;  %5246 = vmatprep.mubr.msk.f32.mxu0 %vm287_vm6, %v3124_v24  ;;  %vm8191_vm6 = vcmp.eq.s32.totalorder %v6559_v3, 1  ;;  %v3540_v3 = vld [vmem:[#allocation4 + $0x48] sm:$0xff] }
 0x841   :  { %v3023_v20 = vadd.f32 %v7800_v31, %v2898_v33  ;;  %v4657_v19 = vadd.f32 %v4656_v8, %v4655_v11  ;;  %v3108_v37 = vrot.slane %v7858_v62, 1  ;;  %v3072_v4 = vrot.slane %v7858_v62, 7 }
 0x843   :  { %v7872_v41 = vmax.f32 %v3023_v20, 0.0  ;;  %v2903_v23 = vadd.f32 %v4657_v19, %v7810_v45  ;;  %v4658_v46 = vpop.f32.mrb[122].mxu0  ;;  %v3123_v40 = vsel %vm236_vm1, %v3107_v0, %v3108_v37  ;;  %v7879_v12 = vsel %vm139_vm12, %v3071_v56, %v3072_v4 }
 0x844   :  { %v4659_v16 = vpop.f32.mrb[123].mxu0  ;;  %5247 = vmatmul.mubr.msk.f32.gmra.mrb[134].mxu0 %vm288_vm8, %v3123_v40  ;;  %vm8193_vm8 = vcmp.eq.s32.totalorder %v6367_v49, 1  ;;  %v3533_v49 = vld [vmem:[#allocation4 + $0x10] sm:$0xff] }
 0x845   :  { %v3028_v31 = vadd.f32 %v7804_v51, %v2903_v23  ;;  %v4660_v15 = vadd.f32 %v4659_v16, %v4658_v46  ;;  %v3109_v27 = vrot.slane %v7872_v41, 1  ;;  %v3073_v28 = vrot.slane %v7872_v41, 7 }
 0x847   :  { %v7886_v2 = vmax.f32 %v3028_v31, 0.0  ;;  %v2908_v35 = vadd.f32 %v4660_v15, %v7810_v45  ;;  %v4661_v10 = vpop.f32.mrb[124].mxu0  ;;  %v3122_v58 = vsel %vm236_vm1, %v3108_v37, %v3109_v27  ;;  %v7893_v6 = vsel %vm139_vm12, %v3072_v4, %v3073_v28 }
 0x848   :  { %v4662_v26 = vpop.f32.mrb[125].mxu0  ;;  %5249 = vmatprep.mubr.msk.f32.mxu0 %vm289_vm10, %v3122_v58  ;;  %vm8197_vm10 = vcmp.eq.s32.totalorder %v6377_v53, 1 }
 0x849   :  { %v3033_v51 = vadd.f32 %v7802_v30, %v2908_v35  ;;  %v4663_v0 = vadd.f32 %v4662_v26, %v4661_v10  ;;  %v3110_v56 = vrot.slane %v7886_v2, 1  ;;  %v3074_v33 = vrot.slane %v7886_v2, 7 }
 0x84b   :  { %v7900_v11 = vmax.f32 %v3033_v51, 0.0  ;;  %v2913_v24 = vadd.f32 %v4663_v0, %v7810_v45  ;;  %v4664_v8 = vpop.f32.mrb[126].mxu0  ;;  %v3121_v20 = vsel %vm236_vm1, %v3109_v27, %v3110_v56  ;;  %v3085_v19 = vsel %vm139_vm12, %v3073_v28, %v3074_v33 }
 0x84c   :  { %v4665_v34 = vpop.f32.mrb[127].mxu0  ;;  %5250 = vmatmul.mubr.msk.f32.gmra.mrb[136].mxu0 %vm290_vm7, %v3121_v20  ;;  %vm8192_vm7 = vcmp.eq.s32.totalorder %v6553_v1, 1  ;;  %v3539_v1 = vld [vmem:[#allocation4 + $0x40] sm:$0xff] }
 0x84d   :  { %v3038_v30 = vadd.f32 %v7808_v52, %v2913_v24  ;;  %v4666_v37 = vadd.f32 %v4665_v34, %v4664_v8  ;;  %v3111_v4 = vrot.slane %v7900_v11, 1  ;;  %v3075_v23 = vrot.slane %v7900_v11, 7 }
 0x84e   :  { %v5936_v18 = vpack.c.bf16 %v3540_v3, %v3539_v1 }
 0x84f   :  { %v3064_v46 = vmax.f32 %v3038_v30, 0.0  ;;  %v2918_v40 = vadd.f32 %v4666_v37, %v7810_v45  ;;  %v4667_v16 = vpop.f32.mrb[128].mxu0  ;;  %v3120_v31 = vsel %vm236_vm1, %v3110_v56, %v3111_v4  ;;  %v3084_v15 = vsel %vm139_vm12, %v3074_v33, %v3075_v23 }
 0x850   :  { %v4668_v27 = vpop.f32.mrb[129].mxu0  ;;  %5252 = vmatprep.mubr.msk.f32.mxu0 %vm291_vm5, %v3120_v31  ;;  %vm8190_vm5 = vcmp.eq.s32.totalorder %v6538_v57, 1  ;;  %v5933_v57 = vpack.c.bf16 %v3538_v55, %v3537_v36 }
 0x851   :  { %v3043_v14 = vadd.f32 %v7806_v13, %v2918_v40  ;;  %v4669_v52 = vadd.f32 %v4668_v27, %v4667_v16  ;;  %v3112_v28 = vrot.slane %v3064_v46, 1  ;;  %v3076_v35 = vrot.slane %v3064_v46, 7 }
 0x853   :  { %v3065_v10 = vmax.f32 %v3043_v14, 0.0  ;;  %v2923_v58 = vadd.f32 %v4669_v52, %v7810_v45  ;;  %v4670_v26 = vpop.f32.mrb[130].mxu0  ;;  %v3119_v51 = vsel %vm236_vm1, %v3111_v4, %v3112_v28  ;;  %v3083_v0 = vsel %vm139_vm12, %v3075_v23, %v3076_v35 }
 0x854   :  { %v4671_v56 = vpop.f32.mrb[131].mxu0  ;;  %5253 = vmatmul.mubr.msk.f32.gmra.mrb[138].mxu0 %vm8188_vm3, %v3119_v51  ;;  %vm6149_vm3 = vmmov 0  }
 0x855   :  { %v3048_v22 = vadd.f32 %v7814_v17, %v2923_v58  ;;  %v4672_v13 = vadd.f32 %v4671_v56, %v4670_v26  ;;  %v3113_v33 = vrot.slane %v3065_v10, 1  ;;  %v3077_v24 = vrot.slane %v3065_v10, 7 }
 0x857   :  { %v3066_v8 = vmax.f32 %v3048_v22, 0.0  ;;  %v2928_v20 = vadd.f32 %v4672_v13, %v7810_v45  ;;  %v3118_v34 = vsel %vm236_vm1, %v3112_v28, %v3113_v33  ;;  %v3082_v30 = vsel %vm139_vm12, %v3076_v35, %v3077_v24  ;;  %v8014_v35 = vld [vmem:[#allocation6 + $0x7] ss:$0 sm:$0xff] }
 0x858   :  { %5255 = vmatprep.mubr.msk.f32.mxu0 %vm8189_vm4, %v3118_v34  ;;  %vm3457_vm4 = vcmask 785408  }
 0x859   :  { %v3053_v42 = vadd.f32 %v7812_v59, %v2928_v20  ;;  %v3114_v37 = vrot.slane %v3066_v8, 1  ;;  %v3078_v4 = vrot.slane %v3066_v8, 7 }
 0x85b   :  { %v3067_v17 = vmax.f32 %v3053_v42, 0.0  ;;  %v3117_v23 = vsel %vm236_vm1, %v3113_v33, %v3114_v37  ;;  %v3081_v45 = vsel %vm139_vm12, %v3077_v24, %v3078_v4 }
 0x85c   :  { %5256 = vmatmul.mubr.msk.f32.gmra.mrb[140].mxu0 %vm8190_vm5, %v3117_v23 }
 0x85d   :  { %v3079_v40 = vrot.slane %v3067_v17, 7  ;;  %v3115_v16 = vrot.slane %v3067_v17, 1 }
 0x85f   :  { %v3091_v63 = vsel %vm139_vm12, %v3079_v40, %v3068_v21  ;;  %v3116_v59 = vsel %vm236_vm1, %v3114_v37, %v3115_v16  ;;  %v3127_v31 = vsel %vm236_vm1, %v3115_v16, %v3104_v50  ;;  %v3080_v27 = vsel %vm139_vm12, %v3078_v4, %v3079_v40  ;;  %v3542_v21 = vld [vmem:[#allocation4 + $0x58] sm:$0xff] }
 0x860   :  { %4000 = vmatmul.mubr.msk.f32.vlgmr.msra.gmra.mrb[120].mxu1 %vm200_vm13, %v3091_v63  ;;  %5258 = vmatprep.mubr.msk.f32.mxu0 %vm8191_vm6, %v3116_v59  ;;  %vm8194_vm12 = vcmp.eq.s32.totalorder %v6353_v43, 1  ;;  %vm8195_vm13 = vcmp.eq.s32.totalorder %v6365_v48, 1  ;;  %vm8196_vm1 = vcmp.eq.s32.totalorder %v6379_v54, 1  ;;  %v6150_v43 = vmov 0.0   ;;  %v3532_v48 = vld [vmem:[#allocation4 + $0x8] sm:$0xff]  ;;  %v3534_v54 = vld [vmem:[#allocation4 + $0x18] sm:$0xff] }
 0x861   :  { %3263 = vmatprep.mubr.f32.mxu1 %v7821_v7  ;;  %5259 = vmatmul.mubr.msk.f32.gmra.mrb[142].mxu0 %vm8192_vm7, %v3127_v31  ;;  %v5924_v53 = vpack.c.bf16 %v3532_v48, %v3531_v44  ;;  %v5927_v60 = vpack.c.bf16 %v3534_v54, %v3533_v49  ;;  %v3541_v7 = vld [vmem:[#allocation4 + $0x50] sm:$0xff] }
 0x862   :  { %5285 = vmatprep.mubr.msk.f32.mxu0 %vm6149_vm3, %v6150_v43  ;;  %v5939_v50 = vpack.c.bf16 %v3542_v21, %v3541_v7 }
 0x863   :  { %5925 = vmatpush3.bf16.msra.mxu1 %v5924_v53 }
 0x864   :  { %4001 = vmatmul.mubr.msk.f32.gmra.mrb[122].mxu1 %vm8193_vm8, %v7839_v29  ;;  %5926 = vmatprep.subr.bf16.mxu1 %v6148_v32  ;;  %v3544_v29 = vld [vmem:[#allocation4 + $0x68] sm:$0xff] }
 0x865   :  { %3268 = vmatprep.mubr.f32.mxu1 %v7828_v9  ;;  %v3543_v9 = vld [vmem:[#allocation4 + $0x60] sm:$0xff] }
 0x867   :  { %5928 = vmatpush3.bf16.msra.mxu1 %v5927_v60 }
 0x868   :  { %4002 = vmatmul.mubr.msk.f32.gmra.mrb[124].mxu1 %vm8194_vm12, %v7852_v39  ;;  %5929 = vmatprep.subr.bf16.mxu1 %v6148_v32  ;;  %v3545_v39 = vld [vmem:[#allocation4 + $0x70] sm:$0xff] }
 0x869   :  { %3273 = vmatprep.mubr.f32.mxu1 %v7845_v38  ;;  %v5942_v38 = vpack.c.bf16 %v3544_v29, %v3543_v9 }
 0x86b   :  { %5931 = vmatpush3.bf16.msra.mxu1 %v5930_v25 }
 0x86c   :  { %4003 = vmatmul.mubr.msk.f32.gmra.mrb[126].mxu1 %vm8195_vm13, %v7865_v47  ;;  %5932 = vmatprep.subr.bf16.mxu1 %v6148_v32 }
 0x86d   :  { %3278 = vmatprep.mubr.f32.mxu1 %v7858_v62  ;;  %v3546_v62 = vld [vmem:[#allocation4 + $0x78] sm:$0xff] }
 0x86e   :  { %v5945_v47 = vpack.c.bf16 %v3546_v62, %v3545_v39 }
 0x86f   :  { %5934 = vmatpush3.bf16.msra.mxu1 %v5933_v57 }
 0x870   :  { %4004 = vmatmul.mubr.msk.f32.gmra.mrb[128].mxu1 %vm8196_vm1, %v7879_v12  ;;  %5935 = vmatprep.subr.bf16.mxu1 %v6148_v32 }
 0x871   :  { %3283 = vmatprep.mubr.f32.mxu1 %v7872_v41 }
 0x873   :  { %5937 = vmatpush3.bf16.msra.mxu1 %v5936_v18 }
 0x874   :  { %4005 = vmatmul.mubr.msk.f32.gmra.mrb[130].mxu1 %vm8197_vm10, %v7893_v6  ;;  %5938 = vmatprep.subr.bf16.mxu1 %v6148_v32 }
 0x875   :  { %3288 = vmatprep.mubr.f32.mxu1 %v7886_v2 }
 0x877   :  { %5940 = vmatpush3.bf16.msra.mxu1 %v5939_v50 }
 0x878   :  { %4006 = vmatmul.mubr.msk.f32.gmra.mrb[132].mxu1 %vm8182_vm14, %v3085_v19  ;;  %5941 = vmatprep.subr.bf16.mxu1 %v6148_v32 }
 0x879   :  { %3293 = vmatprep.mubr.f32.mxu1 %v7900_v11 }
 0x87b   :  { %5943 = vmatpush3.bf16.msra.mxu1 %v5942_v38 }
 0x87c   :  { %4007 = vmatmul.mubr.msk.f32.gmra.mrb[134].mxu1 %vm8183_vm2, %v3084_v15  ;;  %5944 = vmatprep.subr.bf16.mxu1 %v6148_v32 }
 0x87d   :  { %3298 = vmatprep.mubr.f32.mxu1 %v3064_v46 }
 0x87f   :  { %5946 = vmatpush3.bf16.msra.mxu1 %v5945_v47 }
 0x880   :  { %4008 = vmatmul.mubr.msk.f32.gmra.mrb[136].mxu1 %vm8184_vm15, %v3083_v0  ;;  %5971 = vmatprep.subr.bf16.mxu1 %v6148_v32 }
 0x881   :  { %3303 = vmatprep.mubr.f32.mxu1 %v3065_v10 }
 0x884   :  { %4009 = vmatmul.mubr.msk.f32.gmra.mrb[138].mxu1 %vm8185_vm9, %v3082_v30 }
 0x885   :  { %3308 = vmatprep.mubr.f32.mxu1 %v3066_v8 }
 0x888   :  { %4010 = vmatmul.mubr.msk.f32.gmra.mrb[140].mxu1 %vm8186_vm11, %v3081_v45 }
 0x889   :  { %3313 = vmatprep.mubr.f32.mxu1 %v3067_v17 }
 0x88c   :  { %4011 = vmatmul.mubr.msk.f32.gmra.mrb[142].mxu1 %vm8187_vm0, %v3080_v27 }
 0x88d   :  { %5320 = vmatprep.mubr.msk.f32.mxu1 %vm6149_vm3, %v6150_v43 }
 0x90f   :  { %v5245_v41 = vpop.f32.mrb[132].mxu0 }
 0x910   :  { %v3385_v12 = vpop.f32.mrb[133].mxu0 }
 0x917   :  { %v5248_v2 = vpop.f32.mrb[134].mxu0 }
 0x918   :  { %v3395_v6 = vpop.f32.mrb[135].mxu0 }
 0x91f   :  { %v5251_v11 = vpop.f32.mrb[136].mxu0 }
 0x920   :  { %v3405_v19 = vpop.f32.mrb[137].mxu0 }
 0x927   :  { %v8008_v46 = vpop.f32.mrb[138].mxu0 }
 0x928   :  { %v3415_v15 = vpop.f32.mrb[139].mxu0 }
 0x92f   :  { %v8010_v14 = vpop.f32.mrb[140].mxu0 }
 0x930   :  { %v8012_v52 = vpop.f32.mrb[141].mxu0 }
 0x933   :  { %v4733_v28 = vpop.f32.mrb[120].mxu1 }
 0x934   :  { %v4734_v10 = vpop.f32.mrb[121].mxu1  ;;  %v8016_v58 = vpop.f32.mrb[142].mxu0 }
 0x935   :  { %v4735_v26 = vadd.f32 %v4734_v10, %v4733_v28  ;;  %v8018_v51 = vpop.f32.mrb[143].mxu0 }
 0x937   :  { %v3261_v0 = vadd.f32 %v4735_v26, %v8014_v35  ;;  %v4736_v56 = vpop.f32.mrb[122].mxu1 }
 0x938   :  { %v4737_v22 = vpop.f32.mrb[123].mxu1 }
 0x939   :  { %v3386_v13 = vadd.f32 %v3385_v12, %v3261_v0  ;;  %v4738_v33 = vadd.f32 %v4737_v22, %v4736_v56 }
 0x93b   :  { %v3266_v24 = vadd.f32 %v4738_v33, %v8014_v35  ;;  %v4739_v8 = vpop.f32.mrb[124].mxu1  ;;  %v3444_v42 = vmax.f32 %v3386_v13, 0.0 }
 0x93c   :  { %v4740_v20 = vpop.f32.mrb[125].mxu1 }
 0x93d   :  { %v3391_v34 = vadd.f32 %v5245_v41, %v3266_v24  ;;  %v4741_v30 = vadd.f32 %v4740_v20, %v4739_v8 }
 0x93f   :  { %v3445_v37 = vmax.f32 %v3391_v34, 0.0  ;;  %v3271_v4 = vadd.f32 %v4741_v30, %v8014_v35  ;;  %v4742_v17 = vpop.f32.mrb[126].mxu1 }
 0x940   :  { %v4743_v23 = vpop.f32.mrb[127].mxu1 }
 0x941   :  { %v5906_v45 = vpack.c.bf16 %v3445_v37, %v3444_v42  ;;  %v3396_v40 = vadd.f32 %v3395_v6, %v3271_v4  ;;  %v4744_v16 = vadd.f32 %v4743_v23, %v4742_v17 }
 0x943   :  { %v3276_v63 = vadd.f32 %v4744_v16, %v8014_v35  ;;  %v4745_v59 = vpop.f32.mrb[128].mxu1  ;;  %5907 = vmatpush3.bf16.msra.mxu0 %v5906_v45  ;;  %v3446_v48 = vmax.f32 %v3396_v40, 0.0  ;;  %v3456_v40 = vld [vmem:[#allocation9] sm:$0xf]  ;;  %v3625_v16 = vld [vmem:[#allocation4 + $0x88] sm:$0xff] }
 0x944   :  { %v4746_v31 = vpop.f32.mrb[129].mxu1  ;;  %5908 = vmatprep.subr.bf16.mxu0 %v6148_v32 }
 0x945   :  { %v3401_v27 = vadd.f32 %v5248_v2, %v3276_v63  ;;  %v4747_v44 = vadd.f32 %v4746_v31, %v4745_v59  ;;  %v3627_v59 = vld [vmem:[#allocation4 + $0x98] sm:$0xff] }
 0x947   :  { %v3447_v49 = vmax.f32 %v3401_v27, 0.0  ;;  %v3281_v53 = vadd.f32 %v4747_v44, %v8014_v35  ;;  %v4748_v54 = vpop.f32.mrb[130].mxu1  ;;  %v3629_v27 = vld [vmem:[#allocation4 + $0xa8] sm:$0xff] }
 0x948   :  { %v4749_v60 = vpop.f32.mrb[131].mxu1 }
 0x949   :  { %v5909_v61 = vpack.c.bf16 %v3447_v49, %v3446_v48  ;;  %v3406_v5 = vadd.f32 %v3405_v19, %v3281_v53  ;;  %v4750_v25 = vadd.f32 %v4749_v60, %v4748_v54  ;;  %v3630_v48 = vld [vmem:[#allocation4 + $0xb0] sm:$0xff]  ;;  %v3631_v49 = vld [vmem:[#allocation4 + $0xb8] sm:$0xff]  ;;  %v3632_v54 = vld [vmem:[#allocation4 + $0xc0] sm:$0xff] }
 0x94a   :  { %v5957_v53 = vpack.c.bf16 %v3631_v49, %v3630_v48  ;;  %v3633_v60 = vld [vmem:[#allocation4 + $0xc8] sm:$0xff] }
 0x94b   :  { %v3286_v36 = vadd.f32 %v4750_v25, %v8014_v35  ;;  %v4751_v55 = vpop.f32.mrb[132].mxu1  ;;  %5910 = vmatpush3.bf16.msra.mxu0 %v5909_v61  ;;  %v3448_v18 = vmax.f32 %v3406_v5, 0.0  ;;  %v5960_v61 = vpack.c.bf16 %v3633_v60, %v3632_v54  ;;  %v3634_v5 = vld [vmem:[#allocation4 + $0xd0] sm:$0xff]  ;;  %v3635_v25 = vld [vmem:[#allocation4 + $0xd8] sm:$0xff] }
 0x94c   :  { %v4752_v57 = vpop.f32.mrb[133].mxu1  ;;  %5911 = vmatprep.subr.bf16.mxu0 %v6148_v32 }
 0x94d   :  { %v3411_v1 = vadd.f32 %v5251_v11, %v3286_v36  ;;  %v4753_v3 = vadd.f32 %v4752_v57, %v4751_v55  ;;  %v5963_v36 = vpack.c.bf16 %v3635_v25, %v3634_v5  ;;  %v3636_v55 = vld [vmem:[#allocation4 + $0xe0] sm:$0xff]  ;;  %v3637_v57 = vld [vmem:[#allocation4 + $0xe8] sm:$0xff] }
 0x94f   :  { %v3449_v7 = vmax.f32 %v3411_v1, 0.0  ;;  %v3291_v21 = vadd.f32 %v4753_v3, %v8014_v35  ;;  %v4754_v50 = vpop.f32.mrb[134].mxu1  ;;  %v5966_v1 = vpack.c.bf16 %v3637_v57, %v3636_v55 }
 0x950   :  { %v4755_v9 = vpop.f32.mrb[135].mxu1 }
 0x951   :  { %v5912_v29 = vpack.c.bf16 %v3449_v7, %v3448_v18  ;;  %v3416_v38 = vadd.f32 %v3415_v15, %v3291_v21  ;;  %v4756_v39 = vadd.f32 %v4755_v9, %v4754_v50  ;;  %v3638_v7 = vld [vmem:[#allocation4 + $0xf0] sm:$0xff]  ;;  %v3639_v21 = vld [vmem:[#allocation4 + $0xf8] sm:$0xff]  ;;  %v3717_v9 = vld [vmem:[#allocation4 + $0x100] sm:$0xff] }
 0x952   :  { %v5969_v50 = vpack.c.bf16 %v3639_v21, %v3638_v7 }
 0x953   :  { %v3296_v62 = vadd.f32 %v4756_v39, %v8014_v35  ;;  %v4757_v47 = vpop.f32.mrb[136].mxu1  ;;  %5913 = vmatpush3.bf16.msra.mxu0 %v5912_v29  ;;  %v3450_v6 = vmax.f32 %v3416_v38, 0.0  ;;  %v3718_v29 = vld [vmem:[#allocation4 + $0x108] sm:$0xff]  ;;  %v3719_v38 = vld [vmem:[#allocation4 + $0x110] sm:$0xff] }
 0x954   :  { %v4758_v41 = vpop.f32.mrb[137].mxu1  ;;  %5914 = vmatprep.subr.bf16.mxu0 %v6148_v32  ;;  %v5972_v39 = vpack.c.bf16 %v3718_v29, %v3717_v9 }
 0x955   :  { %v3421_v12 = vadd.f32 %v8008_v46, %v3296_v62  ;;  %v4759_v2 = vadd.f32 %v4758_v41, %v4757_v47  ;;  %v3720_v62 = vld [vmem:[#allocation4 + $0x118] sm:$0xff]  ;;  %v3721_v41 = vld [vmem:[#allocation4 + $0x120] sm:$0xff] }
 0x956   :  { %v5975_v47 = vpack.c.bf16 %v3720_v62, %v3719_v38 }
 0x957   :  { %v3451_v11 = vmax.f32 %v3421_v12, 0.0  ;;  %v3301_v19 = vadd.f32 %v4759_v2, %v8014_v35  ;;  %v4760_v28 = vpop.f32.mrb[138].mxu1  ;;  %v3722_v12 = vld [vmem:[#allocation4 + $0x128] sm:$0xff] }
 0x958   :  { %v4761_v10 = vpop.f32.mrb[139].mxu1  ;;  %v5978_v2 = vpack.c.bf16 %v3722_v12, %v3721_v41 }
 0x959   :  { %v5915_v26 = vpack.c.bf16 %v3451_v11, %v3450_v6  ;;  %v3426_v15 = vadd.f32 %v8012_v52, %v3301_v19  ;;  %v4762_v0 = vadd.f32 %v4761_v10, %v4760_v28  ;;  %v3724_v6 = vld [vmem:[#allocation4 + $0x138] sm:$0xff]  ;;  %v3725_v19 = vld [vmem:[#allocation4 + $0x140] sm:$0xff]  ;;  %v3726_v28 = vld [vmem:[#allocation4 + $0x148] sm:$0xff] }
 0x95a   :  { %v5984_v10 = vpack.c.bf16 %v3726_v28, %v3725_v19 }
 0x95b   :  { %v3306_v56 = vadd.f32 %v4762_v0, %v8014_v35  ;;  %v4763_v22 = vpop.f32.mrb[140].mxu1  ;;  %5916 = vmatpush3.bf16.msra.mxu0 %v5915_v26  ;;  %v3452_v24 = vmax.f32 %v3426_v15, 0.0  ;;  %v3727_v26 = vld [vmem:[#allocation4 + $0x150] sm:$0xff]  ;;  %v3728_v15 = vld [vmem:[#allocation4 + $0x158] sm:$0xff] }
 0x95c   :  { %v4764_v13 = vpop.f32.mrb[141].mxu1  ;;  %5917 = vmatprep.subr.bf16.mxu0 %v6148_v32  ;;  %v5987_v0 = vpack.c.bf16 %v3728_v15, %v3727_v26 }
 0x95d   :  { %v3431_v46 = vadd.f32 %v8010_v14, %v3306_v56  ;;  %v4765_v33 = vadd.f32 %v4764_v13, %v4763_v22  ;;  %v3729_v56 = vld [vmem:[#allocation4 + $0x160] sm:$0xff]  ;;  %v3730_v22 = vld [vmem:[#allocation4 + $0x168] sm:$0xff] }
 0x95e   :  { %v5990_v13 = vpack.c.bf16 %v3730_v22, %v3729_v56 }
 0x95f   :  { %v3453_v8 = vmax.f32 %v3431_v46, 0.0  ;;  %v3311_v20 = vadd.f32 %v4765_v33, %v8014_v35  ;;  %v4766_v34 = vpop.f32.mrb[142].mxu1  ;;  %v4025_v46 = vld [vmem:[#allocation6 + $0xb] ss:$0 sm:$0xff] }
 0x960   :  { %v4767_v30 = vpop.f32.mrb[143].mxu1 }
 0x961   :  { %v5918_v42 = vpack.c.bf16 %v3453_v8, %v3452_v24  ;;  %v3436_v52 = vadd.f32 %v8018_v51, %v3311_v20  ;;  %v4768_v37 = vadd.f32 %v4767_v30, %v4766_v34  ;;  %v3624_v51 = vld [vmem:[#allocation4 + $0x80] sm:$0xff]  ;;  %v3731_v34 = vld [vmem:[#allocation4 + $0x170] sm:$0xff]  ;;  %v3732_v30 = vld [vmem:[#allocation4 + $0x178] sm:$0xff] }
 0x962   :  { %v5948_v63 = vpack.c.bf16 %v3625_v16, %v3624_v51 }
 0x963   :  { %v3316_v4 = vadd.f32 %v4768_v37, %v8014_v35  ;;  %5919 = vmatpush3.bf16.msra.mxu0 %v5918_v42  ;;  %v3454_v23 = vmax.f32 %v3436_v52, 0.0  ;;  %v3626_v35 = vld [vmem:[#allocation4 + $0x90] sm:$0xff]  ;;  %v5993_v42 = vpack.c.bf16 %v3732_v30, %v3731_v34  ;;  %v4026_v52 = vld [vmem:[#allocation6 + $0xc] ss:$0 sm:$0xff] }
 0x964   :  { %5920 = vmatprep.subr.bf16.mxu0 %v6148_v32  ;;  %v5951_v31 = vpack.c.bf16 %v3627_v59, %v3626_v35 }
 0x965   :  { %v3441_v17 = vadd.f32 %v8016_v58, %v3316_v4  ;;  %v3628_v58 = vld [vmem:[#allocation4 + $0xa0] sm:$0xff] }
 0x966   :  { %v5954_v44 = vpack.c.bf16 %v3629_v27, %v3628_v58 }
 0x967   :  { %v3455_v14 = vmax.f32 %v3441_v17, 0.0 }
 0x969   :  { %v5921_v45 = vpack.c.bf16 %v3455_v14, %v3454_v23  ;;  %v4027_v14 = vld [vmem:[#allocation6 + $0xd] ss:$0 sm:$0xff] }
 0x96b   :  { %5922 = vmatpush3.bf16.msra.mxu0 %v5921_v45 }
 0x96c   :  { %5947 = vmatprep.subr.bf16.mxu0 %v6148_v32 }
 0x96e   :  { %5286 = vmatmul.mubr.msk.f32.vlgmr.msra.gmra.mrb[144].mxu0 %vm3457_vm4, %v3456_v40 }
 0x96f   :  { %5355 = vmatprep.mubr.msk.f32.mxu0 %vm6149_vm3, %v6150_v43  ;;  %5949 = vmatpush3.bf16.msra.mxu0 %v5948_v63 }
 0x970   :  { %5950 = vmatprep.subr.bf16.mxu0 %v6148_v32 }
 0x973   :  { %5952 = vmatpush3.bf16.msra.mxu0 %v5951_v31 }
 0x974   :  { %5953 = vmatprep.subr.bf16.mxu0 %v6148_v32 }
 0x977   :  { %5955 = vmatpush3.bf16.msra.mxu0 %v5954_v44 }
 0x978   :  { %5956 = vmatprep.subr.bf16.mxu0 %v6148_v32 }
 0x97b   :  { %5958 = vmatpush3.bf16.msra.mxu0 %v5957_v53 }
 0x97c   :  { %5959 = vmatprep.subr.bf16.mxu0 %v6148_v32 }
 0x97f   :  { %5961 = vmatpush3.bf16.msra.mxu0 %v5960_v61 }
 0x980   :  { %5962 = vmatprep.subr.bf16.mxu0 %v6148_v32 }
 0x983   :  { %5964 = vmatpush3.bf16.msra.mxu0 %v5963_v36 }
 0x984   :  { %5965 = vmatprep.subr.bf16.mxu0 %v6148_v32 }
 0x987   :  { %5967 = vmatpush3.bf16.msra.mxu0 %v5966_v1 }
 0x988   :  { %5968 = vmatprep.subr.bf16.mxu0 %v6148_v32 }
 0x98b   :  { %5970 = vmatpush3.bf16.msra.mxu0 %v5969_v50 }
 0xa41   :  { %v3527_v3 = vpop.f32.mrb[144].mxu0 }
 0xa42   :  { %v5287_v18 = vpop.f32.mrb[145].mxu0  ;;  %5321 = vmatmul.mubr.f32.vlgmr.msra.gmra.mrb[144].mxu1 %v3527_v3 }
 0xa43   :  { %5390 = vmatprep.mubr.msk.f32.mxu1 %vm6149_vm3, %v6150_v43  ;;  %5973 = vmatpush3.bf16.msra.mxu1 %v5972_v39  ;;  %v3723_v43 = vld [vmem:[#allocation4 + $0x130] sm:$0xff] }
 0xa44   :  { %5974 = vmatprep.subr.bf16.mxu1 %v6148_v32  ;;  %v5981_v11 = vpack.c.bf16 %v3724_v6, %v3723_v43 }
 0xa47   :  { %5976 = vmatpush3.bf16.msra.mxu1 %v5975_v47 }
 0xa48   :  { %5977 = vmatprep.subr.bf16.mxu1 %v6148_v32 }
 0xa4b   :  { %5979 = vmatpush3.bf16.msra.mxu1 %v5978_v2 }
 0xa4c   :  { %5980 = vmatprep.subr.bf16.mxu1 %v6148_v32 }
 0xa4f   :  { %5982 = vmatpush3.bf16.msra.mxu1 %v5981_v11 }
 0xa50   :  { %5983 = vmatprep.subr.bf16.mxu1 %v6148_v32 }
 0xa53   :  { %5985 = vmatpush3.bf16.msra.mxu1 %v5984_v10 }
 0xa54   :  { %5986 = vmatprep.subr.bf16.mxu1 %v6148_v32 }
 0xa57   :  { %5988 = vmatpush3.bf16.msra.mxu1 %v5987_v0 }
 0xa58   :  { %5989 = vmatprep.subr.bf16.mxu1 %v6148_v32 }
 0xa5b   :  { %5991 = vmatpush3.bf16.msra.mxu1 %v5990_v13 }
 0xa5c   :  { %5992 = vmatprep.subr.bf16.mxu1 %v6148_v32 }
 0xa5f   :  { %5994 = vmatpush3.bf16.msra.mxu1 %v5993_v42 }
 0xb15   :  { %v3618_v33 = vpop.f32.mrb[144].mxu1 }
 0xb16   :  { %v3619_v24 = vadd.f32 %v4025_v46, %v3618_v33  ;;  %v5322_v8 = vpop.f32.mrb[145].mxu1 }
 0xb18   :  { %v3622_v20 = vmax.f32 %v3619_v24, 0.0 }
 0xb1a   :  { %5356 = vmatmul.mubr.f32.vlgmr.msra.gmra.mrb[146].mxu0 %v3622_v20 }
 0xbed   :  { %v3711_v37 = vpop.f32.mrb[146].mxu0 }
 0xbee   :  { %v3712_v4 = vadd.f32 %v4026_v52, %v3711_v37  ;;  %v5357_v17 = vpop.f32.mrb[147].mxu0 }
 0xbf0   :  { %v3715_v23 = vmax.f32 %v3712_v4, 0.0 }
 0xbf2   :  { %5391 = vmatmul.mubr.f32.vlgmr.msra.gmra.mrb[146].mxu1 %v3715_v23 }
 0xcc5   :  { %v3804_v45 = vpop.f32.mrb[146].mxu1 }
 0xcc6   :  { %v3805_v40 = vadd.f32 %v4027_v14, %v3804_v45  ;;  %v5392_v32 = vpop.f32.mrb[147].mxu1 }
 0xcc8   :  { %v4028_v51 = vmul.f32 -1.442695, %v3805_v40 }
 0xcca   :  { %6019 = vpow2.f32 %v4028_v51 }
 0xcd4   :  { %v6020_v16 = vpop.eup %6019 }
 0xcd5   :  { %v3811_v35 = vadd.f32 1.0, %v6020_v16 }
 0xcd7   :  { %6021 = vrcp.f32 %v3811_v35 }
 0xce1   :  { %v6022_v63 = vpop.eup %6021 }
 0xce2   :  { %3814 = vst [vmem:[%s8070_s6] sm:$0xf] %v6022_v63 }
 0xce3   :  { %3819 = vsyncpa [#allocation3], 1 }
 0xce4   :  { %3820 = vsyncpa [#allocation5], 1 }
 0xce5   :  { %3821 = vsyncpa [#allocation8], 1 }

</bundles_post_ra>
